<compile_context>
chip_gen: v5e
topology: v5e:2x2
jax: 0.10.0
libtpu: 0.0.40
codegen_flags: <defaults>
</compile_context>

<pallas_src>
import functools
import math

import jax
import jax.numpy as jnp
from jax.experimental import pallas as pl
from jax.experimental.pallas import tpu as pltpu

# ---------------------- small synthetic PsychBERT config --------------------
VOCAB = 1000
HIDDEN = 128
N_LAYERS = 2
N_HEADS = 4
HEAD_DIM = HIDDEN // N_HEADS
INTERMEDIATE = 256
MAX_POS = 64
TYPE_VOCAB = 2
NUM_LABELS = 2
LN_EPS = 1e-12
LANE = 128  # lane-dense slab width for the classifier output


def _gelu(x):
    # TODO(synk): HF BERT default is erf-based GELU; using the tanh ("gelu_new")
    # approximation for guaranteed Mosaic lowering (difference < 1e-3).
    return 0.5 * x * (1.0 + jnp.tanh(0.7978845608028654 * (x + 0.044715 * x * x * x)))


def _layernorm_f32(x, g, b, eps):
    mu = jnp.mean(x, axis=-1, keepdims=True)
    xc = x - mu
    var = jnp.mean(xc * xc, axis=-1, keepdims=True)
    return xc * jax.lax.rsqrt(var + eps) * g + b


# ------------------------------ fused Pallas kernel ---------------------------

def _fused_forward_kernel(emb_ref, mask_ref,
                          emb_ln_g_ref, emb_ln_b_ref,
                          wqkv_ref, bqkv_ref, wo_ref, bo_ref,
                          ln1_g_ref, ln1_b_ref,
                          w1_ref, b1_ref, w2_ref, b2_ref,
                          ln2_g_ref, ln2_b_ref,
                          pool_w_ref, pool_b_ref, cls_w_ref, cls_b_ref,
                          o_ref, ctx_scr,
                          *, n_layers, n_heads, head_dim, batch, seq, eps):
    """Whole PsychBERT forward (post-embedding-gather) in one VMEM-resident program."""
    hidden = n_heads * head_dim
    scale = 1.0 / math.sqrt(head_dim)

    # Embedding LayerNorm on the full (B*S, H) slab.
    x = _layernorm_f32(emb_ref[...].astype(jnp.float32),
                       emb_ln_g_ref[...], emb_ln_b_ref[...], eps)

    # Additive key mask built in-kernel from the int attention mask (B, S).
    addm = (1.0 - mask_ref[...].astype(jnp.float32)) * -1e9            # (B, S)

    for l in range(n_layers):
        # Fused QKV projection on the whole slab: bf16 MXU operands, f32 accumulation.
        qkv = jnp.dot(x.astype(jnp.bfloat16), wqkv_ref[l],
                      preferred_element_type=jnp.float32) + bqkv_ref[l]  # (B*S, 3H) f32
        qkv_bf = qkv.astype(jnp.bfloat16)

        # Per-sequence, per-head attention.  Contexts are written lane-dense into the
        # VMEM scratch at static offsets so the output projection is a single
        # full-depth (B*S, H) @ (H, H) matmul.
        for b in range(batch):
            r0 = b * seq
            m_b = addm[b:b + 1, :]                                      # (1, S)
            for h in range(n_heads):
                c0 = h * head_dim
                qh = qkv_bf[r0:r0 + seq, c0:c0 + head_dim]              # (S, D) bf16
                kh = qkv_bf[r0:r0 + seq, hidden + c0:hidden + c0 + head_dim]
                vh = qkv_bf[r0:r0 + seq, 2 * hidden + c0:2 * hidden + c0 + head_dim]
                s = jnp.einsum("qd,kd->qk", qh, kh,
                               preferred_element_type=jnp.float32) * scale  # (S, S)
                s = s + m_b
                s = s - jnp.max(s, axis=-1, keepdims=True)
                p = jnp.exp(s)
                p = p * pl.reciprocal(jnp.sum(p, axis=-1, keepdims=True), approx=True)
                ctx_scr[r0:r0 + seq, c0:c0 + head_dim] = jnp.dot(
                    p.astype(jnp.bfloat16), vh, preferred_element_type=jnp.float32)

        attn = jnp.dot(ctx_scr[...].astype(jnp.bfloat16), wo_ref[l],
                       preferred_element_type=jnp.float32) + bo_ref[l]
        x1 = _layernorm_f32(attn + x, ln1_g_ref[l], ln1_b_ref[l], eps)

        # FFN: GELU(x1 @ W1 + b1) @ W2 + b2, bf16 MXU operands, f32 accumulation.
        h1 = _gelu(jnp.dot(x1.astype(jnp.bfloat16), w1_ref[l],
                           preferred_element_type=jnp.float32) + b1_ref[l])
        h2 = jnp.dot(h1.astype(jnp.bfloat16), w2_ref[l],
                     preferred_element_type=jnp.float32) + b2_ref[l]
        x = _layernorm_f32(h2 + x1, ln2_g_ref[l], ln2_b_ref[l], eps)

    # Pooler (tanh) + classifier.  These ops are row-independent, so they run on the
    # full (B*S, H) slab (better MXU fill, no in-kernel row gather / partial stores);
    # the [CLS] row per sequence is selected outside the kernel.
    pooled = jnp.tanh(jnp.dot(x.astype(jnp.bfloat16), pool_w_ref[...],
                              preferred_element_type=jnp.float32) + pool_b_ref[...])
    logits = jnp.dot(pooled.astype(jnp.bfloat16), cls_w_ref[...],
                     preferred_element_type=jnp.float32) + cls_b_ref[...]
    o_ref[...] = logits.astype(o_ref.dtype)                             # (B*S, LANE)


def psychbert_fused_forward(emb, mask_i32, params):
    """emb: (B*S, H) f32 summed embeddings; mask_i32: (B, S) int mask."""
    BS, H = emb.shape
    B, S = mask_i32.shape
    args = (emb, mask_i32,
            params["emb_ln_g"], params["emb_ln_b"],
            params["wqkv"], params["bqkv"], params["wo"], params["bo"],
            params["ln1_g"], params["ln1_b"],
            params["w1"], params["b1"], params["w2"], params["b2"],
            params["ln2_g"], params["ln2_b"],
            params["pool_w"], params["pool_b"], params["cls_w"], params["cls_b"])
    vmem = pl.BlockSpec(memory_space=pltpu.MemorySpace.VMEM)
    # TODO(synk): a single program uses only one TensorCore on v7x; for large batches,
    # re-introduce a batch grid axis marked "parallel" to shard across both TCs.
    return pl.pallas_call(
        functools.partial(_fused_forward_kernel, n_layers=N_LAYERS, n_heads=N_HEADS,
                          head_dim=HEAD_DIM, batch=B, seq=S, eps=LN_EPS),
        out_shape=jax.ShapeDtypeStruct((BS, LANE), jnp.float32),
        in_specs=[vmem] * len(args),
        out_specs=vmem,
        scratch_shapes=[pltpu.VMEM((BS, H), jnp.float32)],   # lane-dense attention ctx
    )(*args)


# --------------------------- parameters & forward ----------------------------

def init_params(key):
    def normal(k, shape, std=0.02, dtype=jnp.float32):
        return (std * jax.random.normal(k, shape, dtype=jnp.float32)).astype(dtype)

    keys = jax.random.split(key, 8 + N_LAYERS)
    cls_w = jnp.zeros((HIDDEN, LANE), jnp.bfloat16)
    cls_w = cls_w.at[:, :NUM_LABELS].set(
        normal(keys[4], (HIDDEN, NUM_LABELS), dtype=jnp.bfloat16))
    params = {
        "word_emb": normal(keys[0], (VOCAB, HIDDEN)),
        "pos_emb": normal(keys[1], (MAX_POS, HIDDEN)),
        "type_emb": normal(keys[2], (TYPE_VOCAB, HIDDEN)),
        "emb_ln_g": jnp.ones((1, HIDDEN), jnp.float32),
        "emb_ln_b": jnp.zeros((1, HIDDEN), jnp.float32),
        "pool_w": normal(keys[3], (HIDDEN, HIDDEN), dtype=jnp.bfloat16),
        "pool_b": jnp.zeros((1, HIDDEN), jnp.float32),
        "cls_w": cls_w,                         # padded to 128 lanes; cols >= 2 are zero
        "cls_b": jnp.zeros((1, LANE), jnp.float32),
    }
    wqkv, wo, w1, w2 = [], [], [], []
    for i in range(N_LAYERS):
        lk = jax.random.split(keys[8 + i], 6)
        wq = normal(lk[0], (HIDDEN, HIDDEN))
        wk = normal(lk[1], (HIDDEN, HIDDEN))
        wv = normal(lk[2], (HIDDEN, HIDDEN))
        wqkv.append(jnp.concatenate([wq, wk, wv], axis=1).astype(jnp.bfloat16))
        wo.append(normal(lk[3], (HIDDEN, HIDDEN), dtype=jnp.bfloat16))
        w1.append(normal(lk[4], (HIDDEN, INTERMEDIATE), dtype=jnp.bfloat16))
        w2.append(normal(lk[5], (INTERMEDIATE, HIDDEN), dtype=jnp.bfloat16))
    # Per-layer weights stacked with a leading (L, ...) axis so the fused kernel can
    # statically index them while keeping every layer's weights VMEM-resident.
    params.update({
        "wqkv": jnp.stack(wqkv),
        "bqkv": jnp.zeros((N_LAYERS, 1, 3 * HIDDEN), jnp.float32),
        "wo": jnp.stack(wo),
        "bo": jnp.zeros((N_LAYERS, 1, HIDDEN), jnp.float32),
        "ln1_g": jnp.ones((N_LAYERS, 1, HIDDEN), jnp.float32),
        "ln1_b": jnp.zeros((N_LAYERS, 1, HIDDEN), jnp.float32),
        "w1": jnp.stack(w1),
        "b1": jnp.zeros((N_LAYERS, 1, INTERMEDIATE), jnp.float32),
        "w2": jnp.stack(w2),
        "b2": jnp.zeros((N_LAYERS, 1, HIDDEN), jnp.float32),
        "ln2_g": jnp.ones((N_LAYERS, 1, HIDDEN), jnp.float32),
        "ln2_b": jnp.zeros((N_LAYERS, 1, HIDDEN), jnp.float32),
    })
    return params


def psychbert_classifier_forward(params, input_ids, attention_mask):
    """Mirrors PsychBertClassifier.forward: returns logits of shape (B, num_labels)."""
    B, S = input_ids.shape

    # Embedding table gathers stay in XLA (data-dependent gather); everything after the
    # embedding sum runs inside one fused Pallas kernel.
    emb = (params["word_emb"][input_ids]
           + params["pos_emb"][:S][None, :, :]
           + params["type_emb"][0][None, None, :])
    emb = emb.reshape(B * S, HIDDEN)

    logits_slab = psychbert_fused_forward(emb, attention_mask.astype(jnp.int32), params)
    # (dropout before the classifier is identity in eval mode)
    # Select the [CLS] row per sequence and the first NUM_LABELS lane columns.
    return logits_slab.reshape(B, S, LANE)[:, 0, :NUM_LABELS]


if __name__ == "__main__":
    key = jax.random.PRNGKey(0)
    pkey, ikey = jax.random.split(key)
    params = init_params(pkey)

    B, S = 2, 8
    input_ids = jax.random.randint(ikey, (B, S), 0, VOCAB, dtype=jnp.int32)
    attention_mask = jnp.array([[1, 1, 1, 1, 1, 1, 1, 1],
                                [1, 1, 1, 1, 1, 0, 0, 0]], dtype=jnp.int32)

    logits = jax.jit(psychbert_classifier_forward)(params, input_ids, attention_mask)
    jax.block_until_ready(logits)
    assert logits.shape == (B, NUM_LABELS) and logits.dtype == jnp.float32
    print("KERNEL_OK")
</pallas_src>

<mosaic_0001>
module attributes {stable_mosaic.version = 11 : i64} {
  func.func @_fused_forward_kernel(%arg0: memref<16x128xf32, #tpu.memory_space<vmem>>, %arg1: memref<2x8xi32, #tpu.memory_space<vmem>>, %arg2: memref<1x128xf32, #tpu.memory_space<vmem>>, %arg3: memref<1x128xf32, #tpu.memory_space<vmem>>, %arg4: memref<2x128x384xbf16, #tpu.memory_space<vmem>>, %arg5: memref<2x1x384xf32, #tpu.memory_space<vmem>>, %arg6: memref<2x128x128xbf16, #tpu.memory_space<vmem>>, %arg7: memref<2x1x128xf32, #tpu.memory_space<vmem>>, %arg8: memref<2x1x128xf32, #tpu.memory_space<vmem>>, %arg9: memref<2x1x128xf32, #tpu.memory_space<vmem>>, %arg10: memref<2x128x256xbf16, #tpu.memory_space<vmem>>, %arg11: memref<2x1x256xf32, #tpu.memory_space<vmem>>, %arg12: memref<2x256x128xbf16, #tpu.memory_space<vmem>>, %arg13: memref<2x1x128xf32, #tpu.memory_space<vmem>>, %arg14: memref<2x1x128xf32, #tpu.memory_space<vmem>>, %arg15: memref<2x1x128xf32, #tpu.memory_space<vmem>>, %arg16: memref<128x128xbf16, #tpu.memory_space<vmem>>, %arg17: memref<1x128xf32, #tpu.memory_space<vmem>>, %arg18: memref<128x128xbf16, #tpu.memory_space<vmem>>, %arg19: memref<1x128xf32, #tpu.memory_space<vmem>>, %arg20: memref<16x128xf32, #tpu.memory_space<vmem>>, %arg21: memref<16x128xf32, #tpu.memory_space<vmem>>) attributes {dimension_semantics = [], scalar_prefetch = 0 : i64, scratch_operands = 1 : i64, tpu.core_type = #tpu.core_type<tc>} {
    %c0 = arith.constant 0 : index
    %c0_0 = arith.constant 0 : index
    %0 = vector.load %arg0[%c0, %c0_0] : memref<16x128xf32, #tpu.memory_space<vmem>>, vector<16x128xf32>
    %c0_1 = arith.constant 0 : index
    %c0_2 = arith.constant 0 : index
    %1 = vector.load %arg2[%c0_1, %c0_2] : memref<1x128xf32, #tpu.memory_space<vmem>>, vector<1x128xf32>
    %c0_3 = arith.constant 0 : index
    %c0_4 = arith.constant 0 : index
    %2 = vector.load %arg3[%c0_3, %c0_4] : memref<1x128xf32, #tpu.memory_space<vmem>>, vector<1x128xf32>
    %cst = arith.constant dense<0.000000e+00> : vector<16xf32>
    %3 = vector.multi_reduction <add>, %0, %cst [1] : vector<16x128xf32> to vector<16xf32>
    %4 = vector.shape_cast %3 : vector<16xf32> to vector<16x1xf32>
    %cst_5 = arith.constant 1.280000e+02 : f32
    %5 = vector.broadcast %cst_5 : f32 to vector<16x1xf32>
    %6 = arith.divf %4, %5 : vector<16x1xf32>
    %7 = vector.broadcast %6 : vector<16x1xf32> to vector<16x128xf32>
    %8 = arith.subf %0, %7 : vector<16x128xf32>
    %9 = arith.mulf %8, %8 : vector<16x128xf32>
    %cst_6 = arith.constant dense<0.000000e+00> : vector<16xf32>
    %10 = vector.multi_reduction <add>, %9, %cst_6 [1] : vector<16x128xf32> to vector<16xf32>
    %11 = vector.shape_cast %10 : vector<16xf32> to vector<16x1xf32>
    %cst_7 = arith.constant 1.280000e+02 : f32
    %12 = vector.broadcast %cst_7 : f32 to vector<16x1xf32>
    %13 = arith.divf %11, %12 : vector<16x1xf32>
    %cst_8 = arith.constant 9.99999996E-13 : f32
    %14 = vector.broadcast %cst_8 : f32 to vector<16x1xf32>
    %15 = arith.addf %13, %14 : vector<16x1xf32>
    %16 = math.rsqrt %15 : vector<16x1xf32>
    %17 = vector.broadcast %16 : vector<16x1xf32> to vector<16x128xf32>
    %18 = arith.mulf %8, %17 : vector<16x128xf32>
    %19 = vector.broadcast %1 : vector<1x128xf32> to vector<16x128xf32>
    %20 = arith.mulf %18, %19 : vector<16x128xf32>
    %21 = vector.broadcast %2 : vector<1x128xf32> to vector<16x128xf32>
    %22 = arith.addf %20, %21 : vector<16x128xf32>
    %c0_9 = arith.constant 0 : index
    %c0_10 = arith.constant 0 : index
    %23 = vector.load %arg1[%c0_9, %c0_10] : memref<2x8xi32, #tpu.memory_space<vmem>>, vector<2x8xi32>
    %24 = arith.sitofp %23 : vector<2x8xi32> to vector<2x8xf32>
    %cst_11 = arith.constant 1.000000e+00 : f32
    %25 = vector.broadcast %cst_11 : f32 to vector<2x8xf32>
    %26 = arith.subf %25, %24 : vector<2x8xf32>
    %cst_12 = arith.constant -1.000000e+09 : f32
    %27 = vector.broadcast %cst_12 : f32 to vector<2x8xf32>
    %28 = arith.mulf %26, %27 : vector<2x8xf32>
    %29 = arith.truncf %22 : vector<16x128xf32> to vector<16x128xbf16>
    %c0_13 = arith.constant 0 : index
    %c0_14 = arith.constant 0 : index
    %c0_15 = arith.constant 0 : index
    %30 = vector.load %arg4[%c0_13, %c0_14, %c0_15] : memref<2x128x384xbf16, #tpu.memory_space<vmem>>, vector<1x128x384xbf16>
    %31 = vector.shape_cast %30 : vector<1x128x384xbf16> to vector<128x384xbf16>
    %cst_16 = arith.constant dense<0.000000e+00> : vector<16x384xf32>
    %32 = tpu.matmul %29, %31, %cst_16 {dimension_numbers = #tpu.dot_dimension_numbers<[1], [0], [0], [1], [0, 0, 1, 1], [], []>} : vector<16x128xbf16>, vector<128x384xbf16>, vector<16x384xf32> -> vector<16x384xf32>
    %c0_17 = arith.constant 0 : index
    %c0_18 = arith.constant 0 : index
    %c0_19 = arith.constant 0 : index
    %33 = vector.load %arg5[%c0_17, %c0_18, %c0_19] : memref<2x1x384xf32, #tpu.memory_space<vmem>>, vector<1x1x384xf32>
    %34 = vector.shape_cast %33 : vector<1x1x384xf32> to vector<1x384xf32>
    %35 = vector.broadcast %34 : vector<1x384xf32> to vector<16x384xf32>
    %36 = arith.addf %32, %35 : vector<16x384xf32>
    %37 = arith.truncf %36 : vector<16x384xf32> to vector<16x384xbf16>
    %38 = vector.extract_strided_slice %28 {offsets = [0, 0], sizes = [1, 8], strides = [1, 1]} : vector<2x8xf32> to vector<1x8xf32>
    %39 = vector.extract_strided_slice %37 {offsets = [0, 0], sizes = [8, 32], strides = [1, 1]} : vector<16x384xbf16> to vector<8x32xbf16>
    %40 = vector.extract_strided_slice %37 {offsets = [0, 128], sizes = [8, 32], strides = [1, 1]} : vector<16x384xbf16> to vector<8x32xbf16>
    %41 = vector.extract_strided_slice %37 {offsets = [0, 256], sizes = [8, 32], strides = [1, 1]} : vector<16x384xbf16> to vector<8x32xbf16>
    "tpu.trace_start"() <{level = 10 : i32, message = "qd,kd->qk"}> : () -> ()
    %cst_20 = arith.constant dense<0.000000e+00> : vector<8x8xf32>
    %42 = tpu.matmul %39, %40, %cst_20 {dimension_numbers = #tpu.dot_dimension_numbers<[1], [1], [0], [0], [0, 0, 1, 0], [], []>} : vector<8x32xbf16>, vector<8x32xbf16>, vector<8x8xf32> -> vector<8x8xf32>
    "tpu.trace_stop"() : () -> ()
    %cst_21 = arith.constant 0.176776692 : f32
    %43 = vector.broadcast %cst_21 : f32 to vector<8x8xf32>
    %44 = arith.mulf %42, %43 : vector<8x8xf32>
    %45 = vector.broadcast %38 : vector<1x8xf32> to vector<8x8xf32>
    %46 = arith.addf %44, %45 : vector<8x8xf32>
    %cst_22 = arith.constant dense<0xFF800000> : vector<8xf32>
    %47 = vector.multi_reduction <maximumf>, %46, %cst_22 [1] : vector<8x8xf32> to vector<8xf32>
    %48 = vector.shape_cast %47 : vector<8xf32> to vector<8x1xf32>
    %49 = vector.broadcast %48 : vector<8x1xf32> to vector<8x8xf32>
    %50 = arith.subf %46, %49 : vector<8x8xf32>
    %51 = math.exp %50 : vector<8x8xf32>
    %cst_23 = arith.constant dense<0.000000e+00> : vector<8xf32>
    %52 = vector.multi_reduction <add>, %51, %cst_23 [1] : vector<8x8xf32> to vector<8xf32>
    %53 = vector.shape_cast %52 : vector<8xf32> to vector<8x1xf32>
    %54 = tpu.reciprocal %53 {approx = true} : vector<8x1xf32> -> vector<8x1xf32>
    %55 = vector.broadcast %54 : vector<8x1xf32> to vector<8x8xf32>
    %56 = arith.mulf %51, %55 : vector<8x8xf32>
    %57 = arith.truncf %56 : vector<8x8xf32> to vector<8x8xbf16>
    %cst_24 = arith.constant dense<0.000000e+00> : vector<8x32xf32>
    %58 = tpu.matmul %57, %41, %cst_24 {dimension_numbers = #tpu.dot_dimension_numbers<[1], [0], [0], [1], [0, 0, 1, 1], [], []>} : vector<8x8xbf16>, vector<8x32xbf16>, vector<8x32xf32> -> vector<8x32xf32>
    %c0_25 = arith.constant 0 : index
    %c0_26 = arith.constant 0 : index
    %59 = vector.load %arg21[%c0_25, %c0_26] : memref<16x128xf32, #tpu.memory_space<vmem>>, vector<8x32xf32>
    tpu.vector_store %arg21[%c0_25, %c0_26], %58 {strides = array<i32>} : memref<16x128xf32, #tpu.memory_space<vmem>>, vector<8x32xf32>,
    %60 = vector.extract_strided_slice %37 {offsets = [0, 32], sizes = [8, 32], strides = [1, 1]} : vector<16x384xbf16> to vector<8x32xbf16>
    %61 = vector.extract_strided_slice %37 {offsets = [0, 160], sizes = [8, 32], strides = [1, 1]} : vector<16x384xbf16> to vector<8x32xbf16>
    %62 = vector.extract_strided_slice %37 {offsets = [0, 288], sizes = [8, 32], strides = [1, 1]} : vector<16x384xbf16> to vector<8x32xbf16>
    "tpu.trace_start"() <{level = 10 : i32, message = "qd,kd->qk"}> : () -> ()
    %cst_27 = arith.constant dense<0.000000e+00> : vector<8x8xf32>
    %63 = tpu.matmul %60, %61, %cst_27 {dimension_numbers = #tpu.dot_dimension_numbers<[1], [1], [0], [0], [0, 0, 1, 0], [], []>} : vector<8x32xbf16>, vector<8x32xbf16>, vector<8x8xf32> -> vector<8x8xf32>
    "tpu.trace_stop"() : () -> ()
    %cst_28 = arith.constant 0.176776692 : f32
    %64 = vector.broadcast %cst_28 : f32 to vector<8x8xf32>
    %65 = arith.mulf %63, %64 : vector<8x8xf32>
    %66 = vector.broadcast %38 : vector<1x8xf32> to vector<8x8xf32>
    %67 = arith.addf %65, %66 : vector<8x8xf32>
    %cst_29 = arith.constant dense<0xFF800000> : vector<8xf32>
    %68 = vector.multi_reduction <maximumf>, %67, %cst_29 [1] : vector<8x8xf32> to vector<8xf32>
    %69 = vector.shape_cast %68 : vector<8xf32> to vector<8x1xf32>
    %70 = vector.broadcast %69 : vector<8x1xf32> to vector<8x8xf32>
    %71 = arith.subf %67, %70 : vector<8x8xf32>
    %72 = math.exp %71 : vector<8x8xf32>
    %cst_30 = arith.constant dense<0.000000e+00> : vector<8xf32>
    %73 = vector.multi_reduction <add>, %72, %cst_30 [1] : vector<8x8xf32> to vector<8xf32>
    %74 = vector.shape_cast %73 : vector<8xf32> to vector<8x1xf32>
    %75 = tpu.reciprocal %74 {approx = true} : vector<8x1xf32> -> vector<8x1xf32>
    %76 = vector.broadcast %75 : vector<8x1xf32> to vector<8x8xf32>
    %77 = arith.mulf %72, %76 : vector<8x8xf32>
    %78 = arith.truncf %77 : vector<8x8xf32> to vector<8x8xbf16>
    %cst_31 = arith.constant dense<0.000000e+00> : vector<8x32xf32>
    %79 = tpu.matmul %78, %62, %cst_31 {dimension_numbers = #tpu.dot_dimension_numbers<[1], [0], [0], [1], [0, 0, 1, 1], [], []>} : vector<8x8xbf16>, vector<8x32xbf16>, vector<8x32xf32> -> vector<8x32xf32>
    %c0_32 = arith.constant 0 : index
    %c32 = arith.constant 32 : index
    %80 = vector.load %arg21[%c0_32, %c32] : memref<16x128xf32, #tpu.memory_space<vmem>>, vector<8x32xf32>
    tpu.vector_store %arg21[%c0_32, %c32], %79 {strides = array<i32>} : memref<16x128xf32, #tpu.memory_space<vmem>>, vector<8x32xf32>,
    %81 = vector.extract_strided_slice %37 {offsets = [0, 64], sizes = [8, 32], strides = [1, 1]} : vector<16x384xbf16> to vector<8x32xbf16>
    %82 = vector.extract_strided_slice %37 {offsets = [0, 192], sizes = [8, 32], strides = [1, 1]} : vector<16x384xbf16> to vector<8x32xbf16>
    %83 = vector.extract_strided_slice %37 {offsets = [0, 320], sizes = [8, 32], strides = [1, 1]} : vector<16x384xbf16> to vector<8x32xbf16>
    "tpu.trace_start"() <{level = 10 : i32, message = "qd,kd->qk"}> : () -> ()
    %cst_33 = arith.constant dense<0.000000e+00> : vector<8x8xf32>
    %84 = tpu.matmul %81, %82, %cst_33 {dimension_numbers = #tpu.dot_dimension_numbers<[1], [1], [0], [0], [0, 0, 1, 0], [], []>} : vector<8x32xbf16>, vector<8x32xbf16>, vector<8x8xf32> -> vector<8x8xf32>
    "tpu.trace_stop"() : () -> ()
    %cst_34 = arith.constant 0.176776692 : f32
    %85 = vector.broadcast %cst_34 : f32 to vector<8x8xf32>
    %86 = arith.mulf %84, %85 : vector<8x8xf32>
    %87 = vector.broadcast %38 : vector<1x8xf32> to vector<8x8xf32>
    %88 = arith.addf %86, %87 : vector<8x8xf32>
    %cst_35 = arith.constant dense<0xFF800000> : vector<8xf32>
    %89 = vector.multi_reduction <maximumf>, %88, %cst_35 [1] : vector<8x8xf32> to vector<8xf32>
    %90 = vector.shape_cast %89 : vector<8xf32> to vector<8x1xf32>
    %91 = vector.broadcast %90 : vector<8x1xf32> to vector<8x8xf32>
    %92 = arith.subf %88, %91 : vector<8x8xf32>
    %93 = math.exp %92 : vector<8x8xf32>
    %cst_36 = arith.constant dense<0.000000e+00> : vector<8xf32>
    %94 = vector.multi_reduction <add>, %93, %cst_36 [1] : vector<8x8xf32> to vector<8xf32>
    %95 = vector.shape_cast %94 : vector<8xf32> to vector<8x1xf32>
    %96 = tpu.reciprocal %95 {approx = true} : vector<8x1xf32> -> vector<8x1xf32>
    %97 = vector.broadcast %96 : vector<8x1xf32> to vector<8x8xf32>
    %98 = arith.mulf %93, %97 : vector<8x8xf32>
    %99 = arith.truncf %98 : vector<8x8xf32> to vector<8x8xbf16>
    %cst_37 = arith.constant dense<0.000000e+00> : vector<8x32xf32>
    %100 = tpu.matmul %99, %83, %cst_37 {dimension_numbers = #tpu.dot_dimension_numbers<[1], [0], [0], [1], [0, 0, 1, 1], [], []>} : vector<8x8xbf16>, vector<8x32xbf16>, vector<8x32xf32> -> vector<8x32xf32>
    %c0_38 = arith.constant 0 : index
    %c64 = arith.constant 64 : index
    %101 = vector.load %arg21[%c0_38, %c64] : memref<16x128xf32, #tpu.memory_space<vmem>>, vector<8x32xf32>
    tpu.vector_store %arg21[%c0_38, %c64], %100 {strides = array<i32>} : memref<16x128xf32, #tpu.memory_space<vmem>>, vector<8x32xf32>,
    %102 = vector.extract_strided_slice %37 {offsets = [0, 96], sizes = [8, 32], strides = [1, 1]} : vector<16x384xbf16> to vector<8x32xbf16>
    %103 = vector.extract_strided_slice %37 {offsets = [0, 224], sizes = [8, 32], strides = [1, 1]} : vector<16x384xbf16> to vector<8x32xbf16>
    %104 = vector.extract_strided_slice %37 {offsets = [0, 352], sizes = [8, 32], strides = [1, 1]} : vector<16x384xbf16> to vector<8x32xbf16>
    "tpu.trace_start"() <{level = 10 : i32, message = "qd,kd->qk"}> : () -> ()
    %cst_39 = arith.constant dense<0.000000e+00> : vector<8x8xf32>
    %105 = tpu.matmul %102, %103, %cst_39 {dimension_numbers = #tpu.dot_dimension_numbers<[1], [1], [0], [0], [0, 0, 1, 0], [], []>} : vector<8x32xbf16>, vector<8x32xbf16>, vector<8x8xf32> -> vector<8x8xf32>
    "tpu.trace_stop"() : () -> ()
    %cst_40 = arith.constant 0.176776692 : f32
    %106 = vector.broadcast %cst_40 : f32 to vector<8x8xf32>
    %107 = arith.mulf %105, %106 : vector<8x8xf32>
    %108 = vector.broadcast %38 : vector<1x8xf32> to vector<8x8xf32>
    %109 = arith.addf %107, %108 : vector<8x8xf32>
    %cst_41 = arith.constant dense<0xFF800000> : vector<8xf32>
    %110 = vector.multi_reduction <maximumf>, %109, %cst_41 [1] : vector<8x8xf32> to vector<8xf32>
    %111 = vector.shape_cast %110 : vector<8xf32> to vector<8x1xf32>
    %112 = vector.broadcast %111 : vector<8x1xf32> to vector<8x8xf32>
    %113 = arith.subf %109, %112 : vector<8x8xf32>
    %114 = math.exp %113 : vector<8x8xf32>
    %cst_42 = arith.constant dense<0.000000e+00> : vector<8xf32>
    %115 = vector.multi_reduction <add>, %114, %cst_42 [1] : vector<8x8xf32> to vector<8xf32>
    %116 = vector.shape_cast %115 : vector<8xf32> to vector<8x1xf32>
    %117 = tpu.reciprocal %116 {approx = true} : vector<8x1xf32> -> vector<8x1xf32>
    %118 = vector.broadcast %117 : vector<8x1xf32> to vector<8x8xf32>
    %119 = arith.mulf %114, %118 : vector<8x8xf32>
    %120 = arith.truncf %119 : vector<8x8xf32> to vector<8x8xbf16>
    %cst_43 = arith.constant dense<0.000000e+00> : vector<8x32xf32>
    %121 = tpu.matmul %120, %104, %cst_43 {dimension_numbers = #tpu.dot_dimension_numbers<[1], [0], [0], [1], [0, 0, 1, 1], [], []>} : vector<8x8xbf16>, vector<8x32xbf16>, vector<8x32xf32> -> vector<8x32xf32>
    %c0_44 = arith.constant 0 : index
    %c96 = arith.constant 96 : index
    %122 = vector.load %arg21[%c0_44, %c96] : memref<16x128xf32, #tpu.memory_space<vmem>>, vector<8x32xf32>
    tpu.vector_store %arg21[%c0_44, %c96], %121 {strides = array<i32>} : memref<16x128xf32, #tpu.memory_space<vmem>>, vector<8x32xf32>,
    %123 = vector.extract_strided_slice %28 {offsets = [1, 0], sizes = [1, 8], strides = [1, 1]} : vector<2x8xf32> to vector<1x8xf32>
    %124 = vector.extract_strided_slice %37 {offsets = [8, 0], sizes = [8, 32], strides = [1, 1]} : vector<16x384xbf16> to vector<8x32xbf16>
    %125 = vector.extract_strided_slice %37 {offsets = [8, 128], sizes = [8, 32], strides = [1, 1]} : vector<16x384xbf16> to vector<8x32xbf16>
    %126 = vector.extract_strided_slice %37 {offsets = [8, 256], sizes = [8, 32], strides = [1, 1]} : vector<16x384xbf16> to vector<8x32xbf16>
    "tpu.trace_start"() <{level = 10 : i32, message = "qd,kd->qk"}> : () -> ()
    %cst_45 = arith.constant dense<0.000000e+00> : vector<8x8xf32>
    %127 = tpu.matmul %124, %125, %cst_45 {dimension_numbers = #tpu.dot_dimension_numbers<[1], [1], [0], [0], [0, 0, 1, 0], [], []>} : vector<8x32xbf16>, vector<8x32xbf16>, vector<8x8xf32> -> vector<8x8xf32>
    "tpu.trace_stop"() : () -> ()
    %cst_46 = arith.constant 0.176776692 : f32
    %128 = vector.broadcast %cst_46 : f32 to vector<8x8xf32>
    %129 = arith.mulf %127, %128 : vector<8x8xf32>
    %130 = vector.broadcast %123 : vector<1x8xf32> to vector<8x8xf32>
    %131 = arith.addf %129, %130 : vector<8x8xf32>
    %cst_47 = arith.constant dense<0xFF800000> : vector<8xf32>
    %132 = vector.multi_reduction <maximumf>, %131, %cst_47 [1] : vector<8x8xf32> to vector<8xf32>
    %133 = vector.shape_cast %132 : vector<8xf32> to vector<8x1xf32>
    %134 = vector.broadcast %133 : vector<8x1xf32> to vector<8x8xf32>
    %135 = arith.subf %131, %134 : vector<8x8xf32>
    %136 = math.exp %135 : vector<8x8xf32>
    %cst_48 = arith.constant dense<0.000000e+00> : vector<8xf32>
    %137 = vector.multi_reduction <add>, %136, %cst_48 [1] : vector<8x8xf32> to vector<8xf32>
    %138 = vector.shape_cast %137 : vector<8xf32> to vector<8x1xf32>
    %139 = tpu.reciprocal %138 {approx = true} : vector<8x1xf32> -> vector<8x1xf32>
    %140 = vector.broadcast %139 : vector<8x1xf32> to vector<8x8xf32>
    %141 = arith.mulf %136, %140 : vector<8x8xf32>
    %142 = arith.truncf %141 : vector<8x8xf32> to vector<8x8xbf16>
    %cst_49 = arith.constant dense<0.000000e+00> : vector<8x32xf32>
    %143 = tpu.matmul %142, %126, %cst_49 {dimension_numbers = #tpu.dot_dimension_numbers<[1], [0], [0], [1], [0, 0, 1, 1], [], []>} : vector<8x8xbf16>, vector<8x32xbf16>, vector<8x32xf32> -> vector<8x32xf32>
    %c8 = arith.constant 8 : index
    %c0_50 = arith.constant 0 : index
    %144 = vector.load %arg21[%c8, %c0_50] : memref<16x128xf32, #tpu.memory_space<vmem>>, vector<8x32xf32>
    tpu.vector_store %arg21[%c8, %c0_50], %143 {strides = array<i32>} : memref<16x128xf32, #tpu.memory_space<vmem>>, vector<8x32xf32>,
    %145 = vector.extract_strided_slice %37 {offsets = [8, 32], sizes = [8, 32], strides = [1, 1]} : vector<16x384xbf16> to vector<8x32xbf16>
    %146 = vector.extract_strided_slice %37 {offsets = [8, 160], sizes = [8, 32], strides = [1, 1]} : vector<16x384xbf16> to vector<8x32xbf16>
    %147 = vector.extract_strided_slice %37 {offsets = [8, 288], sizes = [8, 32], strides = [1, 1]} : vector<16x384xbf16> to vector<8x32xbf16>
    "tpu.trace_start"() <{level = 10 : i32, message = "qd,kd->qk"}> : () -> ()
    %cst_51 = arith.constant dense<0.000000e+00> : vector<8x8xf32>
    %148 = tpu.matmul %145, %146, %cst_51 {dimension_numbers = #tpu.dot_dimension_numbers<[1], [1], [0], [0], [0, 0, 1, 0], [], []>} : vector<8x32xbf16>, vector<8x32xbf16>, vector<8x8xf32> -> vector<8x8xf32>
    "tpu.trace_stop"() : () -> ()
    %cst_52 = arith.constant 0.176776692 : f32
    %149 = vector.broadcast %cst_52 : f32 to vector<8x8xf32>
    %150 = arith.mulf %148, %149 : vector<8x8xf32>
    %151 = vector.broadcast %123 : vector<1x8xf32> to vector<8x8xf32>
    %152 = arith.addf %150, %151 : vector<8x8xf32>
    %cst_53 = arith.constant dense<0xFF800000> : vector<8xf32>
    %153 = vector.multi_reduction <maximumf>, %152, %cst_53 [1] : vector<8x8xf32> to vector<8xf32>
    %154 = vector.shape_cast %153 : vector<8xf32> to vector<8x1xf32>
    %155 = vector.broadcast %154 : vector<8x1xf32> to vector<8x8xf32>
    %156 = arith.subf %152, %155 : vector<8x8xf32>
    %157 = math.exp %156 : vector<8x8xf32>
    %cst_54 = arith.constant dense<0.000000e+00> : vector<8xf32>
    %158 = vector.multi_reduction <add>, %157, %cst_54 [1] : vector<8x8xf32> to vector<8xf32>
    %159 = vector.shape_cast %158 : vector<8xf32> to vector<8x1xf32>
    %160 = tpu.reciprocal %159 {approx = true} : vector<8x1xf32> -> vector<8x1xf32>
    %161 = vector.broadcast %160 : vector<8x1xf32> to vector<8x8xf32>
    %162 = arith.mulf %157, %161 : vector<8x8xf32>
    %163 = arith.truncf %162 : vector<8x8xf32> to vector<8x8xbf16>
    %cst_55 = arith.constant dense<0.000000e+00> : vector<8x32xf32>
    %164 = tpu.matmul %163, %147, %cst_55 {dimension_numbers = #tpu.dot_dimension_numbers<[1], [0], [0], [1], [0, 0, 1, 1], [], []>} : vector<8x8xbf16>, vector<8x32xbf16>, vector<8x32xf32> -> vector<8x32xf32>
    %c8_56 = arith.constant 8 : index
    %c32_57 = arith.constant 32 : index
    %165 = vector.load %arg21[%c8_56, %c32_57] : memref<16x128xf32, #tpu.memory_space<vmem>>, vector<8x32xf32>
    tpu.vector_store %arg21[%c8_56, %c32_57], %164 {strides = array<i32>} : memref<16x128xf32, #tpu.memory_space<vmem>>, vector<8x32xf32>,
    %166 = vector.extract_strided_slice %37 {offsets = [8, 64], sizes = [8, 32], strides = [1, 1]} : vector<16x384xbf16> to vector<8x32xbf16>
    %167 = vector.extract_strided_slice %37 {offsets = [8, 192], sizes = [8, 32], strides = [1, 1]} : vector<16x384xbf16> to vector<8x32xbf16>
    %168 = vector.extract_strided_slice %37 {offsets = [8, 320], sizes = [8, 32], strides = [1, 1]} : vector<16x384xbf16> to vector<8x32xbf16>
    "tpu.trace_start"() <{level = 10 : i32, message = "qd,kd->qk"}> : () -> ()
    %cst_58 = arith.constant dense<0.000000e+00> : vector<8x8xf32>
    %169 = tpu.matmul %166, %167, %cst_58 {dimension_numbers = #tpu.dot_dimension_numbers<[1], [1], [0], [0], [0, 0, 1, 0], [], []>} : vector<8x32xbf16>, vector<8x32xbf16>, vector<8x8xf32> -> vector<8x8xf32>
    "tpu.trace_stop"() : () -> ()
    %cst_59 = arith.constant 0.176776692 : f32
    %170 = vector.broadcast %cst_59 : f32 to vector<8x8xf32>
    %171 = arith.mulf %169, %170 : vector<8x8xf32>
    %172 = vector.broadcast %123 : vector<1x8xf32> to vector<8x8xf32>
    %173 = arith.addf %171, %172 : vector<8x8xf32>
    %cst_60 = arith.constant dense<0xFF800000> : vector<8xf32>
    %174 = vector.multi_reduction <maximumf>, %173, %cst_60 [1] : vector<8x8xf32> to vector<8xf32>
    %175 = vector.shape_cast %174 : vector<8xf32> to vector<8x1xf32>
    %176 = vector.broadcast %175 : vector<8x1xf32> to vector<8x8xf32>
    %177 = arith.subf %173, %176 : vector<8x8xf32>
    %178 = math.exp %177 : vector<8x8xf32>
    %cst_61 = arith.constant dense<0.000000e+00> : vector<8xf32>
    %179 = vector.multi_reduction <add>, %178, %cst_61 [1] : vector<8x8xf32> to vector<8xf32>
    %180 = vector.shape_cast %179 : vector<8xf32> to vector<8x1xf32>
    %181 = tpu.reciprocal %180 {approx = true} : vector<8x1xf32> -> vector<8x1xf32>
    %182 = vector.broadcast %181 : vector<8x1xf32> to vector<8x8xf32>
    %183 = arith.mulf %178, %182 : vector<8x8xf32>
    %184 = arith.truncf %183 : vector<8x8xf32> to vector<8x8xbf16>
    %cst_62 = arith.constant dense<0.000000e+00> : vector<8x32xf32>
    %185 = tpu.matmul %184, %168, %cst_62 {dimension_numbers = #tpu.dot_dimension_numbers<[1], [0], [0], [1], [0, 0, 1, 1], [], []>} : vector<8x8xbf16>, vector<8x32xbf16>, vector<8x32xf32> -> vector<8x32xf32>
    %c8_63 = arith.constant 8 : index
    %c64_64 = arith.constant 64 : index
    %186 = vector.load %arg21[%c8_63, %c64_64] : memref<16x128xf32, #tpu.memory_space<vmem>>, vector<8x32xf32>
    tpu.vector_store %arg21[%c8_63, %c64_64], %185 {strides = array<i32>} : memref<16x128xf32, #tpu.memory_space<vmem>>, vector<8x32xf32>,
    %187 = vector.extract_strided_slice %37 {offsets = [8, 96], sizes = [8, 32], strides = [1, 1]} : vector<16x384xbf16> to vector<8x32xbf16>
    %188 = vector.extract_strided_slice %37 {offsets = [8, 224], sizes = [8, 32], strides = [1, 1]} : vector<16x384xbf16> to vector<8x32xbf16>
    %189 = vector.extract_strided_slice %37 {offsets = [8, 352], sizes = [8, 32], strides = [1, 1]} : vector<16x384xbf16> to vector<8x32xbf16>
    "tpu.trace_start"() <{level = 10 : i32, message = "qd,kd->qk"}> : () -> ()
    %cst_65 = arith.constant dense<0.000000e+00> : vector<8x8xf32>
    %190 = tpu.matmul %187, %188, %cst_65 {dimension_numbers = #tpu.dot_dimension_numbers<[1], [1], [0], [0], [0, 0, 1, 0], [], []>} : vector<8x32xbf16>, vector<8x32xbf16>, vector<8x8xf32> -> vector<8x8xf32>
    "tpu.trace_stop"() : () -> ()
    %cst_66 = arith.constant 0.176776692 : f32
    %191 = vector.broadcast %cst_66 : f32 to vector<8x8xf32>
    %192 = arith.mulf %190, %191 : vector<8x8xf32>
    %193 = vector.broadcast %123 : vector<1x8xf32> to vector<8x8xf32>
    %194 = arith.addf %192, %193 : vector<8x8xf32>
    %cst_67 = arith.constant dense<0xFF800000> : vector<8xf32>
    %195 = vector.multi_reduction <maximumf>, %194, %cst_67 [1] : vector<8x8xf32> to vector<8xf32>
    %196 = vector.shape_cast %195 : vector<8xf32> to vector<8x1xf32>
    %197 = vector.broadcast %196 : vector<8x1xf32> to vector<8x8xf32>
    %198 = arith.subf %194, %197 : vector<8x8xf32>
    %199 = math.exp %198 : vector<8x8xf32>
    %cst_68 = arith.constant dense<0.000000e+00> : vector<8xf32>
    %200 = vector.multi_reduction <add>, %199, %cst_68 [1] : vector<8x8xf32> to vector<8xf32>
    %201 = vector.shape_cast %200 : vector<8xf32> to vector<8x1xf32>
    %202 = tpu.reciprocal %201 {approx = true} : vector<8x1xf32> -> vector<8x1xf32>
    %203 = vector.broadcast %202 : vector<8x1xf32> to vector<8x8xf32>
    %204 = arith.mulf %199, %203 : vector<8x8xf32>
    %205 = arith.truncf %204 : vector<8x8xf32> to vector<8x8xbf16>
    %cst_69 = arith.constant dense<0.000000e+00> : vector<8x32xf32>
    %206 = tpu.matmul %205, %189, %cst_69 {dimension_numbers = #tpu.dot_dimension_numbers<[1], [0], [0], [1], [0, 0, 1, 1], [], []>} : vector<8x8xbf16>, vector<8x32xbf16>, vector<8x32xf32> -> vector<8x32xf32>
    %c8_70 = arith.constant 8 : index
    %c96_71 = arith.constant 96 : index
    %207 = vector.load %arg21[%c8_70, %c96_71] : memref<16x128xf32, #tpu.memory_space<vmem>>, vector<8x32xf32>
    tpu.vector_store %arg21[%c8_70, %c96_71], %206 {strides = array<i32>} : memref<16x128xf32, #tpu.memory_space<vmem>>, vector<8x32xf32>,
    %c0_72 = arith.constant 0 : index
    %c0_73 = arith.constant 0 : index
    %208 = vector.load %arg21[%c0_72, %c0_73] : memref<16x128xf32, #tpu.memory_space<vmem>>, vector<16x128xf32>
    %209 = arith.truncf %208 : vector<16x128xf32> to vector<16x128xbf16>
    %c0_74 = arith.constant 0 : index
    %c0_75 = arith.constant 0 : index
    %c0_76 = arith.constant 0 : index
    %210 = vector.load %arg6[%c0_74, %c0_75, %c0_76] : memref<2x128x128xbf16, #tpu.memory_space<vmem>>, vector<1x128x128xbf16>
    %211 = vector.shape_cast %210 : vector<1x128x128xbf16> to vector<128x128xbf16>
    %cst_77 = arith.constant dense<0.000000e+00> : vector<16x128xf32>
    %212 = tpu.matmul %209, %211, %cst_77 {dimension_numbers = #tpu.dot_dimension_numbers<[1], [0], [0], [1], [0, 0, 1, 1], [], []>} : vector<16x128xbf16>, vector<128x128xbf16>, vector<16x128xf32> -> vector<16x128xf32>
    %c0_78 = arith.constant 0 : index
    %c0_79 = arith.constant 0 : index
    %c0_80 = arith.constant 0 : index
    %213 = vector.load %arg7[%c0_78, %c0_79, %c0_80] : memref<2x1x128xf32, #tpu.memory_space<vmem>>, vector<1x1x128xf32>
    %214 = vector.shape_cast %213 : vector<1x1x128xf32> to vector<1x128xf32>
    %215 = vector.broadcast %214 : vector<1x128xf32> to vector<16x128xf32>
    %216 = arith.addf %212, %215 : vector<16x128xf32>
    %217 = arith.addf %216, %22 : vector<16x128xf32>
    %c0_81 = arith.constant 0 : index
    %c0_82 = arith.constant 0 : index
    %c0_83 = arith.constant 0 : index
    %218 = vector.load %arg8[%c0_81, %c0_82, %c0_83] : memref<2x1x128xf32, #tpu.memory_space<vmem>>, vector<1x1x128xf32>
    %219 = vector.shape_cast %218 : vector<1x1x128xf32> to vector<1x128xf32>
    %c0_84 = arith.constant 0 : index
    %c0_85 = arith.constant 0 : index
    %c0_86 = arith.constant 0 : index
    %220 = vector.load %arg9[%c0_84, %c0_85, %c0_86] : memref<2x1x128xf32, #tpu.memory_space<vmem>>, vector<1x1x128xf32>
    %221 = vector.shape_cast %220 : vector<1x1x128xf32> to vector<1x128xf32>
    %cst_87 = arith.constant dense<0.000000e+00> : vector<16xf32>
    %222 = vector.multi_reduction <add>, %217, %cst_87 [1] : vector<16x128xf32> to vector<16xf32>
    %223 = vector.shape_cast %222 : vector<16xf32> to vector<16x1xf32>
    %cst_88 = arith.constant 1.280000e+02 : f32
    %224 = vector.broadcast %cst_88 : f32 to vector<16x1xf32>
    %225 = arith.divf %223, %224 : vector<16x1xf32>
    %226 = vector.broadcast %225 : vector<16x1xf32> to vector<16x128xf32>
    %227 = arith.subf %217, %226 : vector<16x128xf32>
    %228 = arith.mulf %227, %227 : vector<16x128xf32>
    %cst_89 = arith.constant dense<0.000000e+00> : vector<16xf32>
    %229 = vector.multi_reduction <add>, %228, %cst_89 [1] : vector<16x128xf32> to vector<16xf32>
    %230 = vector.shape_cast %229 : vector<16xf32> to vector<16x1xf32>
    %cst_90 = arith.constant 1.280000e+02 : f32
    %231 = vector.broadcast %cst_90 : f32 to vector<16x1xf32>
    %232 = arith.divf %230, %231 : vector<16x1xf32>
    %cst_91 = arith.constant 9.99999996E-13 : f32
    %233 = vector.broadcast %cst_91 : f32 to vector<16x1xf32>
    %234 = arith.addf %232, %233 : vector<16x1xf32>
    %235 = math.rsqrt %234 : vector<16x1xf32>
    %236 = vector.broadcast %235 : vector<16x1xf32> to vector<16x128xf32>
    %237 = arith.mulf %227, %236 : vector<16x128xf32>
    %238 = vector.broadcast %219 : vector<1x128xf32> to vector<16x128xf32>
    %239 = arith.mulf %237, %238 : vector<16x128xf32>
    %240 = vector.broadcast %221 : vector<1x128xf32> to vector<16x128xf32>
    %241 = arith.addf %239, %240 : vector<16x128xf32>
    %242 = arith.truncf %241 : vector<16x128xf32> to vector<16x128xbf16>
    %c0_92 = arith.constant 0 : index
    %c0_93 = arith.constant 0 : index
    %c0_94 = arith.constant 0 : index
    %243 = vector.load %arg10[%c0_92, %c0_93, %c0_94] : memref<2x128x256xbf16, #tpu.memory_space<vmem>>, vector<1x128x256xbf16>
    %244 = vector.shape_cast %243 : vector<1x128x256xbf16> to vector<128x256xbf16>
    %cst_95 = arith.constant dense<0.000000e+00> : vector<16x256xf32>
    %245 = tpu.matmul %242, %244, %cst_95 {dimension_numbers = #tpu.dot_dimension_numbers<[1], [0], [0], [1], [0, 0, 1, 1], [], []>} : vector<16x128xbf16>, vector<128x256xbf16>, vector<16x256xf32> -> vector<16x256xf32>
    %c0_96 = arith.constant 0 : index
    %c0_97 = arith.constant 0 : index
    %c0_98 = arith.constant 0 : index
    %246 = vector.load %arg11[%c0_96, %c0_97, %c0_98] : memref<2x1x256xf32, #tpu.memory_space<vmem>>, vector<1x1x256xf32>
    %247 = vector.shape_cast %246 : vector<1x1x256xf32> to vector<1x256xf32>
    %248 = vector.broadcast %247 : vector<1x256xf32> to vector<16x256xf32>
    %249 = arith.addf %245, %248 : vector<16x256xf32>
    %cst_99 = arith.constant 5.000000e-01 : f32
    %250 = vector.broadcast %cst_99 : f32 to vector<16x256xf32>
    %251 = arith.mulf %250, %249 : vector<16x256xf32>
    %cst_100 = arith.constant 4.471500e-02 : f32
    %252 = vector.broadcast %cst_100 : f32 to vector<16x256xf32>
    %253 = arith.mulf %252, %249 : vector<16x256xf32>
    %254 = arith.mulf %253, %249 : vector<16x256xf32>
    %255 = arith.mulf %254, %249 : vector<16x256xf32>
    %256 = arith.addf %249, %255 : vector<16x256xf32>
    %cst_101 = arith.constant 0.797884583 : f32
    %257 = vector.broadcast %cst_101 : f32 to vector<16x256xf32>
    %258 = arith.mulf %257, %256 : vector<16x256xf32>
    %259 = math.tanh %258 : vector<16x256xf32>
    %cst_102 = arith.constant 1.000000e+00 : f32
    %260 = vector.broadcast %cst_102 : f32 to vector<16x256xf32>
    %261 = arith.addf %260, %259 : vector<16x256xf32>
    %262 = arith.mulf %251, %261 : vector<16x256xf32>
    %263 = arith.truncf %262 : vector<16x256xf32> to vector<16x256xbf16>
    %c0_103 = arith.constant 0 : index
    %c0_104 = arith.constant 0 : index
    %c0_105 = arith.constant 0 : index
    %264 = vector.load %arg12[%c0_103, %c0_104, %c0_105] : memref<2x256x128xbf16, #tpu.memory_space<vmem>>, vector<1x256x128xbf16>
    %265 = vector.shape_cast %264 : vector<1x256x128xbf16> to vector<256x128xbf16>
    %cst_106 = arith.constant dense<0.000000e+00> : vector<16x128xf32>
    %266 = tpu.matmul %263, %265, %cst_106 {dimension_numbers = #tpu.dot_dimension_numbers<[1], [0], [0], [1], [0, 0, 1, 1], [], []>} : vector<16x256xbf16>, vector<256x128xbf16>, vector<16x128xf32> -> vector<16x128xf32>
    %c0_107 = arith.constant 0 : index
    %c0_108 = arith.constant 0 : index
    %c0_109 = arith.constant 0 : index
    %267 = vector.load %arg13[%c0_107, %c0_108, %c0_109] : memref<2x1x128xf32, #tpu.memory_space<vmem>>, vector<1x1x128xf32>
    %268 = vector.shape_cast %267 : vector<1x1x128xf32> to vector<1x128xf32>
    %269 = vector.broadcast %268 : vector<1x128xf32> to vector<16x128xf32>
    %270 = arith.addf %266, %269 : vector<16x128xf32>
    %271 = arith.addf %270, %241 : vector<16x128xf32>
    %c0_110 = arith.constant 0 : index
    %c0_111 = arith.constant 0 : index
    %c0_112 = arith.constant 0 : index
    %272 = vector.load %arg14[%c0_110, %c0_111, %c0_112] : memref<2x1x128xf32, #tpu.memory_space<vmem>>, vector<1x1x128xf32>
    %273 = vector.shape_cast %272 : vector<1x1x128xf32> to vector<1x128xf32>
    %c0_113 = arith.constant 0 : index
    %c0_114 = arith.constant 0 : index
    %c0_115 = arith.constant 0 : index
    %274 = vector.load %arg15[%c0_113, %c0_114, %c0_115] : memref<2x1x128xf32, #tpu.memory_space<vmem>>, vector<1x1x128xf32>
    %275 = vector.shape_cast %274 : vector<1x1x128xf32> to vector<1x128xf32>
    %cst_116 = arith.constant dense<0.000000e+00> : vector<16xf32>
    %276 = vector.multi_reduction <add>, %271, %cst_116 [1] : vector<16x128xf32> to vector<16xf32>
    %277 = vector.shape_cast %276 : vector<16xf32> to vector<16x1xf32>
    %cst_117 = arith.constant 1.280000e+02 : f32
    %278 = vector.broadcast %cst_117 : f32 to vector<16x1xf32>
    %279 = arith.divf %277, %278 : vector<16x1xf32>
    %280 = vector.broadcast %279 : vector<16x1xf32> to vector<16x128xf32>
    %281 = arith.subf %271, %280 : vector<16x128xf32>
    %282 = arith.mulf %281, %281 : vector<16x128xf32>
    %cst_118 = arith.constant dense<0.000000e+00> : vector<16xf32>
    %283 = vector.multi_reduction <add>, %282, %cst_118 [1] : vector<16x128xf32> to vector<16xf32>
    %284 = vector.shape_cast %283 : vector<16xf32> to vector<16x1xf32>
    %cst_119 = arith.constant 1.280000e+02 : f32
    %285 = vector.broadcast %cst_119 : f32 to vector<16x1xf32>
    %286 = arith.divf %284, %285 : vector<16x1xf32>
    %cst_120 = arith.constant 9.99999996E-13 : f32
    %287 = vector.broadcast %cst_120 : f32 to vector<16x1xf32>
    %288 = arith.addf %286, %287 : vector<16x1xf32>
    %289 = math.rsqrt %288 : vector<16x1xf32>
    %290 = vector.broadcast %289 : vector<16x1xf32> to vector<16x128xf32>
    %291 = arith.mulf %281, %290 : vector<16x128xf32>
    %292 = vector.broadcast %273 : vector<1x128xf32> to vector<16x128xf32>
    %293 = arith.mulf %291, %292 : vector<16x128xf32>
    %294 = vector.broadcast %275 : vector<1x128xf32> to vector<16x128xf32>
    %295 = arith.addf %293, %294 : vector<16x128xf32>
    %296 = arith.truncf %295 : vector<16x128xf32> to vector<16x128xbf16>
    %c1 = arith.constant 1 : index
    %c0_121 = arith.constant 0 : index
    %c0_122 = arith.constant 0 : index
    %297 = vector.load %arg4[%c1, %c0_121, %c0_122] : memref<2x128x384xbf16, #tpu.memory_space<vmem>>, vector<1x128x384xbf16>
    %298 = vector.shape_cast %297 : vector<1x128x384xbf16> to vector<128x384xbf16>
    %cst_123 = arith.constant dense<0.000000e+00> : vector<16x384xf32>
    %299 = tpu.matmul %296, %298, %cst_123 {dimension_numbers = #tpu.dot_dimension_numbers<[1], [0], [0], [1], [0, 0, 1, 1], [], []>} : vector<16x128xbf16>, vector<128x384xbf16>, vector<16x384xf32> -> vector<16x384xf32>
    %c1_124 = arith.constant 1 : index
    %c0_125 = arith.constant 0 : index
    %c0_126 = arith.constant 0 : index
    %300 = vector.load %arg5[%c1_124, %c0_125, %c0_126] : memref<2x1x384xf32, #tpu.memory_space<vmem>>, vector<1x1x384xf32>
    %301 = vector.shape_cast %300 : vector<1x1x384xf32> to vector<1x384xf32>
    %302 = vector.broadcast %301 : vector<1x384xf32> to vector<16x384xf32>
    %303 = arith.addf %299, %302 : vector<16x384xf32>
    %304 = arith.truncf %303 : vector<16x384xf32> to vector<16x384xbf16>
    %305 = vector.extract_strided_slice %28 {offsets = [0, 0], sizes = [1, 8], strides = [1, 1]} : vector<2x8xf32> to vector<1x8xf32>
    %306 = vector.extract_strided_slice %304 {offsets = [0, 0], sizes = [8, 32], strides = [1, 1]} : vector<16x384xbf16> to vector<8x32xbf16>
    %307 = vector.extract_strided_slice %304 {offsets = [0, 128], sizes = [8, 32], strides = [1, 1]} : vector<16x384xbf16> to vector<8x32xbf16>
    %308 = vector.extract_strided_slice %304 {offsets = [0, 256], sizes = [8, 32], strides = [1, 1]} : vector<16x384xbf16> to vector<8x32xbf16>
    "tpu.trace_start"() <{level = 10 : i32, message = "qd,kd->qk"}> : () -> ()
    %cst_127 = arith.constant dense<0.000000e+00> : vector<8x8xf32>
    %309 = tpu.matmul %306, %307, %cst_127 {dimension_numbers = #tpu.dot_dimension_numbers<[1], [1], [0], [0], [0, 0, 1, 0], [], []>} : vector<8x32xbf16>, vector<8x32xbf16>, vector<8x8xf32> -> vector<8x8xf32>
    "tpu.trace_stop"() : () -> ()
    %cst_128 = arith.constant 0.176776692 : f32
    %310 = vector.broadcast %cst_128 : f32 to vector<8x8xf32>
    %311 = arith.mulf %309, %310 : vector<8x8xf32>
    %312 = vector.broadcast %305 : vector<1x8xf32> to vector<8x8xf32>
    %313 = arith.addf %311, %312 : vector<8x8xf32>
    %cst_129 = arith.constant dense<0xFF800000> : vector<8xf32>
    %314 = vector.multi_reduction <maximumf>, %313, %cst_129 [1] : vector<8x8xf32> to vector<8xf32>
    %315 = vector.shape_cast %314 : vector<8xf32> to vector<8x1xf32>
    %316 = vector.broadcast %315 : vector<8x1xf32> to vector<8x8xf32>
    %317 = arith.subf %313, %316 : vector<8x8xf32>
    %318 = math.exp %317 : vector<8x8xf32>
    %cst_130 = arith.constant dense<0.000000e+00> : vector<8xf32>
    %319 = vector.multi_reduction <add>, %318, %cst_130 [1] : vector<8x8xf32> to vector<8xf32>
    %320 = vector.shape_cast %319 : vector<8xf32> to vector<8x1xf32>
    %321 = tpu.reciprocal %320 {approx = true} : vector<8x1xf32> -> vector<8x1xf32>
    %322 = vector.broadcast %321 : vector<8x1xf32> to vector<8x8xf32>
    %323 = arith.mulf %318, %322 : vector<8x8xf32>
    %324 = arith.truncf %323 : vector<8x8xf32> to vector<8x8xbf16>
    %cst_131 = arith.constant dense<0.000000e+00> : vector<8x32xf32>
    %325 = tpu.matmul %324, %308, %cst_131 {dimension_numbers = #tpu.dot_dimension_numbers<[1], [0], [0], [1], [0, 0, 1, 1], [], []>} : vector<8x8xbf16>, vector<8x32xbf16>, vector<8x32xf32> -> vector<8x32xf32>
    %c0_132 = arith.constant 0 : index
    %c0_133 = arith.constant 0 : index
    %326 = vector.load %arg21[%c0_132, %c0_133] : memref<16x128xf32, #tpu.memory_space<vmem>>, vector<8x32xf32>
    tpu.vector_store %arg21[%c0_132, %c0_133], %325 {strides = array<i32>} : memref<16x128xf32, #tpu.memory_space<vmem>>, vector<8x32xf32>,
    %327 = vector.extract_strided_slice %304 {offsets = [0, 32], sizes = [8, 32], strides = [1, 1]} : vector<16x384xbf16> to vector<8x32xbf16>
    %328 = vector.extract_strided_slice %304 {offsets = [0, 160], sizes = [8, 32], strides = [1, 1]} : vector<16x384xbf16> to vector<8x32xbf16>
    %329 = vector.extract_strided_slice %304 {offsets = [0, 288], sizes = [8, 32], strides = [1, 1]} : vector<16x384xbf16> to vector<8x32xbf16>
    "tpu.trace_start"() <{level = 10 : i32, message = "qd,kd->qk"}> : () -> ()
    %cst_134 = arith.constant dense<0.000000e+00> : vector<8x8xf32>
    %330 = tpu.matmul %327, %328, %cst_134 {dimension_numbers = #tpu.dot_dimension_numbers<[1], [1], [0], [0], [0, 0, 1, 0], [], []>} : vector<8x32xbf16>, vector<8x32xbf16>, vector<8x8xf32> -> vector<8x8xf32>
    "tpu.trace_stop"() : () -> ()
    %cst_135 = arith.constant 0.176776692 : f32
    %331 = vector.broadcast %cst_135 : f32 to vector<8x8xf32>
    %332 = arith.mulf %330, %331 : vector<8x8xf32>
    %333 = vector.broadcast %305 : vector<1x8xf32> to vector<8x8xf32>
    %334 = arith.addf %332, %333 : vector<8x8xf32>
    %cst_136 = arith.constant dense<0xFF800000> : vector<8xf32>
    %335 = vector.multi_reduction <maximumf>, %334, %cst_136 [1] : vector<8x8xf32> to vector<8xf32>
    %336 = vector.shape_cast %335 : vector<8xf32> to vector<8x1xf32>
    %337 = vector.broadcast %336 : vector<8x1xf32> to vector<8x8xf32>
    %338 = arith.subf %334, %337 : vector<8x8xf32>
    %339 = math.exp %338 : vector<8x8xf32>
    %cst_137 = arith.constant dense<0.000000e+00> : vector<8xf32>
    %340 = vector.multi_reduction <add>, %339, %cst_137 [1] : vector<8x8xf32> to vector<8xf32>
    %341 = vector.shape_cast %340 : vector<8xf32> to vector<8x1xf32>
    %342 = tpu.reciprocal %341 {approx = true} : vector<8x1xf32> -> vector<8x1xf32>
    %343 = vector.broadcast %342 : vector<8x1xf32> to vector<8x8xf32>
    %344 = arith.mulf %339, %343 : vector<8x8xf32>
    %345 = arith.truncf %344 : vector<8x8xf32> to vector<8x8xbf16>
    %cst_138 = arith.constant dense<0.000000e+00> : vector<8x32xf32>
    %346 = tpu.matmul %345, %329, %cst_138 {dimension_numbers = #tpu.dot_dimension_numbers<[1], [0], [0], [1], [0, 0, 1, 1], [], []>} : vector<8x8xbf16>, vector<8x32xbf16>, vector<8x32xf32> -> vector<8x32xf32>
    %c0_139 = arith.constant 0 : index
    %c32_140 = arith.constant 32 : index
    %347 = vector.load %arg21[%c0_139, %c32_140] : memref<16x128xf32, #tpu.memory_space<vmem>>, vector<8x32xf32>
    tpu.vector_store %arg21[%c0_139, %c32_140], %346 {strides = array<i32>} : memref<16x128xf32, #tpu.memory_space<vmem>>, vector<8x32xf32>,
    %348 = vector.extract_strided_slice %304 {offsets = [0, 64], sizes = [8, 32], strides = [1, 1]} : vector<16x384xbf16> to vector<8x32xbf16>
    %349 = vector.extract_strided_slice %304 {offsets = [0, 192], sizes = [8, 32], strides = [1, 1]} : vector<16x384xbf16> to vector<8x32xbf16>
    %350 = vector.extract_strided_slice %304 {offsets = [0, 320], sizes = [8, 32], strides = [1, 1]} : vector<16x384xbf16> to vector<8x32xbf16>
    "tpu.trace_start"() <{level = 10 : i32, message = "qd,kd->qk"}> : () -> ()
    %cst_141 = arith.constant dense<0.000000e+00> : vector<8x8xf32>
    %351 = tpu.matmul %348, %349, %cst_141 {dimension_numbers = #tpu.dot_dimension_numbers<[1], [1], [0], [0], [0, 0, 1, 0], [], []>} : vector<8x32xbf16>, vector<8x32xbf16>, vector<8x8xf32> -> vector<8x8xf32>
    "tpu.trace_stop"() : () -> ()
    %cst_142 = arith.constant 0.176776692 : f32
    %352 = vector.broadcast %cst_142 : f32 to vector<8x8xf32>
    %353 = arith.mulf %351, %352 : vector<8x8xf32>
    %354 = vector.broadcast %305 : vector<1x8xf32> to vector<8x8xf32>
    %355 = arith.addf %353, %354 : vector<8x8xf32>
    %cst_143 = arith.constant dense<0xFF800000> : vector<8xf32>
    %356 = vector.multi_reduction <maximumf>, %355, %cst_143 [1] : vector<8x8xf32> to vector<8xf32>
    %357 = vector.shape_cast %356 : vector<8xf32> to vector<8x1xf32>
    %358 = vector.broadcast %357 : vector<8x1xf32> to vector<8x8xf32>
    %359 = arith.subf %355, %358 : vector<8x8xf32>
    %360 = math.exp %359 : vector<8x8xf32>
    %cst_144 = arith.constant dense<0.000000e+00> : vector<8xf32>
    %361 = vector.multi_reduction <add>, %360, %cst_144 [1] : vector<8x8xf32> to vector<8xf32>
    %362 = vector.shape_cast %361 : vector<8xf32> to vector<8x1xf32>
    %363 = tpu.reciprocal %362 {approx = true} : vector<8x1xf32> -> vector<8x1xf32>
    %364 = vector.broadcast %363 : vector<8x1xf32> to vector<8x8xf32>
    %365 = arith.mulf %360, %364 : vector<8x8xf32>
    %366 = arith.truncf %365 : vector<8x8xf32> to vector<8x8xbf16>
    %cst_145 = arith.constant dense<0.000000e+00> : vector<8x32xf32>
    %367 = tpu.matmul %366, %350, %cst_145 {dimension_numbers = #tpu.dot_dimension_numbers<[1], [0], [0], [1], [0, 0, 1, 1], [], []>} : vector<8x8xbf16>, vector<8x32xbf16>, vector<8x32xf32> -> vector<8x32xf32>
    %c0_146 = arith.constant 0 : index
    %c64_147 = arith.constant 64 : index
    %368 = vector.load %arg21[%c0_146, %c64_147] : memref<16x128xf32, #tpu.memory_space<vmem>>, vector<8x32xf32>
    tpu.vector_store %arg21[%c0_146, %c64_147], %367 {strides = array<i32>} : memref<16x128xf32, #tpu.memory_space<vmem>>, vector<8x32xf32>,
    %369 = vector.extract_strided_slice %304 {offsets = [0, 96], sizes = [8, 32], strides = [1, 1]} : vector<16x384xbf16> to vector<8x32xbf16>
    %370 = vector.extract_strided_slice %304 {offsets = [0, 224], sizes = [8, 32], strides = [1, 1]} : vector<16x384xbf16> to vector<8x32xbf16>
    %371 = vector.extract_strided_slice %304 {offsets = [0, 352], sizes = [8, 32], strides = [1, 1]} : vector<16x384xbf16> to vector<8x32xbf16>
    "tpu.trace_start"() <{level = 10 : i32, message = "qd,kd->qk"}> : () -> ()
    %cst_148 = arith.constant dense<0.000000e+00> : vector<8x8xf32>
    %372 = tpu.matmul %369, %370, %cst_148 {dimension_numbers = #tpu.dot_dimension_numbers<[1], [1], [0], [0], [0, 0, 1, 0], [], []>} : vector<8x32xbf16>, vector<8x32xbf16>, vector<8x8xf32> -> vector<8x8xf32>
    "tpu.trace_stop"() : () -> ()
    %cst_149 = arith.constant 0.176776692 : f32
    %373 = vector.broadcast %cst_149 : f32 to vector<8x8xf32>
    %374 = arith.mulf %372, %373 : vector<8x8xf32>
    %375 = vector.broadcast %305 : vector<1x8xf32> to vector<8x8xf32>
    %376 = arith.addf %374, %375 : vector<8x8xf32>
    %cst_150 = arith.constant dense<0xFF800000> : vector<8xf32>
    %377 = vector.multi_reduction <maximumf>, %376, %cst_150 [1] : vector<8x8xf32> to vector<8xf32>
    %378 = vector.shape_cast %377 : vector<8xf32> to vector<8x1xf32>
    %379 = vector.broadcast %378 : vector<8x1xf32> to vector<8x8xf32>
    %380 = arith.subf %376, %379 : vector<8x8xf32>
    %381 = math.exp %380 : vector<8x8xf32>
    %cst_151 = arith.constant dense<0.000000e+00> : vector<8xf32>
    %382 = vector.multi_reduction <add>, %381, %cst_151 [1] : vector<8x8xf32> to vector<8xf32>
    %383 = vector.shape_cast %382 : vector<8xf32> to vector<8x1xf32>
    %384 = tpu.reciprocal %383 {approx = true} : vector<8x1xf32> -> vector<8x1xf32>
    %385 = vector.broadcast %384 : vector<8x1xf32> to vector<8x8xf32>
    %386 = arith.mulf %381, %385 : vector<8x8xf32>
    %387 = arith.truncf %386 : vector<8x8xf32> to vector<8x8xbf16>
    %cst_152 = arith.constant dense<0.000000e+00> : vector<8x32xf32>
    %388 = tpu.matmul %387, %371, %cst_152 {dimension_numbers = #tpu.dot_dimension_numbers<[1], [0], [0], [1], [0, 0, 1, 1], [], []>} : vector<8x8xbf16>, vector<8x32xbf16>, vector<8x32xf32> -> vector<8x32xf32>
    %c0_153 = arith.constant 0 : index
    %c96_154 = arith.constant 96 : index
    %389 = vector.load %arg21[%c0_153, %c96_154] : memref<16x128xf32, #tpu.memory_space<vmem>>, vector<8x32xf32>
    tpu.vector_store %arg21[%c0_153, %c96_154], %388 {strides = array<i32>} : memref<16x128xf32, #tpu.memory_space<vmem>>, vector<8x32xf32>,
    %390 = vector.extract_strided_slice %28 {offsets = [1, 0], sizes = [1, 8], strides = [1, 1]} : vector<2x8xf32> to vector<1x8xf32>
    %391 = vector.extract_strided_slice %304 {offsets = [8, 0], sizes = [8, 32], strides = [1, 1]} : vector<16x384xbf16> to vector<8x32xbf16>
    %392 = vector.extract_strided_slice %304 {offsets = [8, 128], sizes = [8, 32], strides = [1, 1]} : vector<16x384xbf16> to vector<8x32xbf16>
    %393 = vector.extract_strided_slice %304 {offsets = [8, 256], sizes = [8, 32], strides = [1, 1]} : vector<16x384xbf16> to vector<8x32xbf16>
    "tpu.trace_start"() <{level = 10 : i32, message = "qd,kd->qk"}> : () -> ()
    %cst_155 = arith.constant dense<0.000000e+00> : vector<8x8xf32>
    %394 = tpu.matmul %391, %392, %cst_155 {dimension_numbers = #tpu.dot_dimension_numbers<[1], [1], [0], [0], [0, 0, 1, 0], [], []>} : vector<8x32xbf16>, vector<8x32xbf16>, vector<8x8xf32> -> vector<8x8xf32>
    "tpu.trace_stop"() : () -> ()
    %cst_156 = arith.constant 0.176776692 : f32
    %395 = vector.broadcast %cst_156 : f32 to vector<8x8xf32>
    %396 = arith.mulf %394, %395 : vector<8x8xf32>
    %397 = vector.broadcast %390 : vector<1x8xf32> to vector<8x8xf32>
    %398 = arith.addf %396, %397 : vector<8x8xf32>
    %cst_157 = arith.constant dense<0xFF800000> : vector<8xf32>
    %399 = vector.multi_reduction <maximumf>, %398, %cst_157 [1] : vector<8x8xf32> to vector<8xf32>
    %400 = vector.shape_cast %399 : vector<8xf32> to vector<8x1xf32>
    %401 = vector.broadcast %400 : vector<8x1xf32> to vector<8x8xf32>
    %402 = arith.subf %398, %401 : vector<8x8xf32>
    %403 = math.exp %402 : vector<8x8xf32>
    %cst_158 = arith.constant dense<0.000000e+00> : vector<8xf32>
    %404 = vector.multi_reduction <add>, %403, %cst_158 [1] : vector<8x8xf32> to vector<8xf32>
    %405 = vector.shape_cast %404 : vector<8xf32> to vector<8x1xf32>
    %406 = tpu.reciprocal %405 {approx = true} : vector<8x1xf32> -> vector<8x1xf32>
    %407 = vector.broadcast %406 : vector<8x1xf32> to vector<8x8xf32>
    %408 = arith.mulf %403, %407 : vector<8x8xf32>
    %409 = arith.truncf %408 : vector<8x8xf32> to vector<8x8xbf16>
    %cst_159 = arith.constant dense<0.000000e+00> : vector<8x32xf32>
    %410 = tpu.matmul %409, %393, %cst_159 {dimension_numbers = #tpu.dot_dimension_numbers<[1], [0], [0], [1], [0, 0, 1, 1], [], []>} : vector<8x8xbf16>, vector<8x32xbf16>, vector<8x32xf32> -> vector<8x32xf32>
    %c8_160 = arith.constant 8 : index
    %c0_161 = arith.constant 0 : index
    %411 = vector.load %arg21[%c8_160, %c0_161] : memref<16x128xf32, #tpu.memory_space<vmem>>, vector<8x32xf32>
    tpu.vector_store %arg21[%c8_160, %c0_161], %410 {strides = array<i32>} : memref<16x128xf32, #tpu.memory_space<vmem>>, vector<8x32xf32>,
    %412 = vector.extract_strided_slice %304 {offsets = [8, 32], sizes = [8, 32], strides = [1, 1]} : vector<16x384xbf16> to vector<8x32xbf16>
    %413 = vector.extract_strided_slice %304 {offsets = [8, 160], sizes = [8, 32], strides = [1, 1]} : vector<16x384xbf16> to vector<8x32xbf16>
    %414 = vector.extract_strided_slice %304 {offsets = [8, 288], sizes = [8, 32], strides = [1, 1]} : vector<16x384xbf16> to vector<8x32xbf16>
    "tpu.trace_start"() <{level = 10 : i32, message = "qd,kd->qk"}> : () -> ()
    %cst_162 = arith.constant dense<0.000000e+00> : vector<8x8xf32>
    %415 = tpu.matmul %412, %413, %cst_162 {dimension_numbers = #tpu.dot_dimension_numbers<[1], [1], [0], [0], [0, 0, 1, 0], [], []>} : vector<8x32xbf16>, vector<8x32xbf16>, vector<8x8xf32> -> vector<8x8xf32>
    "tpu.trace_stop"() : () -> ()
    %cst_163 = arith.constant 0.176776692 : f32
    %416 = vector.broadcast %cst_163 : f32 to vector<8x8xf32>
    %417 = arith.mulf %415, %416 : vector<8x8xf32>
    %418 = vector.broadcast %390 : vector<1x8xf32> to vector<8x8xf32>
    %419 = arith.addf %417, %418 : vector<8x8xf32>
    %cst_164 = arith.constant dense<0xFF800000> : vector<8xf32>
    %420 = vector.multi_reduction <maximumf>, %419, %cst_164 [1] : vector<8x8xf32> to vector<8xf32>
    %421 = vector.shape_cast %420 : vector<8xf32> to vector<8x1xf32>
    %422 = vector.broadcast %421 : vector<8x1xf32> to vector<8x8xf32>
    %423 = arith.subf %419, %422 : vector<8x8xf32>
    %424 = math.exp %423 : vector<8x8xf32>
    %cst_165 = arith.constant dense<0.000000e+00> : vector<8xf32>
    %425 = vector.multi_reduction <add>, %424, %cst_165 [1] : vector<8x8xf32> to vector<8xf32>
    %426 = vector.shape_cast %425 : vector<8xf32> to vector<8x1xf32>
    %427 = tpu.reciprocal %426 {approx = true} : vector<8x1xf32> -> vector<8x1xf32>
    %428 = vector.broadcast %427 : vector<8x1xf32> to vector<8x8xf32>
    %429 = arith.mulf %424, %428 : vector<8x8xf32>
    %430 = arith.truncf %429 : vector<8x8xf32> to vector<8x8xbf16>
    %cst_166 = arith.constant dense<0.000000e+00> : vector<8x32xf32>
    %431 = tpu.matmul %430, %414, %cst_166 {dimension_numbers = #tpu.dot_dimension_numbers<[1], [0], [0], [1], [0, 0, 1, 1], [], []>} : vector<8x8xbf16>, vector<8x32xbf16>, vector<8x32xf32> -> vector<8x32xf32>
    %c8_167 = arith.constant 8 : index
    %c32_168 = arith.constant 32 : index
    %432 = vector.load %arg21[%c8_167, %c32_168] : memref<16x128xf32, #tpu.memory_space<vmem>>, vector<8x32xf32>
    tpu.vector_store %arg21[%c8_167, %c32_168], %431 {strides = array<i32>} : memref<16x128xf32, #tpu.memory_space<vmem>>, vector<8x32xf32>,
    %433 = vector.extract_strided_slice %304 {offsets = [8, 64], sizes = [8, 32], strides = [1, 1]} : vector<16x384xbf16> to vector<8x32xbf16>
    %434 = vector.extract_strided_slice %304 {offsets = [8, 192], sizes = [8, 32], strides = [1, 1]} : vector<16x384xbf16> to vector<8x32xbf16>
    %435 = vector.extract_strided_slice %304 {offsets = [8, 320], sizes = [8, 32], strides = [1, 1]} : vector<16x384xbf16> to vector<8x32xbf16>
    "tpu.trace_start"() <{level = 10 : i32, message = "qd,kd->qk"}> : () -> ()
    %cst_169 = arith.constant dense<0.000000e+00> : vector<8x8xf32>
    %436 = tpu.matmul %433, %434, %cst_169 {dimension_numbers = #tpu.dot_dimension_numbers<[1], [1], [0], [0], [0, 0, 1, 0], [], []>} : vector<8x32xbf16>, vector<8x32xbf16>, vector<8x8xf32> -> vector<8x8xf32>
    "tpu.trace_stop"() : () -> ()
    %cst_170 = arith.constant 0.176776692 : f32
    %437 = vector.broadcast %cst_170 : f32 to vector<8x8xf32>
    %438 = arith.mulf %436, %437 : vector<8x8xf32>
    %439 = vector.broadcast %390 : vector<1x8xf32> to vector<8x8xf32>
    %440 = arith.addf %438, %439 : vector<8x8xf32>
    %cst_171 = arith.constant dense<0xFF800000> : vector<8xf32>
    %441 = vector.multi_reduction <maximumf>, %440, %cst_171 [1] : vector<8x8xf32> to vector<8xf32>
    %442 = vector.shape_cast %441 : vector<8xf32> to vector<8x1xf32>
    %443 = vector.broadcast %442 : vector<8x1xf32> to vector<8x8xf32>
    %444 = arith.subf %440, %443 : vector<8x8xf32>
    %445 = math.exp %444 : vector<8x8xf32>
    %cst_172 = arith.constant dense<0.000000e+00> : vector<8xf32>
    %446 = vector.multi_reduction <add>, %445, %cst_172 [1] : vector<8x8xf32> to vector<8xf32>
    %447 = vector.shape_cast %446 : vector<8xf32> to vector<8x1xf32>
    %448 = tpu.reciprocal %447 {approx = true} : vector<8x1xf32> -> vector<8x1xf32>
    %449 = vector.broadcast %448 : vector<8x1xf32> to vector<8x8xf32>
    %450 = arith.mulf %445, %449 : vector<8x8xf32>
    %451 = arith.truncf %450 : vector<8x8xf32> to vector<8x8xbf16>
    %cst_173 = arith.constant dense<0.000000e+00> : vector<8x32xf32>
    %452 = tpu.matmul %451, %435, %cst_173 {dimension_numbers = #tpu.dot_dimension_numbers<[1], [0], [0], [1], [0, 0, 1, 1], [], []>} : vector<8x8xbf16>, vector<8x32xbf16>, vector<8x32xf32> -> vector<8x32xf32>
    %c8_174 = arith.constant 8 : index
    %c64_175 = arith.constant 64 : index
    %453 = vector.load %arg21[%c8_174, %c64_175] : memref<16x128xf32, #tpu.memory_space<vmem>>, vector<8x32xf32>
    tpu.vector_store %arg21[%c8_174, %c64_175], %452 {strides = array<i32>} : memref<16x128xf32, #tpu.memory_space<vmem>>, vector<8x32xf32>,
    %454 = vector.extract_strided_slice %304 {offsets = [8, 96], sizes = [8, 32], strides = [1, 1]} : vector<16x384xbf16> to vector<8x32xbf16>
    %455 = vector.extract_strided_slice %304 {offsets = [8, 224], sizes = [8, 32], strides = [1, 1]} : vector<16x384xbf16> to vector<8x32xbf16>
    %456 = vector.extract_strided_slice %304 {offsets = [8, 352], sizes = [8, 32], strides = [1, 1]} : vector<16x384xbf16> to vector<8x32xbf16>
    "tpu.trace_start"() <{level = 10 : i32, message = "qd,kd->qk"}> : () -> ()
    %cst_176 = arith.constant dense<0.000000e+00> : vector<8x8xf32>
    %457 = tpu.matmul %454, %455, %cst_176 {dimension_numbers = #tpu.dot_dimension_numbers<[1], [1], [0], [0], [0, 0, 1, 0], [], []>} : vector<8x32xbf16>, vector<8x32xbf16>, vector<8x8xf32> -> vector<8x8xf32>
    "tpu.trace_stop"() : () -> ()
    %cst_177 = arith.constant 0.176776692 : f32
    %458 = vector.broadcast %cst_177 : f32 to vector<8x8xf32>
    %459 = arith.mulf %457, %458 : vector<8x8xf32>
    %460 = vector.broadcast %390 : vector<1x8xf32> to vector<8x8xf32>
    %461 = arith.addf %459, %460 : vector<8x8xf32>
    %cst_178 = arith.constant dense<0xFF800000> : vector<8xf32>
    %462 = vector.multi_reduction <maximumf>, %461, %cst_178 [1] : vector<8x8xf32> to vector<8xf32>
    %463 = vector.shape_cast %462 : vector<8xf32> to vector<8x1xf32>
    %464 = vector.broadcast %463 : vector<8x1xf32> to vector<8x8xf32>
    %465 = arith.subf %461, %464 : vector<8x8xf32>
    %466 = math.exp %465 : vector<8x8xf32>
    %cst_179 = arith.constant dense<0.000000e+00> : vector<8xf32>
    %467 = vector.multi_reduction <add>, %466, %cst_179 [1] : vector<8x8xf32> to vector<8xf32>
    %468 = vector.shape_cast %467 : vector<8xf32> to vector<8x1xf32>
    %469 = tpu.reciprocal %468 {approx = true} : vector<8x1xf32> -> vector<8x1xf32>
    %470 = vector.broadcast %469 : vector<8x1xf32> to vector<8x8xf32>
    %471 = arith.mulf %466, %470 : vector<8x8xf32>
    %472 = arith.truncf %471 : vector<8x8xf32> to vector<8x8xbf16>
    %cst_180 = arith.constant dense<0.000000e+00> : vector<8x32xf32>
    %473 = tpu.matmul %472, %456, %cst_180 {dimension_numbers = #tpu.dot_dimension_numbers<[1], [0], [0], [1], [0, 0, 1, 1], [], []>} : vector<8x8xbf16>, vector<8x32xbf16>, vector<8x32xf32> -> vector<8x32xf32>
    %c8_181 = arith.constant 8 : index
    %c96_182 = arith.constant 96 : index
    %474 = vector.load %arg21[%c8_181, %c96_182] : memref<16x128xf32, #tpu.memory_space<vmem>>, vector<8x32xf32>
    tpu.vector_store %arg21[%c8_181, %c96_182], %473 {strides = array<i32>} : memref<16x128xf32, #tpu.memory_space<vmem>>, vector<8x32xf32>,
    %c0_183 = arith.constant 0 : index
    %c0_184 = arith.constant 0 : index
    %475 = vector.load %arg21[%c0_183, %c0_184] : memref<16x128xf32, #tpu.memory_space<vmem>>, vector<16x128xf32>
    %476 = arith.truncf %475 : vector<16x128xf32> to vector<16x128xbf16>
    %c1_185 = arith.constant 1 : index
    %c0_186 = arith.constant 0 : index
    %c0_187 = arith.constant 0 : index
    %477 = vector.load %arg6[%c1_185, %c0_186, %c0_187] : memref<2x128x128xbf16, #tpu.memory_space<vmem>>, vector<1x128x128xbf16>
    %478 = vector.shape_cast %477 : vector<1x128x128xbf16> to vector<128x128xbf16>
    %cst_188 = arith.constant dense<0.000000e+00> : vector<16x128xf32>
    %479 = tpu.matmul %476, %478, %cst_188 {dimension_numbers = #tpu.dot_dimension_numbers<[1], [0], [0], [1], [0, 0, 1, 1], [], []>} : vector<16x128xbf16>, vector<128x128xbf16>, vector<16x128xf32> -> vector<16x128xf32>
    %c1_189 = arith.constant 1 : index
    %c0_190 = arith.constant 0 : index
    %c0_191 = arith.constant 0 : index
    %480 = vector.load %arg7[%c1_189, %c0_190, %c0_191] : memref<2x1x128xf32, #tpu.memory_space<vmem>>, vector<1x1x128xf32>
    %481 = vector.shape_cast %480 : vector<1x1x128xf32> to vector<1x128xf32>
    %482 = vector.broadcast %481 : vector<1x128xf32> to vector<16x128xf32>
    %483 = arith.addf %479, %482 : vector<16x128xf32>
    %484 = arith.addf %483, %295 : vector<16x128xf32>
    %c1_192 = arith.constant 1 : index
    %c0_193 = arith.constant 0 : index
    %c0_194 = arith.constant 0 : index
    %485 = vector.load %arg8[%c1_192, %c0_193, %c0_194] : memref<2x1x128xf32, #tpu.memory_space<vmem>>, vector<1x1x128xf32>
    %486 = vector.shape_cast %485 : vector<1x1x128xf32> to vector<1x128xf32>
    %c1_195 = arith.constant 1 : index
    %c0_196 = arith.constant 0 : index
    %c0_197 = arith.constant 0 : index
    %487 = vector.load %arg9[%c1_195, %c0_196, %c0_197] : memref<2x1x128xf32, #tpu.memory_space<vmem>>, vector<1x1x128xf32>
    %488 = vector.shape_cast %487 : vector<1x1x128xf32> to vector<1x128xf32>
    %cst_198 = arith.constant dense<0.000000e+00> : vector<16xf32>
    %489 = vector.multi_reduction <add>, %484, %cst_198 [1] : vector<16x128xf32> to vector<16xf32>
    %490 = vector.shape_cast %489 : vector<16xf32> to vector<16x1xf32>
    %cst_199 = arith.constant 1.280000e+02 : f32
    %491 = vector.broadcast %cst_199 : f32 to vector<16x1xf32>
    %492 = arith.divf %490, %491 : vector<16x1xf32>
    %493 = vector.broadcast %492 : vector<16x1xf32> to vector<16x128xf32>
    %494 = arith.subf %484, %493 : vector<16x128xf32>
    %495 = arith.mulf %494, %494 : vector<16x128xf32>
    %cst_200 = arith.constant dense<0.000000e+00> : vector<16xf32>
    %496 = vector.multi_reduction <add>, %495, %cst_200 [1] : vector<16x128xf32> to vector<16xf32>
    %497 = vector.shape_cast %496 : vector<16xf32> to vector<16x1xf32>
    %cst_201 = arith.constant 1.280000e+02 : f32
    %498 = vector.broadcast %cst_201 : f32 to vector<16x1xf32>
    %499 = arith.divf %497, %498 : vector<16x1xf32>
    %cst_202 = arith.constant 9.99999996E-13 : f32
    %500 = vector.broadcast %cst_202 : f32 to vector<16x1xf32>
    %501 = arith.addf %499, %500 : vector<16x1xf32>
    %502 = math.rsqrt %501 : vector<16x1xf32>
    %503 = vector.broadcast %502 : vector<16x1xf32> to vector<16x128xf32>
    %504 = arith.mulf %494, %503 : vector<16x128xf32>
    %505 = vector.broadcast %486 : vector<1x128xf32> to vector<16x128xf32>
    %506 = arith.mulf %504, %505 : vector<16x128xf32>
    %507 = vector.broadcast %488 : vector<1x128xf32> to vector<16x128xf32>
    %508 = arith.addf %506, %507 : vector<16x128xf32>
    %509 = arith.truncf %508 : vector<16x128xf32> to vector<16x128xbf16>
    %c1_203 = arith.constant 1 : index
    %c0_204 = arith.constant 0 : index
    %c0_205 = arith.constant 0 : index
    %510 = vector.load %arg10[%c1_203, %c0_204, %c0_205] : memref<2x128x256xbf16, #tpu.memory_space<vmem>>, vector<1x128x256xbf16>
    %511 = vector.shape_cast %510 : vector<1x128x256xbf16> to vector<128x256xbf16>
    %cst_206 = arith.constant dense<0.000000e+00> : vector<16x256xf32>
    %512 = tpu.matmul %509, %511, %cst_206 {dimension_numbers = #tpu.dot_dimension_numbers<[1], [0], [0], [1], [0, 0, 1, 1], [], []>} : vector<16x128xbf16>, vector<128x256xbf16>, vector<16x256xf32> -> vector<16x256xf32>
    %c1_207 = arith.constant 1 : index
    %c0_208 = arith.constant 0 : index
    %c0_209 = arith.constant 0 : index
    %513 = vector.load %arg11[%c1_207, %c0_208, %c0_209] : memref<2x1x256xf32, #tpu.memory_space<vmem>>, vector<1x1x256xf32>
    %514 = vector.shape_cast %513 : vector<1x1x256xf32> to vector<1x256xf32>
    %515 = vector.broadcast %514 : vector<1x256xf32> to vector<16x256xf32>
    %516 = arith.addf %512, %515 : vector<16x256xf32>
    %cst_210 = arith.constant 5.000000e-01 : f32
    %517 = vector.broadcast %cst_210 : f32 to vector<16x256xf32>
    %518 = arith.mulf %517, %516 : vector<16x256xf32>
    %cst_211 = arith.constant 4.471500e-02 : f32
    %519 = vector.broadcast %cst_211 : f32 to vector<16x256xf32>
    %520 = arith.mulf %519, %516 : vector<16x256xf32>
    %521 = arith.mulf %520, %516 : vector<16x256xf32>
    %522 = arith.mulf %521, %516 : vector<16x256xf32>
    %523 = arith.addf %516, %522 : vector<16x256xf32>
    %cst_212 = arith.constant 0.797884583 : f32
    %524 = vector.broadcast %cst_212 : f32 to vector<16x256xf32>
    %525 = arith.mulf %524, %523 : vector<16x256xf32>
    %526 = math.tanh %525 : vector<16x256xf32>
    %cst_213 = arith.constant 1.000000e+00 : f32
    %527 = vector.broadcast %cst_213 : f32 to vector<16x256xf32>
    %528 = arith.addf %527, %526 : vector<16x256xf32>
    %529 = arith.mulf %518, %528 : vector<16x256xf32>
    %530 = arith.truncf %529 : vector<16x256xf32> to vector<16x256xbf16>
    %c1_214 = arith.constant 1 : index
    %c0_215 = arith.constant 0 : index
    %c0_216 = arith.constant 0 : index
    %531 = vector.load %arg12[%c1_214, %c0_215, %c0_216] : memref<2x256x128xbf16, #tpu.memory_space<vmem>>, vector<1x256x128xbf16>
    %532 = vector.shape_cast %531 : vector<1x256x128xbf16> to vector<256x128xbf16>
    %cst_217 = arith.constant dense<0.000000e+00> : vector<16x128xf32>
    %533 = tpu.matmul %530, %532, %cst_217 {dimension_numbers = #tpu.dot_dimension_numbers<[1], [0], [0], [1], [0, 0, 1, 1], [], []>} : vector<16x256xbf16>, vector<256x128xbf16>, vector<16x128xf32> -> vector<16x128xf32>
    %c1_218 = arith.constant 1 : index
    %c0_219 = arith.constant 0 : index
    %c0_220 = arith.constant 0 : index
    %534 = vector.load %arg13[%c1_218, %c0_219, %c0_220] : memref<2x1x128xf32, #tpu.memory_space<vmem>>, vector<1x1x128xf32>
    %535 = vector.shape_cast %534 : vector<1x1x128xf32> to vector<1x128xf32>
    %536 = vector.broadcast %535 : vector<1x128xf32> to vector<16x128xf32>
    %537 = arith.addf %533, %536 : vector<16x128xf32>
    %538 = arith.addf %537, %508 : vector<16x128xf32>
    %c1_221 = arith.constant 1 : index
    %c0_222 = arith.constant 0 : index
    %c0_223 = arith.constant 0 : index
    %539 = vector.load %arg14[%c1_221, %c0_222, %c0_223] : memref<2x1x128xf32, #tpu.memory_space<vmem>>, vector<1x1x128xf32>
    %540 = vector.shape_cast %539 : vector<1x1x128xf32> to vector<1x128xf32>
    %c1_224 = arith.constant 1 : index
    %c0_225 = arith.constant 0 : index
    %c0_226 = arith.constant 0 : index
    %541 = vector.load %arg15[%c1_224, %c0_225, %c0_226] : memref<2x1x128xf32, #tpu.memory_space<vmem>>, vector<1x1x128xf32>
    %542 = vector.shape_cast %541 : vector<1x1x128xf32> to vector<1x128xf32>
    %cst_227 = arith.constant dense<0.000000e+00> : vector<16xf32>
    %543 = vector.multi_reduction <add>, %538, %cst_227 [1] : vector<16x128xf32> to vector<16xf32>
    %544 = vector.shape_cast %543 : vector<16xf32> to vector<16x1xf32>
    %cst_228 = arith.constant 1.280000e+02 : f32
    %545 = vector.broadcast %cst_228 : f32 to vector<16x1xf32>
    %546 = arith.divf %544, %545 : vector<16x1xf32>
    %547 = vector.broadcast %546 : vector<16x1xf32> to vector<16x128xf32>
    %548 = arith.subf %538, %547 : vector<16x128xf32>
    %549 = arith.mulf %548, %548 : vector<16x128xf32>
    %cst_229 = arith.constant dense<0.000000e+00> : vector<16xf32>
    %550 = vector.multi_reduction <add>, %549, %cst_229 [1] : vector<16x128xf32> to vector<16xf32>
    %551 = vector.shape_cast %550 : vector<16xf32> to vector<16x1xf32>
    %cst_230 = arith.constant 1.280000e+02 : f32
    %552 = vector.broadcast %cst_230 : f32 to vector<16x1xf32>
    %553 = arith.divf %551, %552 : vector<16x1xf32>
    %cst_231 = arith.constant 9.99999996E-13 : f32
    %554 = vector.broadcast %cst_231 : f32 to vector<16x1xf32>
    %555 = arith.addf %553, %554 : vector<16x1xf32>
    %556 = math.rsqrt %555 : vector<16x1xf32>
    %557 = vector.broadcast %556 : vector<16x1xf32> to vector<16x128xf32>
    %558 = arith.mulf %548, %557 : vector<16x128xf32>
    %559 = vector.broadcast %540 : vector<1x128xf32> to vector<16x128xf32>
    %560 = arith.mulf %558, %559 : vector<16x128xf32>
    %561 = vector.broadcast %542 : vector<1x128xf32> to vector<16x128xf32>
    %562 = arith.addf %560, %561 : vector<16x128xf32>
    %563 = arith.truncf %562 : vector<16x128xf32> to vector<16x128xbf16>
    %c0_232 = arith.constant 0 : index
    %c0_233 = arith.constant 0 : index
    %564 = vector.load %arg16[%c0_232, %c0_233] : memref<128x128xbf16, #tpu.memory_space<vmem>>, vector<128x128xbf16>
    %cst_234 = arith.constant dense<0.000000e+00> : vector<16x128xf32>
    %565 = tpu.matmul %563, %564, %cst_234 {dimension_numbers = #tpu.dot_dimension_numbers<[1], [0], [0], [1], [0, 0, 1, 1], [], []>} : vector<16x128xbf16>, vector<128x128xbf16>, vector<16x128xf32> -> vector<16x128xf32>
    %c0_235 = arith.constant 0 : index
    %c0_236 = arith.constant 0 : index
    %566 = vector.load %arg17[%c0_235, %c0_236] : memref<1x128xf32, #tpu.memory_space<vmem>>, vector<1x128xf32>
    %567 = vector.broadcast %566 : vector<1x128xf32> to vector<16x128xf32>
    %568 = arith.addf %565, %567 : vector<16x128xf32>
    %569 = math.tanh %568 : vector<16x128xf32>
    %570 = arith.truncf %569 : vector<16x128xf32> to vector<16x128xbf16>
    %c0_237 = arith.constant 0 : index
    %c0_238 = arith.constant 0 : index
    %571 = vector.load %arg18[%c0_237, %c0_238] : memref<128x128xbf16, #tpu.memory_space<vmem>>, vector<128x128xbf16>
    %cst_239 = arith.constant dense<0.000000e+00> : vector<16x128xf32>
    %572 = tpu.matmul %570, %571, %cst_239 {dimension_numbers = #tpu.dot_dimension_numbers<[1], [0], [0], [1], [0, 0, 1, 1], [], []>} : vector<16x128xbf16>, vector<128x128xbf16>, vector<16x128xf32> -> vector<16x128xf32>
    %c0_240 = arith.constant 0 : index
    %c0_241 = arith.constant 0 : index
    %573 = vector.load %arg19[%c0_240, %c0_241] : memref<1x128xf32, #tpu.memory_space<vmem>>, vector<1x128xf32>
    %574 = vector.broadcast %573 : vector<1x128xf32> to vector<16x128xf32>
    %575 = arith.addf %572, %574 : vector<16x128xf32>
    %c0_242 = arith.constant 0 : index
    %c0_243 = arith.constant 0 : index
    %576 = vector.load %arg20[%c0_242, %c0_243] : memref<16x128xf32, #tpu.memory_space<vmem>>, vector<16x128xf32>
    tpu.vector_store %arg20[%c0_242, %c0_243], %575 {strides = array<i32>} : memref<16x128xf32, #tpu.memory_space<vmem>>, vector<16x128xf32>,
    return
  }
}

</mosaic_0001>

<bundles_post_ra>
// kernel: psychbert_classifier_forward.1
= control target key start
LH: loop header
LB: loop body
LE: loop exit
PB: predicated region body
PF: predicated region fallthrough
CT: control target
= control target key end

     0   :  { %s4518_s0 = inlined_call_operand.vmem [shape: f32[16,128], index: 0, kind: input, shape index: {}]   ;;  %s4519_s1 = inlined_call_operand.vmem [shape: s32[2,8], index: 1, kind: input, shape index: {}]   ;;  %s4520_s2 = inlined_call_operand.vmem [shape: f32[1,128], index: 2, kind: input, shape index: {}]   ;;  %s4521_s3 = inlined_call_operand.vmem [shape: f32[1,128], index: 3, kind: input, shape index: {}]   ;;  %s4522_s4 = inlined_call_operand.hbm [shape: bf16[2,128,384], index: 4, kind: input, shape index: {}]   ;;  %s4523_s5 = inlined_call_operand.vmem [shape: f32[2,1,384], index: 5, kind: input, shape index: {}]   ;;  %s4524_s6 = inlined_call_operand.vmem [shape: bf16[2,128,128], index: 6, kind: input, shape index: {}]   ;;  %s4525_s7 = inlined_call_operand.vmem [shape: f32[2,1,128], index: 7, kind: input, shape index: {}]   ;;  %s4526_s8 = inlined_call_operand.vmem [shape: f32[2,1,128], index: 8, kind: input, shape index: {}]   ;;  %s4527_s9 = inlined_call_operand.vmem [shape: f32[2,1,128], index: 9, kind: input, shape index: {}]   ;;  %s4528_s10 = inlined_call_operand.hbm [shape: bf16[2,128,256], index: 10, kind: input, shape index: {}]   ;;  %s4529_s11 = inlined_call_operand.vmem [shape: f32[2,1,256], index: 11, kind: input, shape index: {}]   ;;  %s4530_s12 = inlined_call_operand.hbm [shape: bf16[2,256,128], index: 12, kind: input, shape index: {}]   ;;  %s4531_s13 = inlined_call_operand.vmem [shape: f32[2,1,128], index: 13, kind: input, shape index: {}]   ;;  %s4532_s14 = inlined_call_operand.vmem [shape: f32[2,1,128], index: 14, kind: input, shape index: {}]   ;;  %s4533_s15 = inlined_call_operand.vmem [shape: f32[2,1,128], index: 15, kind: input, shape index: {}]   ;;  %s4534_s16 = inlined_call_operand.hbm [shape: bf16[128,128], index: 16, kind: input, shape index: {}]   ;;  %s4535_s17 = inlined_call_operand.vmem [shape: f32[1,128], index: 17, kind: input, shape index: {}]   ;;  %s4536_s18 = inlined_call_operand.hbm [shape: bf16[128,128], index: 18, kind: input, shape index: {}]   ;;  %s4537_s19 = inlined_call_operand.vmem [shape: f32[1,128], index: 19, kind: input, shape index: {}]   ;;  %s4538_s20 = inlined_call_operand.vmem [shape: f32[16,128], index: 20, kind: output, shape index: {}]  }
   0x1   :  { %4540 = sst [smem:[#allocation14_spill]] %s4518_s0 }
   0x2   :  { %4541 = sst [smem:[#allocation15_spill]] %s4519_s1 }
   0x3   :  { %4542 = sst [smem:[#allocation16_spill]] %s4520_s2 }
   0x4   :  { %4543 = sst [smem:[#allocation17_spill]] %s4521_s3 }
   0x5   :  { %4544 = sst [smem:[#allocation18_spill]] %s4522_s4 }
   0x6   :  { %25 = vsyncpa [#allocation4], 0 }
   0x7   :  { %26 = vsyncpa [#allocation6], 0  ;;  %s63_s23 = sshll.u32 %s4528_s10, 4  ;;  %s64_s23 = int_to_ptr.hbm [resolvable:$true] %s63_s23 }
   0x8   :  { %27 = vsyncpa [#allocation9], 0  ;;  %s3918_s24 = smov [#allocation5]   ;;  %s3919_s25 = smov 128  }
   0x9   :  { %s65_s2 = sshll.u32 %s3918_s24, 4  ;;  %s3920_s3 = smov 8   ;;  %s66_s2 = int_to_ptr.vmem [resolvable:$true] %s65_s2 }
   0xa   :  { %71 = dma.hbm_to_vmem [thread:$0]  %s64_s23, 4096, %s66_s2, [#allocation6], %s3919_s25, %s3919_s25, %s3920_s3  }
   0xb   :  { %s97_s28 = sshll.u32 %s4534_s16, 4  ;;  %s3921_s4 = smov [#allocation8]   ;;  %s98_s28 = int_to_ptr.hbm [resolvable:$true] %s97_s28 }
   0xc   :  { %s99_s29 = sshll.u32 %s3921_s4, 4  ;;  %s4545_s21 = sld [smem:[#allocation18_spill]]  ;;  %s100_s29 = int_to_ptr.vmem [resolvable:$true] %s99_s29 }
   0xd   :  { %s3922_s10 = smov 64   ;;  %s3923_s22 = smov 4  }
   0xe   :  { %105 = dma.hbm_to_vmem [thread:$0]  %s98_s28, 1024, %s100_s29, [#allocation9], %s3922_s10, %s3922_s10, %s3923_s22  }
   0xf   :  { %s3924_s24 = smov [#allocation3]   ;;  %s78_s16 = sshll.u32 %s4530_s12, 4  ;;  %s79_s16 = int_to_ptr.hbm [resolvable:$true] %s78_s16 }
  0x10   :  { %s42_s23 = sshll.u32 %s3924_s24, 4  ;;  %s3925_s3 = smov 192   ;;  %s43_s23 = int_to_ptr.vmem [resolvable:$true] %s42_s23 }
  0x11   :  { %s3926_s26 = smov 12   ;;  %s3927_s27 = smov [#allocation7]  }
  0x12   :  { %s40_s1 = sshll.u32 %s4545_s21, 4  ;;  %s80_s4 = sshll.u32 %s3927_s27, 4  ;;  %s41_s1 = int_to_ptr.hbm [resolvable:$true] %s40_s1  ;;  %s81_s4 = int_to_ptr.vmem [resolvable:$true] %s80_s4 }
  0x13   :  { %48 = dma.hbm_to_vmem [thread:$0]  %s41_s1, 6144, %s43_s23, [#allocation4], %s3925_s3, %s3925_s3, %s3926_s26  }
  0x14   :  { %s112_s21 = sshll.u32 %s4536_s18, 4  ;;  %s3928_s28 = smov [#allocation10]   ;;  %s113_s21 = int_to_ptr.hbm [resolvable:$true] %s112_s21 }
  0x15   :  { %86 = dma.hbm_to_vmem [thread:$0]  %s79_s16, 4096, %s81_s4, [#allocation6], %s3922_s10, %s3922_s10, %s3923_s22  }
  0x16   :  { %s114_s29 = sshll.u32 %s3928_s28, 4  ;;  %s115_s29 = int_to_ptr.vmem [resolvable:$true] %s114_s29 }
  0x17   :  { %120 = dma.hbm_to_vmem [thread:$0]  %s113_s21, 1024, %s115_s29, [#allocation9], %s3922_s10, %s3922_s10, %s3923_s22  }
  0x18   :  { %3912 = dma.done.wait [#allocation4], 6144  }
  0x19   :  { %3913 = vsyncadd [#allocation4], 4294961152 }
  0x1a   :  { %3914 = dma.done.wait [#allocation6], 8192  }
  0x1b   :  { %3915 = vsyncadd [#allocation6], 4294959104 }
  0x1c   :  { %3916 = dma.done.wait [#allocation9], 2048  }
  0x1d   :  { %3917 = vsyncadd [#allocation9], 4294965248  ;;  %s4546_s18 = sld [smem:[#allocation14_spill]]  ;;  %v3929_v2 = vmov 128.0   ;;  %v2966_v17 = vld [vmem:[#allocation3 + $0xa8] sm:$0xf] }
  0x1e   :  { %3686 = vrcp.f32 %v3929_v2  ;;  %v3534_v18 = vld [vmem:[#allocation3 + $0xb0] sm:$0xf0]  ;;  %v3533_v19 = vld [vmem:[#allocation3 + $0xac] sm:$0xf]  ;;  %v2968_v21 = vld [vmem:[#allocation3 + $0xb4] sm:$0xf0] }
  0x1f   :  { %v2967_v20 = vor.u32 %v3534_v18, %v2966_v17  ;;  %v2974_v22 = vld [vmem:[#allocation3 + $0xb0] sm:$0xf]  ;;  %v3535_v23 = vld [vmem:[#allocation3 + $0xb8] sm:$0xf0]  ;;  %v2971_v24 = vor.u32 %v3533_v19, %v2968_v21  ;;  %v3530_v28 = vld [vmem:[#allocation3 + $0x94] sm:$0xf] }
  0x20   :  { %v2975_v25 = vor.u32 %v3535_v23, %v2974_v22  ;;  %v2954_v26 = vld [vmem:[#allocation3 + $0x90] sm:$0xf]  ;;  %v3531_v27 = vld [vmem:[#allocation3 + $0x98] sm:$0xf0]  ;;  %v2956_v30 = vld [vmem:[#allocation3 + $0x9c] sm:$0xf0] }
  0x21   :  { %378 = vmatpush.bf16.msra.mxu0 %v2967_v20  ;;  %392 = vmatpush.bf16.msra.mxu1 %v2971_v24  ;;  %v2955_v29 = vor.u32 %v3531_v27, %v2954_v26  ;;  %v2962_v31 = vld [vmem:[#allocation3 + $0x98] sm:$0xf]  ;;  %v3532_v32 = vld [vmem:[#allocation3 + $0xa0] sm:$0xf0]  ;;  %v2959_v33 = vor.u32 %v3530_v28, %v2956_v30  ;;  %v3527_v37 = vld [vmem:[#allocation3 + $0x7c] sm:$0xf] }
  0x22   :  { %406 = vmatpush.bf16.msra.mxu2 %v2975_v25  ;;  %v2963_v34 = vor.u32 %v3532_v32, %v2962_v31  ;;  %v2942_v35 = vld [vmem:[#allocation3 + $0x78] sm:$0xf]  ;;  %v3528_v36 = vld [vmem:[#allocation3 + $0x80] sm:$0xf0]  ;;  %v2944_v39 = vld [vmem:[#allocation3 + $0x84] sm:$0xf0] }
  0x23   :  { %v144_v0 = vld [vmem:[%s4546_s18] sm:$0xff]  ;;  %v145_v1 = vld [vmem:[%s4546_s18 + $0x8] sm:$0xff]  ;;  %v2943_v38 = vor.u32 %v3528_v36, %v2942_v35  ;;  %v2950_v40 = vld [vmem:[#allocation3 + $0x80] sm:$0xf]  ;;  %v2947_v42 = vor.u32 %v3527_v37, %v2944_v39  ;;  %s4547_s25 = sld [smem:[#allocation16_spill]]  ;;  %vm427_vm7 = vcmask 261120  }
  0x24   :  { %148 = vadd.xlane.f32.xlu0 %v144_v0  ;;  %v3687_v3 = vpop.eup %3686  ;;  %v3529_v41 = vld [vmem:[#allocation3 + $0x88] sm:$0xf0]  ;;  %v2930_v44 = vld [vmem:[#allocation3 + $0x60] sm:$0xf]  ;;  %v3524_v46 = vld [vmem:[#allocation3 + $0x64] sm:$0xf] }
  0x25   :  { %v153_v4 = vmul.f32 128.0, %v3687_v3  ;;  %vm157_vm0 = vweird.f32 %v3687_v3  ;;  %379 = vmatpush.bf16.msra.mxu0 %v2955_v29  ;;  %393 = vmatpush.bf16.msra.mxu1 %v2959_v33  ;;  %v2951_v43 = vor.u32 %v3529_v41, %v2950_v40  ;;  %v3525_v45 = vld [vmem:[#allocation3 + $0x68] sm:$0xf0]  ;;  %v2932_v48 = vld [vmem:[#allocation3 + $0x6c] sm:$0xf0]  ;;  %s4548_s26 = sld [smem:[#allocation17_spill]] }
  0x26   :  { %407 = vmatpush.bf16.msra.mxu2 %v2963_v34  ;;  %v2931_v47 = vor.u32 %v3525_v45, %v2930_v44  ;;  %v2938_v49 = vld [vmem:[#allocation3 + $0x68] sm:$0xf]  ;;  %v3526_v50 = vld [vmem:[#allocation3 + $0x70] sm:$0xf0]  ;;  %v2935_v51 = vor.u32 %v3524_v46, %v2932_v48  ;;  %v3521_v55 = vld [vmem:[#allocation3 + $0x4c] sm:$0xf] }
  0x27   :  { %v154_v5 = vsub.f32 1.0, %v153_v4  ;;  %v2939_v52 = vor.u32 %v3526_v50, %v2938_v49  ;;  %v2918_v53 = vld [vmem:[#allocation3 + $0x48] sm:$0xf]  ;;  %v3522_v54 = vld [vmem:[#allocation3 + $0x50] sm:$0xf0]  ;;  %s3930_s30 = smov 96  }
  0x28   :  { %v2919_v56 = vor.u32 %v3522_v54, %v2918_v53  ;;  %v2920_v57 = vld [vmem:[#allocation3 + $0x54] sm:$0xf0]  ;;  %v2926_v58 = vld [vmem:[#allocation3 + $0x50] sm:$0xf]  ;;  %v3523_v59 = vld [vmem:[#allocation3 + $0x58] sm:$0xf0] }
  0x29   :  { %v155_v6 = vmul.f32 %v3687_v3, %v154_v5  ;;  %380 = vmatpush.bf16.msra.mxu0 %v2943_v38  ;;  %394 = vmatpush.bf16.msra.mxu1 %v2947_v42  ;;  %v2923_v60 = vor.u32 %v3521_v55, %v2920_v57  ;;  %v2927_v61 = vor.u32 %v3523_v59, %v2926_v58  ;;  %v2906_v62 = vld [vmem:[#allocation3 + $0x30] sm:$0xf]  ;;  %v3519_v63 = vld [vmem:[#allocation3 + $0x38] sm:$0xf0]  ;;  %v2908_v2 = vld [vmem:[#allocation3 + $0x3c] sm:$0xf0] }
  0x2a   :  { %408 = vmatpush.bf16.msra.mxu2 %v2951_v43  ;;  %v3520_v4 = vld [vmem:[#allocation3 + $0x40] sm:$0xf0]  ;;  %v2882_v19 = vld [vmem:[#allocation3] sm:$0xf]  ;;  %v3513_v20 = vld [vmem:[#allocation3 + $0x8] sm:$0xf0] }
  0x2b   :  { %v156_v7 = vadd.f32 %v3687_v3, %v155_v6  ;;  %v3512_v21 = vld [vmem:[#allocation3 + $0x4] sm:$0xf]  ;;  %v2883_v23 = vor.u32 %v3513_v20, %v2882_v19  ;;  %v2884_v24 = vld [vmem:[#allocation3 + $0xc] sm:$0xf0]  ;;  %v2890_v25 = vld [vmem:[#allocation3 + $0x8] sm:$0xf] }
  0x2c   :  { %150 = vadd.xlane.f32.xlu0 %v145_v1  ;;  %v3514_v26 = vld [vmem:[#allocation3 + $0x10] sm:$0xf0]  ;;  %v2887_v28 = vor.u32 %v3512_v21, %v2884_v24  ;;  %vm466_vm8 = vcmask 1043456   ;;  %s3931_s0 = smov 32   ;;  %s4549_s29 = sld [smem:[#allocation15_spill]]  ;;  %vm450_vm9 = vcmask 64512  }
  0x2d   :  { %v4064_v8 = vsel %vm157_vm0, %v3687_v3, %v156_v7  ;;  %381 = vmatpush.bf16.msra.mxu0 %v2931_v47  ;;  %395 = vmatpush.bf16.msra.mxu1 %v2935_v51  ;;  %v2914_v3 = vld [vmem:[#allocation3 + $0x38] sm:$0xf]  ;;  %v2891_v29 = vor.u32 %v3514_v26, %v2890_v25  ;;  %v3670_v47 = vld [vmem:[%s4547_s25] ss:$0 sm:$0xff]  ;;  %vm551_vm10 = vcmask 523520   ;;  %vm615_vm11 = vcmask 785920  }
  0x2e   :  { %409 = vmatpush.bf16.msra.mxu2 %v2939_v52  ;;  %v2915_v6 = vor.u32 %v3520_v4, %v2914_v3  ;;  %v2894_v7 = vld [vmem:[#allocation3 + $0x18] sm:$0xf]  ;;  %v3671_v52 = vld [vmem:[%s4548_s26] ss:$0 sm:$0xff]  ;;  %vm679_vm12 = vcmask 1048320  }
  0x31   :  { %382 = vmatpush.bf16.msra.mxu0 %v2919_v56  ;;  %396 = vmatpush.bf16.msra.mxu1 %v2923_v60 }
  0x32   :  { %410 = vmatpush.bf16.msra.mxu2 %v2927_v61 }
  0x36   :  { %411 = vmatpush.bf16.msra.mxu2 %v2915_v6 }
  0x97   :  { %v149_v9 = vpop.xlane.xlu0 %148 }
  0x98   :  { %v159_v10 = vmul.f32 %v4064_v8, %v149_v9  ;;  %v3516_v9 = vld [vmem:[#allocation3 + $0x20] sm:$0xf0] }
  0x9a   :  { %v4067_v11 = vsub.f32 %v144_v0, %v159_v10  ;;  %v3518_v0 = vld [vmem:[#allocation3 + $0x34] sm:$0xf]  ;;  %v3515_v10 = vld [vmem:[#allocation3 + $0x1c] sm:$0xf] }
  0x9b   :  { %v2911_v5 = vor.u32 %v3518_v0, %v2908_v2 }
  0x9c   :  { %v163_v12 = vmul.f32 %v4067_v11, %v4067_v11 }
  0x9d   :  { %397 = vmatpush.bf16.msra.mxu1 %v2911_v5 }
  0x9e   :  { %165 = vadd.xlane.f32.xlu1 %v163_v12  ;;  %v2895_v12 = vor.u32 %v3516_v9, %v2894_v7 }
  0x9f   :  { %v151_v13 = vpop.xlane.xlu0 %150 }
  0xa0   :  { %v160_v14 = vmul.f32 %v4064_v8, %v151_v13  ;;  %v2896_v13 = vld [vmem:[#allocation3 + $0x24] sm:$0xf0] }
  0xa1   :  { %v2899_v17 = vor.u32 %v3515_v10, %v2896_v13 }
  0xa2   :  { %v4072_v15 = vsub.f32 %v145_v1, %v160_v14  ;;  %v2907_v1 = vor.u32 %v3519_v63, %v2906_v62  ;;  %v2902_v14 = vld [vmem:[#allocation3 + $0x20] sm:$0xf] }
  0xa3   :  { %398 = vmatpush.bf16.msra.mxu1 %v2899_v17 }
  0xa4   :  { %v164_v16 = vmul.f32 %v4072_v15, %v4072_v15  ;;  %383 = vmatpush.bf16.msra.mxu0 %v2907_v1 }
  0xa6   :  { %167 = vadd.xlane.f32.xlu1 %v164_v16  ;;  %v3517_v16 = vld [vmem:[#allocation3 + $0x28] sm:$0xf0] }
  0xa7   :  { %v2903_v18 = vor.u32 %v3517_v16, %v2902_v14  ;;  %399 = vmatpush.bf16.msra.mxu1 %v2887_v28 }
  0xa8   :  { %384 = vmatpush.bf16.msra.mxu0 %v2895_v12 }
  0xa9   :  { %412 = vmatpush.bf16.msra.mxu2 %v2903_v18 }
  0xac   :  { %385 = vmatpush.bf16.msra.mxu0 %v2883_v23  ;;  %v205_v23 = vld [vmem:[%s4549_s29] sm:$0x3] }
  0xad   :  { %413 = vmatpush.bf16.msra.mxu2 %v2891_v29  ;;  %v206_v24 = vcvt.s32.f32 %v205_v23 }
  0xaf   :  { %v207_v25 = vsub.f32 1.0, %v206_v24 }
  0xb1   :  { %v4124_v26 = vmul.f32 -1e+09, %v207_v25 }
 0x111   :  { %v166_v22 = vpop.xlane.xlu1 %165 }
 0x112   :  { %v169_v27 = vmul.f32 %v166_v22, %v4064_v8 }
 0x114   :  { %v171_v30 = vadd.f32 1e-12, %v169_v27  ;;  %v4127_v27 = vperm.slane %v4124_v26, 0 }
 0x116   :  { %3688 = vrsqrt.f32 %v171_v30  ;;  %vm179_vm2 = vweird.f32 %v171_v30 }
 0x119   :  { %v168_v31 = vpop.xlane.xlu1 %167 }
 0x11a   :  { %v170_v32 = vmul.f32 %v168_v31, %v4064_v8 }
 0x11c   :  { %v3689_v33 = vpop.eup %3688  ;;  %v172_v34 = vadd.f32 1e-12, %v170_v32 }
 0x11d   :  { %v174_v35 = vmul.f32 %v3689_v33, %v171_v30  ;;  %vm180_vm1 = vweird.f32 %v3689_v33 }
 0x11e   :  { %3690 = vrsqrt.f32 %v172_v34  ;;  %vm181_vm3 = vmor %vm179_vm2, %vm180_vm1  ;;  %vm189_vm5 = vweird.f32 %v172_v34 }
 0x11f   :  { %v175_v36 = vmul.f32 %v3689_v33, %v174_v35 }
 0x121   :  { %v176_v37 = vmul.f32 0.5, %v175_v36 }
 0x123   :  { %v177_v38 = vsub.f32 1.5, %v176_v37 }
 0x124   :  { %v3691_v39 = vpop.eup %3690 }
 0x125   :  { %v178_v40 = vmul.f32 %v3689_v33, %v177_v38  ;;  %v184_v41 = vmul.f32 %v3691_v39, %v172_v34  ;;  %vm190_vm4 = vweird.f32 %v3691_v39 }
 0x126   :  { %vm191_vm6 = vmor %vm189_vm5, %vm190_vm4 }
 0x127   :  { %v185_v42 = vmul.f32 %v3691_v39, %v184_v41  ;;  %v182_v43 = vsel %vm181_vm3, %v3689_v33, %v178_v40 }
 0x128   :  { %v193_v46 = vmul.f32 %v182_v43, %v4067_v11 }
 0x129   :  { %v186_v44 = vmul.f32 0.5, %v185_v42 }
 0x12a   :  { %v198_v51 = vmul.f32 %v3670_v47, %v193_v46 }
 0x12b   :  { %v187_v45 = vsub.f32 1.5, %v186_v44 }
 0x12c   :  { %v4086_v54 = vadd.f32 %v3671_v52, %v198_v51 }
 0x12d   :  { %v188_v48 = vmul.f32 %v3691_v39, %v187_v45 }
 0x12f   :  { %v192_v49 = vsel %vm191_vm6, %v3691_v39, %v188_v48 }
 0x130   :  { %v194_v50 = vmul.f32 %v192_v49, %v4072_v15  ;;  %v4095_v15 = vld [vmem:[%s4523_s5] sm:$0x7] }
 0x131   :  { %v244_v56 = vperm.slane %v4095_v15, 0  ;;  %v245_v57 = vperm.slane %v4095_v15, 1  ;;  %v246_v63 = vperm.slane %v4095_v15, 2 }
 0x132   :  { %v199_v53 = vmul.f32 %v3670_v47, %v194_v50 }
 0x134   :  { %v4088_v55 = vadd.f32 %v3671_v52, %v199_v53 }
 0x136   :  { %v209_v11 = vpack.c.bf16 %v4088_v55, %v4086_v54 }
 0x138   :  { %386 = vmatmul.bf16.vlgmr.msra.gmra.mxu0 %v209_v11  ;;  %400 = vmatmul.bf16.vlgmr.msra.gmra.mxu1 %v209_v11 }
 0x139   :  { %414 = vmatmul.bf16.vlgmr.msra.gmra.mxu2 %v209_v11 }
 0x1b5   :  { %v387_v58 = vpop.f32.mrf.mxu0  ;;  %v401_v59 = vpop.f32.mrf.mxu1 }
 0x1b6   :  { %v388_v60 = vadd.f32 %v387_v58, %v244_v56  ;;  %v402_v61 = vadd.f32 %v401_v59, %v245_v57 }
 0x1b8   :  { %v420_v62 = vpack.c.bf16 %v402_v61, %v388_v60 }
 0x1ba   :  { %v425_v0 = vunpack.c.h.b16 %v420_v62  ;;  %v484_v1 = vunpack.c.l.b16 %v420_v62 }
 0x1bc   :  { %v415_v2 = vpop.f32.mrf.mxu2  ;;  %v485_v3 = vpack.c.b16 %v484_v1, %v484_v1  ;;  %v426_v4 = vpack.c.b16 %v425_v0, %v425_v0 }
 0x1bd   :  { %v416_v5 = vadd.f32 %v415_v2, %v246_v63  ;;  %v389_v6 = vpop.f32.mrf.mxu0  ;;  %v403_v7 = vpop.f32.mrf.mxu1 }
 0x1be   :  { %486 = vrot.lane.b32.xlu1 %v485_v3, %s3930_s30  ;;  %488 = vrot.lane.b32.xlu0 %v426_v4, %s3930_s30  ;;  %v432_v9 = vsel %vm427_vm7, %v426_v4, 0  ;;  %v390_v12 = vadd.f32 %v389_v6, %v244_v56  ;;  %v404_v13 = vadd.f32 %v403_v7, %v245_v57 }
 0x1bf   :  { %v4105_v10 = vpack.c.bf16 %v416_v5, %v416_v5  ;;  %441 = vmatpush.bf16.xpose.msrb.mxu0 %v432_v9 }
 0x1c0   :  { %v4109_v16 = vpack.c.bf16 %v404_v13, %v390_v12 }
 0x1c1   :  { %v468_v14 = vsel %vm466_vm8, %v4105_v10, 0 }
 0x1c2   :  { %477 = vmatpush.bf16.msra.mxu3 %v468_v14  ;;  %v682_v17 = vunpack.c.h.b16 %v4109_v16  ;;  %v738_v19 = vunpack.c.l.b16 %v4109_v16 }
 0x1c4   :  { %v683_v18 = vpack.c.b16 %v682_v17, %v682_v17  ;;  %v739_v20 = vpack.c.b16 %v738_v19, %v738_v19 }
 0x1c6   :  { %617 = vrot.lane.b32.xlu1 %v485_v3, %s3931_s0  ;;  %619 = vrot.lane.b32.xlu0 %v426_v4, %s3931_s0  ;;  %v688_v46 = vsel %vm427_vm7, %v683_v18, 0 }
 0x1c7   :  { %2976 = vmatmul.msk.bf16.vlgmr.msrb.gmra.mxu0 %vm427_vm7, %v420_v62 }
 0x1ce   :  { %808 = vrot.lane.b32.xlu1 %v683_v18, %s3922_s10  ;;  %742 = vrot.lane.b32.xlu0 %v683_v18, %s3930_s30 }
 0x1d6   :  { %869 = vrot.lane.b32.xlu1 %v739_v20, %s3931_s0  ;;  %871 = vrot.lane.b32.xlu0 %v683_v18, %s3931_s0 }
 0x230   :  { %v489_v21 = vpop.permute.xlu0 %488  ;;  %v487_v38 = vpop.permute.xlu1 %486 }
 0x231   :  { %v494_v22 = vsel %vm427_vm7, %v489_v21, 0 }
 0x232   :  { %503 = vmatpush.bf16.xpose.msrb.mxu3 %v494_v22 }
 0x238   :  { %v618_v40 = vpop.permute.xlu1 %617  ;;  %v620_v44 = vpop.permute.xlu0 %619 }
 0x239   :  { %v625_v48 = vsel %vm427_vm7, %v620_v44, 0 }
 0x240   :  { %v809_v49 = vpop.permute.xlu1 %808  ;;  %v743_v52 = vpop.permute.xlu0 %742 }
 0x241   :  { %v814_v51 = vsel %vm427_vm7, %v809_v49, 0  ;;  %v748_v53 = vsel %vm427_vm7, %v743_v52, 0 }
 0x244   :  { %v443_v28 = vpop.f32.mrf.mxu0 }
 0x245   :  { %v447_v29 = vmul.f32 0.17677669, %v443_v28 }
 0x247   :  { %v449_v30 = vadd.f32 %v4127_v27, %v447_v29 }
 0x248   :  { %v872_v56 = vpop.permute.xlu0 %871  ;;  %v870_v59 = vpop.permute.xlu1 %869 }
 0x249   :  { %v451_v31 = vsel %vm450_vm9, %v449_v30, -inf  ;;  %v877_v57 = vsel %vm427_vm7, %v872_v56, 0 }
 0x24a   :  { %452 = vmax.xlane.f32.xlu2 %v451_v31 }
 0x24c   :  { %v445_v32 = vpop.f32.mrf.mxu0 }
 0x2bd   :  { %v453_v33 = vpop.xlane.xlu2 %452 }
 0x2be   :  { %v454_v34 = vsub.f32 %v449_v30, %v453_v33 }
 0x2c0   :  { %v455_v35 = vmul.f32 1.442695, %v454_v34 }
 0x2c2   :  { %3692 = vpow2.f32 %v455_v35  ;;  %v524_v35 = vunpack.c.l.b16 %v4105_v10 }
 0x2c8   :  { %v3693_v36 = vpop.eup %3692 }
 0x2c9   :  { %v457_v37 = vsel %vm450_vm9, %v3693_v36, 0.0 }
 0x2ca   :  { %458 = vadd.xlane.f32.xlu2 %v457_v37  ;;  %v525_v37 = vpack.c.b16 %v524_v35, %v524_v35 }
 0x2e2   :  { %555 = vrot.lane.b32.xlu2 %v426_v4, %s3922_s10  ;;  %v4155_v4 = vperm.slane %v4124_v26, 1 }
 0x2ea   :  { %553 = vrot.lane.b32.xlu2 %v485_v3, %s3922_s10 }
 0x2f2   :  { %740 = vrot.lane.b32.xlu2 %v739_v20, %s3930_s30 }
 0x2fa   :  { %806 = vrot.lane.b32.xlu2 %v739_v20, %s3922_s10 }
 0x33d   :  { %v459_v39 = vpop.xlane.xlu2 %458 }
 0x33e   :  { %3694 = vrcp.f32 %v459_v39 }
 0x344   :  { %v3695_v41 = vpop.eup %3694 }
 0x345   :  { %v556_v42 = vpop.permute.xlu2 %555  ;;  %v461_v43 = vmul.f32 %v3695_v41, %v3693_v36 }
 0x346   :  { %v561_v45 = vsel %vm427_vm7, %v556_v42, 0 }
 0x347   :  { %570 = vmatpush.bf16.xpose.msrb.mxu1 %v561_v45  ;;  %v462_v47 = vpack.c.bf16 %v461_v43, %v461_v43 }
 0x349   :  { %2977 = vmatmul.msk.bf16.vlgmr.msra.gmra.mxu3 %vm450_vm9, %v462_v47 }
 0x34a   :  { %634 = vmatpush.bf16.xpose.msra.mxu3 %v625_v48 }
 0x34d   :  { %v554_v50 = vpop.permute.xlu2 %553 }
 0x34e   :  { %2980 = vmatmul.msk.bf16.vlgmr.msrb.gmra.mxu1 %vm427_vm7, %v554_v50 }
 0x34f   :  { %697 = vmatpush.bf16.xpose.msra.mxu1 %v688_v46 }
 0x355   :  { %v741_v11 = vpop.permute.xlu2 %740 }
 0x357   :  { %823 = vmatpush.bf16.xpose.msrb.mxu1 %v814_v51 }
 0x359   :  { %2978 = vmatmul.msk.bf16.vlgmr.msrb.gmra.mxu3 %vm427_vm7, %v487_v38 }
 0x35a   :  { %757 = vmatpush.bf16.xpose.msrb.mxu3 %v748_v53 }
 0x35d   :  { %v807_v58 = vpop.permute.xlu2 %806 }
 0x35e   :  { %2984 = vmatmul.msk.bf16.vlgmr.msra.gmra.mxu1 %vm427_vm7, %v4109_v16 }
 0x369   :  { %2982 = vmatmul.msk.bf16.vlgmr.msra.gmra.mxu3 %vm427_vm7, %v618_v40 }
 0x36a   :  { %886 = vmatpush.bf16.xpose.msra.mxu3 %v877_v57 }
 0x36e   :  { %2988 = vmatmul.msk.bf16.vlgmr.msrb.gmra.mxu1 %vm427_vm7, %v807_v58 }
 0x379   :  { %2986 = vmatmul.msk.bf16.vlgmr.msrb.gmra.mxu3 %vm427_vm7, %v741_v11 }
 0x389   :  { %2990 = vmatmul.msk.bf16.vlgmr.msra.gmra.mxu3 %vm427_vm7, %v870_v59 }
 0x3cb   :  { %v572_v60 = vpop.f32.mrf.mxu1 }
 0x3cc   :  { %v576_v61 = vmul.f32 0.17677669, %v572_v60  ;;  %v479_v62 = vpop.f32.mrf.mxu3 }
 0x3cd   :  { %483 = vst.msk [vmem:[#allocation2] sm:$0xff] %vm427_vm7, %v479_v62 }
 0x3ce   :  { %v577_v0 = vadd.f32 %v576_v61, %v4127_v27 }
 0x3d0   :  { %v578_v1 = vsel %vm450_vm9, %v577_v0, -inf }
 0x3d1   :  { %579 = vmax.xlane.f32.xlu2 %v578_v1  ;;  %v417_v1 = vpop.f32.mrf.mxu2 }
 0x3d3   :  { %v574_v2 = vpop.f32.mrf.mxu1 }
 0x3d4   :  { %v481_v3 = vpop.f32.mrf.mxu3  ;;  %v418_v2 = vadd.f32 %v417_v1, %v246_v63 }
 0x3db   :  { %v699_v5 = vpop.f32.mrf.mxu1 }
 0x3dc   :  { %v703_v6 = vmul.f32 0.17677669, %v699_v5  ;;  %v505_v7 = vpop.f32.mrf.mxu3 }
 0x3dd   :  { %v509_v12 = vmul.f32 0.17677669, %v505_v7 }
 0x3de   :  { %v705_v9 = vadd.f32 %v4155_v4, %v703_v6 }
 0x3df   :  { %v510_v17 = vadd.f32 %v509_v12, %v4127_v27  ;;  %v423_v12 = vpack.c.bf16 %v418_v2, %v418_v2 }
 0x3e0   :  { %v706_v13 = vsel %vm450_vm9, %v705_v9, -inf }
 0x3e1   :  { %707 = vmax.xlane.f32.xlu0 %v706_v13  ;;  %v511_v18 = vsel %vm450_vm9, %v510_v17, -inf }
 0x3e3   :  { %v701_v14 = vpop.f32.mrf.mxu1 }
 0x3e4   :  { %v507_v16 = vpop.f32.mrf.mxu3  ;;  %v778_v14 = vunpack.c.l.b16 %v423_v12 }
 0x3e6   :  { %v779_v16 = vpack.c.b16 %v778_v14, %v778_v14 }
 0x3e9   :  { %512 = vmax.xlane.f32.xlu0 %v511_v18 }
 0x3eb   :  { %v825_v19 = vpop.f32.mrf.mxu1 }
 0x3ec   :  { %v829_v20 = vmul.f32 0.17677669, %v825_v19  ;;  %v636_v21 = vpop.f32.mrf.mxu3 }
 0x3ed   :  { %v640_v23 = vmul.f32 0.17677669, %v636_v21 }
 0x3ee   :  { %v4162_v22 = vadd.f32 %v829_v20, %v4155_v4 }
 0x3ef   :  { %v641_v28 = vadd.f32 %v640_v23, %v4127_v27 }
 0x3f0   :  { %v831_v24 = vsel %vm450_vm9, %v4162_v22, -inf }
 0x3f1   :  { %832 = vmax.xlane.f32.xlu1 %v831_v24  ;;  %v642_v29 = vsel %vm450_vm9, %v641_v28, -inf }
 0x3f3   :  { %v827_v25 = vpop.f32.mrf.mxu1 }
 0x3f4   :  { %v638_v26 = vpop.f32.mrf.mxu3 }
 0x3f9   :  { %643 = vmax.xlane.f32.xlu1 %v642_v29 }
 0x3fc   :  { %v759_v30 = vpop.f32.mrf.mxu3 }
 0x3fd   :  { %v763_v31 = vmul.f32 0.17677669, %v759_v30 }
 0x3ff   :  { %v764_v32 = vadd.f32 %v763_v31, %v4155_v4 }
 0x401   :  { %v765_v33 = vsel %vm450_vm9, %v764_v32, -inf }
 0x402   :  { %766 = vmax.xlane.f32.xlu2 %v765_v33  ;;  %v722_v33 = vsel %vm466_vm8, %v423_v12, 0 }
 0x404   :  { %v761_v34 = vpop.f32.mrf.mxu3 }
 0x40c   :  { %v888_v36 = vpop.f32.mrf.mxu3 }
 0x40d   :  { %v892_v43 = vmul.f32 0.17677669, %v888_v36 }
 0x40f   :  { %v893_v10 = vadd.f32 %v892_v43, %v4155_v4 }
 0x411   :  { %v894_v48 = vsel %vm450_vm9, %v893_v10, -inf }
 0x412   :  { %526 = vrot.lane.b32.xlu1 %v525_v37, %s3930_s30 }
 0x414   :  { %v890_v38 = vpop.f32.mrf.mxu3 }
 0x41a   :  { %654 = vrot.lane.b32.xlu2 %v525_v37, %s3931_s0 }
 0x444   :  { %v580_v39 = vpop.xlane.xlu2 %579 }
 0x445   :  { %v581_v40 = vsub.f32 %v577_v0, %v580_v39 }
 0x447   :  { %v582_v41 = vmul.f32 1.442695, %v581_v40 }
 0x449   :  { %3696 = vpow2.f32 %v582_v41 }
 0x44f   :  { %v4173_v42 = vpop.eup %3696 }
 0x450   :  { %v584_v44 = vsel %vm450_vm9, %v4173_v42, 0.0 }
 0x451   :  { %585 = vadd.xlane.f32.xlu0 %v584_v44 }
 0x454   :  { %v708_v45 = vpop.xlane.xlu0 %707 }
 0x455   :  { %v709_v46 = vsub.f32 %v705_v9, %v708_v45 }
 0x457   :  { %v710_v47 = vmul.f32 1.442695, %v709_v46 }
 0x459   :  { %3698 = vpow2.f32 %v710_v47  ;;  %895 = vmax.xlane.f32.xlu0 %v894_v48 }
 0x45c   :  { %v513_v49 = vpop.xlane.xlu0 %512 }
 0x45d   :  { %v514_v50 = vsub.f32 %v510_v17, %v513_v49 }
 0x45f   :  { %v4179_v51 = vpop.eup %3698  ;;  %v515_v52 = vmul.f32 1.442695, %v514_v50 }
 0x460   :  { %v712_v53 = vsel %vm450_vm9, %v4179_v51, 0.0 }
 0x461   :  { %3700 = vpow2.f32 %v515_v52  ;;  %713 = vadd.xlane.f32.xlu1 %v712_v53 }
 0x464   :  { %v833_v11 = vpop.xlane.xlu1 %832 }
 0x465   :  { %v834_v63 = vsub.f32 %v4162_v22, %v833_v11 }
 0x467   :  { %v3701_v56 = vpop.eup %3700  ;;  %v835_v18 = vmul.f32 1.442695, %v834_v63 }
 0x468   :  { %v517_v57 = vsel %vm450_vm9, %v3701_v56, 0.0 }
 0x469   :  { %518 = vadd.xlane.f32.xlu2 %v517_v57 }
 0x46c   :  { %v644_v58 = vpop.xlane.xlu1 %643 }
 0x46d   :  { %v645_v59 = vsub.f32 %v641_v28, %v644_v58  ;;  %590 = vrot.lane.b32.xlu0 %v525_v37, %s3922_s10 }
 0x46f   :  { %v646_v60 = vmul.f32 1.442695, %v645_v59 }
 0x471   :  { %3702 = vpow2.f32 %v646_v60 }
 0x475   :  { %v767_v0 = vpop.xlane.xlu2 %766 }
 0x476   :  { %v768_v6 = vsub.f32 %v764_v32, %v767_v0 }
 0x477   :  { %v3703_v61 = vpop.eup %3702 }
 0x478   :  { %v648_v62 = vsel %vm450_vm9, %v3703_v61, 0.0  ;;  %v769_v13 = vmul.f32 1.442695, %v768_v6 }
 0x479   :  { %649 = vadd.xlane.f32.xlu2 %v648_v62 }
 0x47a   :  { %3704 = vpow2.f32 %v769_v13 }
 0x47b   :  { %3706 = vpow2.f32 %v835_v18 }
 0x47d   :  { %v655_v3 = vpop.permute.xlu2 %654 }
 0x47e   :  { %v660_v9 = vsel %vm466_vm8, %v655_v3, 0 }
 0x480   :  { %v3705_v17 = vpop.eup %3704 }
 0x481   :  { %v771_v15 = vsel %vm450_vm9, %v3705_v17, 0.0  ;;  %v3707_v19 = vpop.eup %3706 }
 0x482   :  { %v837_v20 = vsel %vm450_vm9, %v3707_v19, 0.0 }
 0x484   :  { %v527_v5 = vpop.permute.xlu1 %526 }
 0x485   :  { %v532_v7 = vsel %vm466_vm8, %v527_v5, 0 }
 0x486   :  { %541 = vmatpush.bf16.msra.mxu0 %v532_v7 }
 0x48a   :  { %669 = vmatpush.bf16.msrb.mxu0 %v660_v9 }
 0x491   :  { %780 = vrot.lane.b32.xlu2 %v779_v16, %s3930_s30 }
 0x497   :  { %772 = vadd.xlane.f32.xlu0 %v771_v15 }
 0x4ab   :  { %843 = vrot.lane.b32.xlu0 %v779_v16, %s3922_s10 }
 0x4ba   :  { %838 = vadd.xlane.f32.xlu2 %v837_v20 }
 0x4c4   :  { %v586_v21 = vpop.xlane.xlu0 %585 }
 0x4cc   :  { %v896_v23 = vpop.xlane.xlu0 %895 }
 0x4cd   :  { %v897_v24 = vsub.f32 %v893_v10, %v896_v23  ;;  %v3542_v23 = vld [vmem:[%s4524_s6 + $0x30] sm:$0xff] }
 0x4cf   :  { %v898_v25 = vmul.f32 1.442695, %v897_v24  ;;  %v3541_v24 = vld [vmem:[%s4524_s6 + $0x28] sm:$0xff] }
 0x4d1   :  { %3708 = vpow2.f32 %v898_v25  ;;  %v3540_v25 = vld [vmem:[%s4524_s6 + $0x20] sm:$0xff] }
 0x4d2   :  { %3710 = vrcp.f32 %v586_v21  ;;  %v3543_v21 = vld [vmem:[%s4524_s6 + $0x38] sm:$0xff] }
 0x4d3   :  { %1003 = vmatpush.bf16.msra.mxu1 %v3543_v21  ;;  %v3548_v21 = vld [vmem:[#allocation5 + $0x24] sm:$0xf] }
 0x4d4   :  { %v714_v34 = vpop.xlane.xlu1 %713 }
 0x4d7   :  { %v3709_v26 = vpop.eup %3708  ;;  %1004 = vmatpush.bf16.msra.mxu1 %v3542_v23 }
 0x4d8   :  { %v900_v28 = vsel %vm450_vm9, %v3709_v26, 0.0  ;;  %v3711_v29 = vpop.eup %3710 }
 0x4d9   :  { %901 = vadd.xlane.f32.xlu1 %v900_v28  ;;  %v588_v30 = vmul.f32 %v3711_v29, %v4173_v42  ;;  %v3538_v28 = vld [vmem:[%s4524_s6 + $0x10] sm:$0xff] }
 0x4db   :  { %v589_v35 = vpack.c.bf16 %v588_v30, %v588_v30  ;;  %1005 = vmatpush.bf16.msra.mxu1 %v3541_v24  ;;  %v3537_v30 = vld [vmem:[%s4524_s6 + $0x8] sm:$0xff]  ;;  %v3044_v24 = vld [vmem:[#allocation5 + $0x28] sm:$0xf0] }
 0x4dc   :  { %v519_v22 = vpop.xlane.xlu2 %518 }
 0x4dd   :  { %3712 = vrcp.f32 %v519_v22 }
 0x4de   :  { %3714 = vrcp.f32 %v714_v34 }
 0x4df   :  { %v591_v31 = vpop.permute.xlu0 %590  ;;  %1006 = vmatpush.bf16.msra.mxu1 %v3540_v25  ;;  %v3047_v25 = vor.u32 %v3548_v21, %v3044_v24  ;;  %v3568_v21 = vld [vmem:[#allocation7 + $0x40] sm:$0xff] }
 0x4e0   :  { %v596_v32 = vsel %vm466_vm8, %v591_v31, 0  ;;  %v3536_v31 = vld [vmem:[%s4524_s6] sm:$0xff] }
 0x4e1   :  { %605 = vmatpush.bf16.msrb.mxu2 %v596_v32 }
 0x4e3   :  { %v3713_v36 = vpop.eup %3712 }
 0x4e4   :  { %v521_v37 = vmul.f32 %v3713_v36, %v3701_v56  ;;  %2981 = vmatmul.msk.bf16.vlgmr.msrb.gmra.mxu2 %vm450_vm9, %v589_v35  ;;  %v3715_v39 = vpop.eup %3714  ;;  %v3672_v36 = vld [vmem:[%s4525_s7] ss:$0 sm:$0xff] }
 0x4e5   :  { %731 = vmatpush.bf16.msra.mxu2 %v722_v33  ;;  %v716_v41 = vmul.f32 %v3715_v39, %v4179_v51 }
 0x4e6   :  { %v522_v38 = vpack.c.bf16 %v521_v37, %v521_v37 }
 0x4e7   :  { %v717_v42 = vpack.c.bf16 %v716_v41, %v716_v41 }
 0x4e8   :  { %2979 = vmatmul.msk.bf16.vlgmr.msra.gmra.mxu0 %vm450_vm9, %v522_v38 }
 0x4ec   :  { %v650_v40 = vpop.xlane.xlu2 %649 }
 0x4ed   :  { %3716 = vrcp.f32 %v650_v40 }
 0x4f2   :  { %906 = vrot.lane.b32.xlu1 %v779_v16, %s3931_s0 }
 0x4f3   :  { %v3717_v43 = vpop.eup %3716 }
 0x4f4   :  { %v652_v44 = vmul.f32 %v3717_v43, %v3703_v61  ;;  %2985 = vmatmul.msk.bf16.vlgmr.msra.gmra.mxu2 %vm450_vm9, %v717_v42  ;;  %v781_v45 = vpop.permute.xlu2 %780 }
 0x4f5   :  { %v786_v10 = vsel %vm466_vm8, %v781_v45, 0 }
 0x4f6   :  { %v653_v46 = vpack.c.bf16 %v652_v44, %v652_v44  ;;  %795 = vmatpush.bf16.msra.mxu0 %v786_v10 }
 0x4f8   :  { %2983 = vmatmul.msk.bf16.vlgmr.msrb.gmra.mxu0 %vm450_vm9, %v653_v46 }
 0x50a   :  { %v773_v47 = vpop.xlane.xlu0 %772 }
 0x50b   :  { %3718 = vrcp.f32 %v773_v47 }
 0x511   :  { %v3719_v48 = vpop.eup %3718 }
 0x512   :  { %v775_v49 = vmul.f32 %v3719_v48, %v3705_v17 }
 0x514   :  { %v776_v50 = vpack.c.bf16 %v775_v49, %v775_v49  ;;  %v3559_v49 = vld [vmem:[#allocation5 + $0x74] sm:$0xf0] }
 0x516   :  { %2987 = vmatmul.msk.bf16.vlgmr.msra.gmra.mxu0 %vm450_vm9, %v776_v50  ;;  %v3558_v50 = vld [vmem:[#allocation5 + $0x74] sm:$0xf] }
 0x51d   :  { %v844_v51 = vpop.permute.xlu0 %843 }
 0x51e   :  { %v849_v52 = vsel %vm466_vm8, %v844_v51, 0 }
 0x51f   :  { %858 = vmatpush.bf16.msrb.mxu2 %v849_v52  ;;  %v3084_v52 = vld [vmem:[#allocation5 + $0x78] sm:$0xf0] }
 0x52d   :  { %v839_v53 = vpop.xlane.xlu2 %838 }
 0x52e   :  { %3720 = vrcp.f32 %v839_v53  ;;  %v3087_v53 = vor.u32 %v3558_v50, %v3084_v52 }
 0x530   :  { %1188 = vmatpush.bf16.msrb.mxu3 %v3087_v53 }
 0x534   :  { %v3721_v11 = vpop.eup %3720 }
 0x535   :  { %v841_v56 = vmul.f32 %v3721_v11, %v3707_v19  ;;  %v3074_v11 = vld [vmem:[#allocation5 + $0x60] sm:$0xf] }
 0x537   :  { %v842_v57 = vpack.c.bf16 %v841_v56, %v841_v56  ;;  %v3557_v56 = vld [vmem:[#allocation5 + $0x64] sm:$0xf0] }
 0x539   :  { %2989 = vmatmul.msk.bf16.vlgmr.msrb.gmra.mxu2 %vm450_vm9, %v842_v57  ;;  %v3556_v57 = vld [vmem:[#allocation5 + $0x64] sm:$0xf] }
 0x54c   :  { %v902_v58 = vpop.xlane.xlu1 %901 }
 0x54d   :  { %3722 = vrcp.f32 %v902_v58  ;;  %v3075_v58 = vor.u32 %v3557_v56, %v3074_v11 }
 0x553   :  { %v3723_v59 = vpop.eup %3722 }
 0x554   :  { %v904_v60 = vmul.f32 %v3723_v59, %v3709_v26  ;;  %v3539_v26 = vld [vmem:[%s4524_s6 + $0x18] sm:$0xff] }
 0x555   :  { %1007 = vmatpush.bf16.msra.mxu1 %v3539_v26  ;;  %v3076_v59 = vld [vmem:[#allocation5 + $0x68] sm:$0xf0]  ;;  %v3034_v26 = vld [vmem:[#allocation5 + $0x10] sm:$0xf] }
 0x556   :  { %v905_v1 = vpack.c.bf16 %v904_v60, %v904_v60  ;;  %v3079_v60 = vor.u32 %v3556_v57, %v3076_v59  ;;  %v3673_v57 = vld [vmem:[%s4526_s8] ss:$0 sm:$0xff] }
 0x558   :  { %1189 = vmatpush.bf16.msrb.mxu3 %v3079_v60 }
 0x559   :  { %1008 = vmatpush.bf16.msra.mxu1 %v3538_v28  ;;  %v3547_v28 = vld [vmem:[#allocation5 + $0x14] sm:$0xf0] }
 0x55d   :  { %1009 = vmatpush.bf16.msra.mxu1 %v3537_v30  ;;  %v3036_v30 = vld [vmem:[#allocation5 + $0x18] sm:$0xf0] }
 0x561   :  { %1010 = vmatpush.bf16.msra.mxu1 %v3536_v31  ;;  %v3026_v31 = vld [vmem:[#allocation5] sm:$0xf] }
 0x564   :  { %v907_v61 = vpop.permute.xlu1 %906 }
 0x565   :  { %v912_v62 = vsel %vm466_vm8, %v907_v61, 0  ;;  %v543_v0 = vpop.f32.mrf.mxu0  ;;  %v3066_v61 = vld [vmem:[#allocation5 + $0x50] sm:$0xf] }
 0x566   :  { %921 = vmatpush.bf16.msrb.mxu0 %v912_v62  ;;  %548 = vrot.lane.b32.xlu2 %v543_v0, %s3931_s0  ;;  %v3555_v62 = vld [vmem:[#allocation5 + $0x54] sm:$0xf0]  ;;  %v3554_v0 = vld [vmem:[#allocation5 + $0x54] sm:$0xf] }
 0x567   :  { %v607_v2 = vpop.f32.mrf.mxu2 }
 0x568   :  { %612 = vrot.lane.b32.xlu1 %v607_v2, %s3922_s10  ;;  %v3068_v2 = vld [vmem:[#allocation5 + $0x58] sm:$0xf0] }
 0x569   :  { %2991 = vmatmul.msk.bf16.vlgmr.msrb.gmra.mxu0 %vm450_vm9, %v905_v1  ;;  %v3067_v1 = vor.u32 %v3555_v62, %v3066_v61  ;;  %v3674_v62 = vld [vmem:[%s4527_s9] ss:$0 sm:$0xff] }
 0x56d   :  { %v545_v3 = vpop.f32.mrf.mxu0 }
 0x56e   :  { %v3071_v3 = vor.u32 %v3554_v0, %v3068_v2 }
 0x56f   :  { %v609_v5 = vpop.f32.mrf.mxu2 }
 0x570   :  { %1190 = vmatpush.bf16.msrb.mxu3 %v3071_v3  ;;  %v3058_v5 = vld [vmem:[#allocation5 + $0x40] sm:$0xf]  ;;  %v3567_v3 = vld [vmem:[#allocation7 + $0x38] sm:$0xff] }
 0x571   :  { %1372 = vmatpush.bf16.msra.mxu0 %v3567_v3 }
 0x575   :  { %v671_v6 = vpop.f32.mrf.mxu0 }
 0x576   :  { %676 = vrot.lane.b32.xlu1 %v671_v6, %s3930_s30  ;;  %v3553_v6 = vld [vmem:[#allocation5 + $0x44] sm:$0xf0] }
 0x577   :  { %v733_v7 = vpop.f32.mrf.mxu2 }
 0x578   :  { %737 = vst.msk [vmem:[#allocation2 + $0x8] sm:$0xff] %vm427_vm7, %v733_v7  ;;  %v3552_v7 = vld [vmem:[#allocation5 + $0x44] sm:$0xf] }
 0x57d   :  { %v673_v9 = vpop.f32.mrf.mxu0 }
 0x57e   :  { %v3059_v9 = vor.u32 %v3553_v6, %v3058_v5  ;;  %v3575_v5 = vld [vmem:[#allocation7 + $0x78] sm:$0xff]  ;;  %v3574_v6 = vld [vmem:[#allocation7 + $0x70] sm:$0xff] }
 0x57f   :  { %v735_v12 = vpop.f32.mrf.mxu2  ;;  %1386 = vmatpush.bf16.msrb.mxu1 %v3575_v5 }
 0x580   :  { %v3060_v12 = vld [vmem:[#allocation5 + $0x48] sm:$0xf0] }
 0x583   :  { %1387 = vmatpush.bf16.msrb.mxu1 %v3574_v6 }
 0x593   :  { %v797_v13 = vpop.f32.mrf.mxu0 }
 0x59b   :  { %v799_v14 = vpop.f32.mrf.mxu0 }
 0x59c   :  { %v3050_v14 = vld [vmem:[#allocation5 + $0x30] sm:$0xf] }
 0x5bc   :  { %v860_v16 = vpop.f32.mrf.mxu2 }
 0x5bd   :  { %865 = vrot.lane.b32.xlu0 %v860_v16, %s3922_s10  ;;  %v3551_v16 = vld [vmem:[#allocation5 + $0x34] sm:$0xf0] }
 0x5c0   :  { %v549_v17 = vpop.permute.xlu2 %548 }
 0x5c1   :  { %552 = vst.msk [vmem:[#allocation2] sm:$0xff] %vm551_vm10, %v549_v17  ;;  %v3550_v17 = vld [vmem:[#allocation5 + $0x34] sm:$0xf] }
 0x5c4   :  { %v862_v15 = vpop.f32.mrf.mxu2 }
 0x5c5   :  { %802 = vrot.lane.b32.xlu0 %v797_v13, %s3931_s0  ;;  %v3063_v13 = vor.u32 %v3552_v7, %v3060_v12  ;;  %v3051_v15 = vor.u32 %v3551_v16, %v3050_v14  ;;  %v3565_v7 = vld [vmem:[#allocation7 + $0x28] sm:$0xff]  ;;  %v3564_v12 = vld [vmem:[#allocation7 + $0x20] sm:$0xff]  ;;  %v3563_v14 = vld [vmem:[#allocation7 + $0x18] sm:$0xff] }
 0x5c6   :  { %v3571_v16 = vld [vmem:[#allocation7 + $0x58] sm:$0xff] }
 0x5c7   :  { %1191 = vmatpush.bf16.msrb.mxu3 %v3063_v13  ;;  %v3572_v13 = vld [vmem:[#allocation7 + $0x60] sm:$0xff] }
 0x5da   :  { %v613_v63 = vpop.permute.xlu1 %612 }
 0x5db   :  { %616 = vst.msk [vmem:[#allocation2] sm:$0xff] %vm615_vm11, %v613_v63  ;;  %v3052_v63 = vld [vmem:[#allocation5 + $0x38] sm:$0xf0] }
 0x5e6   :  { %v923_v18 = vpop.f32.mrf.mxu0 }
 0x5e7   :  { %928 = vrot.lane.b32.xlu0 %v923_v18, %s3930_s30  ;;  %v3055_v18 = vor.u32 %v3550_v17, %v3052_v63  ;;  %v3562_v17 = vld [vmem:[#allocation7 + $0x10] sm:$0xff]  ;;  %v3561_v63 = vld [vmem:[#allocation7 + $0x8] sm:$0xff] }
 0x5e8   :  { %v677_v19 = vpop.permute.xlu1 %676 }
 0x5e9   :  { %680 = vst.msk [vmem:[#allocation2] sm:$0xff] %vm679_vm12, %v677_v19  ;;  %1192 = vmatpush.bf16.msrb.mxu3 %v3055_v18  ;;  %v3042_v19 = vld [vmem:[#allocation5 + $0x20] sm:$0xf]  ;;  %v3569_v18 = vld [vmem:[#allocation7 + $0x48] sm:$0xff] }
 0x5ed   :  { %1193 = vmatpush.bf16.msrb.mxu3 %v3047_v25 }
 0x5ee   :  { %v925_v20 = vpop.f32.mrf.mxu0 }
 0x5ef   :  { %v3549_v20 = vld [vmem:[#allocation5 + $0x24] sm:$0xf0] }
 0x5f0   :  { %v932_v33 = vld [vmem:[#allocation2] sm:$0xff]  ;;  %v3043_v23 = vor.u32 %v3549_v20, %v3042_v19  ;;  %v3560_v20 = vld [vmem:[#allocation7] sm:$0xff] }
 0x5f1   :  { %v1088_v19 = vld [vmem:[%s4529_s11] sm:$0x3] }
 0x5f2   :  { %v1091_v24 = vperm.slane %v1088_v19, 1 }
 0x62f   :  { %v866_v29 = vpop.permute.xlu0 %865 }
 0x637   :  { %v803_v22 = vpop.permute.xlu0 %802 }
 0x638   :  { %805 = vst.msk [vmem:[#allocation2 + $0x8] sm:$0xff] %vm551_vm10, %v803_v22  ;;  %v3035_v22 = vor.u32 %v3547_v28, %v3034_v26 }
 0x639   :  { %868 = vst.msk [vmem:[#allocation2 + $0x8] sm:$0xff] %vm615_vm11, %v866_v29  ;;  %v3546_v29 = vld [vmem:[#allocation5 + $0x14] sm:$0xf] }
 0x659   :  { %v929_v32 = vpop.permute.xlu0 %928 }
 0x65a   :  { %931 = vst.msk [vmem:[#allocation2 + $0x8] sm:$0xff] %vm679_vm12, %v929_v32  ;;  %v3545_v32 = vld [vmem:[#allocation5 + $0x4] sm:$0xf0] }
 0x661   :  { %v933_v34 = vld [vmem:[#allocation2 + $0x8] sm:$0xff] }
 0x662   :  { %v934_v35 = vpack.c.bf16 %v933_v34, %v932_v33  ;;  %v3039_v34 = vor.u32 %v3546_v29, %v3036_v30 }
 0x664   :  { %1011 = vmatmul.bf16.vlgmr.msra.gmra.mxu1 %v934_v35  ;;  %v3544_v35 = vld [vmem:[#allocation5 + $0x4] sm:$0xf]  ;;  %1194 = vmatpush.bf16.msrb.mxu3 %v3039_v34 }
 0x6e1   :  { %v1012_v37 = vpop.f32.mrf.mxu1 }
 0x6e2   :  { %v1013_v38 = vadd.f32 %v3672_v36, %v1012_v37 }
 0x6e4   :  { %v1017_v39 = vadd.f32 %v1013_v38, %v4086_v54  ;;  %v3027_v38 = vor.u32 %v3545_v32, %v3026_v31 }
 0x6e6   :  { %1021 = vadd.xlane.f32.xlu2 %v1017_v39 }
 0x6e9   :  { %v1014_v40 = vpop.f32.mrf.mxu1 }
 0x6ea   :  { %v1015_v41 = vadd.f32 %v3672_v36, %v1014_v40  ;;  %v3028_v36 = vld [vmem:[#allocation5 + $0x8] sm:$0xf0] }
 0x6ec   :  { %v1018_v42 = vadd.f32 %v1015_v41, %v4088_v55  ;;  %v3082_v55 = vld [vmem:[#allocation5 + $0x70] sm:$0xf] }
 0x6ed   :  { %v3083_v51 = vor.u32 %v3559_v49, %v3082_v55 }
 0x6ee   :  { %1023 = vadd.xlane.f32.xlu1 %v1018_v42 }
 0x6ef   :  { %1174 = vmatpush.bf16.msra.mxu2 %v3083_v51 }
 0x6f3   :  { %1175 = vmatpush.bf16.msra.mxu2 %v3075_v58 }
 0x6f7   :  { %1176 = vmatpush.bf16.msra.mxu2 %v3067_v1 }
 0x6fb   :  { %1177 = vmatpush.bf16.msra.mxu2 %v3059_v9  ;;  %v3573_v9 = vld [vmem:[#allocation7 + $0x68] sm:$0xff] }
 0x6fc   :  { %1388 = vmatpush.bf16.msrb.mxu1 %v3573_v9 }
 0x6ff   :  { %1178 = vmatpush.bf16.msra.mxu2 %v3051_v15  ;;  %v3570_v15 = vld [vmem:[#allocation7 + $0x50] sm:$0xff] }
 0x700   :  { %1389 = vmatpush.bf16.msrb.mxu1 %v3572_v13 }
 0x703   :  { %1179 = vmatpush.bf16.msra.mxu2 %v3043_v23  ;;  %v1090_v23 = vperm.slane %v1088_v19, 0 }
 0x704   :  { %1390 = vmatpush.bf16.msrb.mxu1 %v3571_v16 }
 0x707   :  { %1180 = vmatpush.bf16.msra.mxu2 %v3035_v22 }
 0x708   :  { %1391 = vmatpush.bf16.msrb.mxu1 %v3570_v15 }
 0x70b   :  { %1181 = vmatpush.bf16.msra.mxu2 %v3027_v38 }
 0x70c   :  { %1392 = vmatpush.bf16.msrb.mxu1 %v3569_v18 }
 0x710   :  { %1393 = vmatpush.bf16.msrb.mxu1 %v3568_v21 }
 0x759   :  { %v1022_v43 = vpop.xlane.xlu2 %1021 }
 0x75a   :  { %v1025_v44 = vmul.f32 %v1022_v43, %v4064_v8 }
 0x75c   :  { %v4254_v45 = vsub.f32 %v1017_v39, %v1025_v44  ;;  %v3031_v39 = vor.u32 %v3544_v35, %v3028_v36 }
 0x75e   :  { %v1029_v10 = vmul.f32 %v4254_v45, %v4254_v45  ;;  %1195 = vmatpush.bf16.msrb.mxu3 %v3031_v39 }
 0x760   :  { %1031 = vadd.xlane.f32.xlu0 %v1029_v10 }
 0x761   :  { %v1024_v46 = vpop.xlane.xlu1 %1023 }
 0x762   :  { %v1026_v47 = vmul.f32 %v1024_v46, %v4064_v8 }
 0x764   :  { %v4259_v48 = vsub.f32 %v1018_v42, %v1026_v47 }
 0x766   :  { %v1030_v54 = vmul.f32 %v4259_v48, %v4259_v48 }
 0x768   :  { %1033 = vadd.xlane.f32.xlu2 %v1030_v54 }
 0x7d3   :  { %v1032_v33 = vpop.xlane.xlu0 %1031 }
 0x7d4   :  { %v1035_v37 = vmul.f32 %v1032_v33, %v4064_v8 }
 0x7d6   :  { %v1037_v40 = vadd.f32 1e-12, %v1035_v37 }
 0x7d8   :  { %3724 = vrsqrt.f32 %v1037_v40  ;;  %vm1045_vm14 = vweird.f32 %v1037_v40 }
 0x7db   :  { %v1034_v41 = vpop.xlane.xlu2 %1033 }
 0x7dc   :  { %v1036_v42 = vmul.f32 %v1034_v41, %v4064_v8 }
 0x7de   :  { %v3725_v43 = vpop.eup %3724  ;;  %v1038_v44 = vadd.f32 1e-12, %v1036_v42 }
 0x7df   :  { %v1040_v10 = vmul.f32 %v3725_v43, %v1037_v40  ;;  %vm1046_vm13 = vweird.f32 %v3725_v43 }
 0x7e0   :  { %3726 = vrsqrt.f32 %v1038_v44  ;;  %vm1047_vm15 = vmor %vm1045_vm14, %vm1046_vm13  ;;  %vm1055_vm1 = vweird.f32 %v1038_v44 }
 0x7e1   :  { %v1041_v46 = vmul.f32 %v3725_v43, %v1040_v10 }
 0x7e3   :  { %v1042_v47 = vmul.f32 0.5, %v1041_v46 }
 0x7e5   :  { %v1043_v54 = vsub.f32 1.5, %v1042_v47 }
 0x7e6   :  { %v3727_v55 = vpop.eup %3726 }
 0x7e7   :  { %v1044_v49 = vmul.f32 %v3725_v43, %v1043_v54  ;;  %v1050_v50 = vmul.f32 %v3727_v55, %v1038_v44  ;;  %vm1056_vm0 = vweird.f32 %v3727_v55 }
 0x7e8   :  { %vm1057_vm2 = vmor %vm1055_vm1, %vm1056_vm0 }
 0x7e9   :  { %v1051_v51 = vmul.f32 %v3727_v55, %v1050_v50  ;;  %v1048_v52 = vsel %vm1047_vm15, %v3725_v43, %v1044_v49 }
 0x7ea   :  { %v1059_v56 = vmul.f32 %v1048_v52, %v4254_v45 }
 0x7eb   :  { %v1052_v53 = vmul.f32 0.5, %v1051_v51 }
 0x7ec   :  { %v1064_v61 = vmul.f32 %v3673_v57, %v1059_v56 }
 0x7ed   :  { %v1053_v11 = vsub.f32 1.5, %v1052_v53 }
 0x7ee   :  { %v4273_v1 = vadd.f32 %v3674_v62, %v1064_v61 }
 0x7ef   :  { %v1054_v58 = vmul.f32 %v3727_v55, %v1053_v11 }
 0x7f1   :  { %v1058_v59 = vsel %vm1057_vm2, %v3727_v55, %v1054_v58 }
 0x7f2   :  { %v1060_v60 = vmul.f32 %v1058_v59, %v4259_v48  ;;  %v3566_v48 = vld [vmem:[#allocation7 + $0x30] sm:$0xff] }
 0x7f3   :  { %1373 = vmatpush.bf16.msra.mxu0 %v3566_v48 }
 0x7f4   :  { %v1065_v0 = vmul.f32 %v3673_v57, %v1060_v60 }
 0x7f6   :  { %v4275_v2 = vadd.f32 %v3674_v62, %v1065_v0 }
 0x7f7   :  { %1374 = vmatpush.bf16.msra.mxu0 %v3565_v7 }
 0x7f8   :  { %v1071_v45 = vpack.c.bf16 %v4275_v2, %v4273_v1 }
 0x7fa   :  { %1182 = vmatmul.bf16.vlgmr.msra.gmra.mxu2 %v1071_v45  ;;  %1196 = vmatmul.bf16.vlgmr.msrb.gmra.mxu3 %v1071_v45 }
 0x7fb   :  { %1375 = vmatpush.bf16.msra.mxu0 %v3564_v12  ;;  %v3675_v12 = vld [vmem:[%s4531_s13] ss:$0 sm:$0xff] }
 0x7ff   :  { %1376 = vmatpush.bf16.msra.mxu0 %v3563_v14 }
 0x803   :  { %1377 = vmatpush.bf16.msra.mxu0 %v3562_v17 }
 0x807   :  { %1378 = vmatpush.bf16.msra.mxu0 %v3561_v63 }
 0x80b   :  { %1379 = vmatpush.bf16.msra.mxu0 %v3560_v20 }
 0x87d   :  { %v1183_v25 = vpop.f32.mrf.mxu2  ;;  %v1197_v26 = vpop.f32.mrf.mxu3 }
 0x87e   :  { %v1184_v28 = vadd.f32 %v1183_v25, %v1090_v23  ;;  %v1198_v29 = vadd.f32 %v1197_v26, %v1091_v24 }
 0x880   :  { %v1206_v22 = vmul.f32 0.044715, %v1184_v28  ;;  %v1207_v30 = vmul.f32 0.044715, %v1198_v29  ;;  %v1202_v59 = vmul.f32 0.5, %v1184_v28  ;;  %v1203_v62 = vmul.f32 0.5, %v1198_v29 }
 0x882   :  { %v1210_v31 = vmul.f32 %v1206_v22, %v1184_v28  ;;  %v1211_v32 = vmul.f32 %v1207_v30, %v1198_v29  ;;  %v3598_v30 = vld [vmem:[#allocation3 + $0x170] sm:$0xf0] }
 0x884   :  { %v1214_v33 = vmul.f32 %v1210_v31, %v1184_v28  ;;  %v1215_v34 = vmul.f32 %v1211_v32, %v1198_v29  ;;  %v3597_v31 = vld [vmem:[#allocation3 + $0x16c] sm:$0xf] }
 0x885   :  { %v1185_v35 = vpop.f32.mrf.mxu2  ;;  %v1199_v36 = vpop.f32.mrf.mxu3 }
 0x886   :  { %v1218_v37 = vadd.f32 %v1214_v33, %v1184_v28  ;;  %v1186_v38 = vadd.f32 %v1185_v35, %v1090_v23  ;;  %v1200_v39 = vadd.f32 %v1199_v36, %v1091_v24  ;;  %v1219_v40 = vadd.f32 %v1215_v34, %v1198_v29  ;;  %v3241_v33 = vld [vmem:[#allocation3 + $0x174] sm:$0xf0]  ;;  %v3247_v34 = vld [vmem:[#allocation3 + $0x170] sm:$0xf]  ;;  %v3599_v35 = vld [vmem:[#allocation3 + $0x178] sm:$0xf0] }
 0x887   :  { %v3244_v36 = vor.u32 %v3597_v31, %v3241_v33 }
 0x888   :  { %v1208_v41 = vmul.f32 0.044715, %v1186_v38  ;;  %v1209_v42 = vmul.f32 0.044715, %v1200_v39  ;;  %v1222_v43 = vmul.f32 0.7978846, %v1218_v37  ;;  %v3248_v37 = vor.u32 %v3599_v35, %v3247_v34 }
 0x889   :  { %v1223_v10 = vmul.f32 0.7978846, %v1219_v40  ;;  %v1204_v60 = vmul.f32 0.5, %v1186_v38  ;;  %v1205_v0 = vmul.f32 0.5, %v1200_v39  ;;  %1639 = vmatpush.bf16.msra.mxu3 %v3244_v36  ;;  %v3594_v40 = vld [vmem:[#allocation3 + $0x154] sm:$0xf] }
 0x88a   :  { %v1212_v44 = vmul.f32 %v1208_v41, %v1186_v38  ;;  %v1213_v46 = vmul.f32 %v1209_v42, %v1200_v39  ;;  %3728 = vtanh.f32 %v1222_v43  ;;  %1653 = vmatpush.bf16.msrb.mxu0 %v3248_v37  ;;  %v3229_v42 = vld [vmem:[#allocation3 + $0x15c] sm:$0xf0]  ;;  %v3235_v43 = vld [vmem:[#allocation3 + $0x158] sm:$0xf]  ;;  %v3577_v35 = vld [vmem:[#allocation3 + $0xc8] sm:$0xf0] }
 0x88b   :  { %3730 = vtanh.f32 %v1223_v10  ;;  %v3232_v10 = vor.u32 %v3594_v40, %v3229_v42  ;;  %v3155_v34 = vld [vmem:[#allocation3 + $0xc0] sm:$0xf]  ;;  %v3576_v36 = vld [vmem:[#allocation3 + $0xc4] sm:$0xf]  ;;  %v3163_v40 = vld [vmem:[#allocation3 + $0xc8] sm:$0xf] }
 0x88c   :  { %v1216_v47 = vmul.f32 %v1212_v44, %v1186_v38  ;;  %v1217_v54 = vmul.f32 %v1213_v46, %v1200_v39  ;;  %v3596_v44 = vld [vmem:[#allocation3 + $0x160] sm:$0xf0] }
 0x88d   :  { %v3236_v46 = vor.u32 %v3596_v44, %v3235_v43  ;;  %1640 = vmatpush.bf16.msra.mxu3 %v3232_v10 }
 0x88e   :  { %v1220_v55 = vadd.f32 %v1216_v47, %v1186_v38  ;;  %v1221_v49 = vadd.f32 %v1217_v54, %v1200_v39  ;;  %v3227_v38 = vld [vmem:[#allocation3 + $0x150] sm:$0xf]  ;;  %v3595_v39 = vld [vmem:[#allocation3 + $0x158] sm:$0xf0]  ;;  %v3215_v47 = vld [vmem:[#allocation3 + $0x138] sm:$0xf] }
 0x88f   :  { %v3228_v41 = vor.u32 %v3595_v39, %v3227_v38  ;;  %1654 = vmatpush.bf16.msrb.mxu0 %v3236_v46  ;;  %v3592_v54 = vld [vmem:[#allocation3 + $0x140] sm:$0xf0]  ;;  %v3156_v38 = vor.u32 %v3577_v35, %v3155_v34  ;;  %v3157_v39 = vld [vmem:[#allocation3 + $0xcc] sm:$0xf0] }
 0x890   :  { %v1224_v50 = vmul.f32 0.7978846, %v1220_v55  ;;  %v1225_v51 = vmul.f32 0.7978846, %v1221_v49  ;;  %v3729_v52 = vpop.eup %3728  ;;  %v3591_v55 = vld [vmem:[#allocation3 + $0x13c] sm:$0xf]  ;;  %v3216_v49 = vor.u32 %v3592_v54, %v3215_v47  ;;  %v3160_v42 = vor.u32 %v3576_v36, %v3157_v39 }
 0x891   :  { %v3731_v53 = vpop.eup %3730  ;;  %v1230_v11 = vadd.f32 1.0, %v3729_v52  ;;  %v3593_v52 = vld [vmem:[#allocation3 + $0x148] sm:$0xf0] }
 0x892   :  { %3732 = vtanh.f32 %v1224_v50  ;;  %v1231_v57 = vadd.f32 1.0, %v3731_v53  ;;  %v3217_v50 = vld [vmem:[#allocation3 + $0x144] sm:$0xf0] }
 0x893   :  { %3734 = vtanh.f32 %v1225_v51  ;;  %v1234_v3 = vmul.f32 %v1230_v11, %v1202_v59  ;;  %v3223_v51 = vld [vmem:[#allocation3 + $0x140] sm:$0xf]  ;;  %v3220_v53 = vor.u32 %v3591_v55, %v3217_v50 }
 0x894   :  { %v1235_v48 = vmul.f32 %v1231_v57, %v1203_v62  ;;  %v3224_v11 = vor.u32 %v3593_v52, %v3223_v51  ;;  %v3589_v57 = vld [vmem:[#allocation3 + $0x128] sm:$0xf0]  ;;  %v3590_v62 = vld [vmem:[#allocation3 + $0x130] sm:$0xf0] }
 0x895   :  { %1641 = vmatpush.bf16.msra.mxu3 %v3220_v53 }
 0x896   :  { %1655 = vmatpush.bf16.msrb.mxu0 %v3224_v11 }
 0x898   :  { %v3733_v56 = vpop.eup %3732 }
 0x899   :  { %v3735_v58 = vpop.eup %3734  ;;  %v1232_v61 = vadd.f32 1.0, %v3733_v56  ;;  %v3203_v56 = vld [vmem:[#allocation3 + $0x120] sm:$0xf] }
 0x89a   :  { %v1233_v45 = vadd.f32 1.0, %v3735_v58  ;;  %v3588_v58 = vld [vmem:[#allocation3 + $0x124] sm:$0xf]  ;;  %v3204_v59 = vor.u32 %v3589_v57, %v3203_v56 }
 0x89b   :  { %v1236_v5 = vmul.f32 %v1232_v61, %v1204_v60  ;;  %v3205_v60 = vld [vmem:[#allocation3 + $0x12c] sm:$0xf0]  ;;  %v3211_v61 = vld [vmem:[#allocation3 + $0x128] sm:$0xf] }
 0x89c   :  { %v1237_v6 = vmul.f32 %v1233_v45, %v1205_v0  ;;  %v3208_v0 = vor.u32 %v3588_v58, %v3205_v60  ;;  %v3212_v45 = vor.u32 %v3590_v62, %v3211_v61  ;;  %v3676_v61 = vld [vmem:[%s4532_s14] ss:$0 sm:$0xff] }
 0x89d   :  { %v1238_v7 = vpack.c.bf16 %v1236_v5, %v1234_v3  ;;  %v3191_v3 = vld [vmem:[#allocation3 + $0x108] sm:$0xf]  ;;  %v3586_v5 = vld [vmem:[#allocation3 + $0x110] sm:$0xf0] }
 0x89e   :  { %v1239_v9 = vpack.c.bf16 %v1237_v6, %v1235_v48  ;;  %1642 = vmatpush.bf16.msra.mxu3 %v3208_v0  ;;  %1656 = vmatpush.bf16.msrb.mxu0 %v3212_v45  ;;  %v3585_v48 = vld [vmem:[#allocation3 + $0x10c] sm:$0xf]  ;;  %v3192_v6 = vor.u32 %v3586_v5, %v3191_v3  ;;  %v3677_v5 = vld [vmem:[%s4533_s15] ss:$0 sm:$0xff] }
 0x89f   :  { %1380 = vmatmul.bf16.vlgmr.msra.gmra.mxu0 %v1238_v7  ;;  %v3193_v7 = vld [vmem:[#allocation3 + $0x114] sm:$0xf0] }
 0x8a0   :  { %1394 = vmatmul.bf16.vlgmr.msrb.gmra.mxu1 %v1239_v9  ;;  %v3199_v9 = vld [vmem:[#allocation3 + $0x110] sm:$0xf] }
 0x91c   :  { %v1381_v13 = vpop.f32.mrf.mxu0 }
 0x91d   :  { %v1382_v14 = vadd.f32 %v3675_v12, %v1381_v13  ;;  %v1395_v16 = vpop.f32.mrf.mxu1  ;;  %v3196_v13 = vor.u32 %v3585_v48, %v3193_v7 }
 0x91f   :  { %v1396_v17 = vadd.f32 %v1395_v16, %v1382_v14  ;;  %1643 = vmatpush.bf16.msra.mxu3 %v3196_v13  ;;  %v3179_v16 = vld [vmem:[#allocation3 + $0xf0] sm:$0xf] }
 0x921   :  { %v1400_v15 = vadd.f32 %v1396_v17, %v4273_v1  ;;  %v3583_v17 = vld [vmem:[#allocation3 + $0xf8] sm:$0xf0] }
 0x923   :  { %1404 = vadd.xlane.f32.xlu1 %v1400_v15 }
 0x924   :  { %v1383_v63 = vpop.f32.mrf.mxu0 }
 0x925   :  { %v1384_v18 = vadd.f32 %v3675_v12, %v1383_v63  ;;  %v1397_v19 = vpop.f32.mrf.mxu1  ;;  %v3587_v12 = vld [vmem:[#allocation3 + $0x118] sm:$0xf0]  ;;  %v3180_v63 = vor.u32 %v3583_v17, %v3179_v16 }
 0x926   :  { %v3200_v14 = vor.u32 %v3587_v12, %v3199_v9 }
 0x927   :  { %v1398_v20 = vadd.f32 %v1397_v19, %v1384_v18  ;;  %v3181_v18 = vld [vmem:[#allocation3 + $0xfc] sm:$0xf0]  ;;  %v3187_v19 = vld [vmem:[#allocation3 + $0xf8] sm:$0xf] }
 0x928   :  { %1657 = vmatpush.bf16.msrb.mxu0 %v3200_v14 }
 0x929   :  { %v1401_v21 = vadd.f32 %v1398_v20, %v4275_v2  ;;  %v3239_v2 = vld [vmem:[#allocation3 + $0x168] sm:$0xf]  ;;  %v3584_v20 = vld [vmem:[#allocation3 + $0x100] sm:$0xf0] }
 0x92a   :  { %v3240_v32 = vor.u32 %v3598_v30, %v3239_v2  ;;  %v3175_v2 = vld [vmem:[#allocation3 + $0xe0] sm:$0xf]  ;;  %v3581_v30 = vld [vmem:[#allocation3 + $0xe8] sm:$0xf0] }
 0x92b   :  { %1406 = vadd.xlane.f32.xlu0 %v1401_v21  ;;  %v3176_v33 = vor.u32 %v3581_v30, %v3175_v2 }
 0x92c   :  { %1625 = vmatpush.bf16.msrb.mxu2 %v3240_v32 }
 0x930   :  { %1626 = vmatpush.bf16.msrb.mxu2 %v3228_v41  ;;  %v3578_v41 = vld [vmem:[#allocation3 + $0xd0] sm:$0xf0] }
 0x931   :  { %v3164_v43 = vor.u32 %v3578_v41, %v3163_v40 }
 0x934   :  { %1627 = vmatpush.bf16.msrb.mxu2 %v3216_v49 }
 0x938   :  { %1628 = vmatpush.bf16.msrb.mxu2 %v3204_v59 }
 0x93c   :  { %1629 = vmatpush.bf16.msrb.mxu2 %v3192_v6 }
 0x940   :  { %1630 = vmatpush.bf16.msrb.mxu2 %v3180_v63 }
 0x996   :  { %v1405_v23 = vpop.xlane.xlu1 %1404 }
 0x997   :  { %v1408_v24 = vmul.f32 %v1405_v23, %v4064_v8  ;;  %v3188_v23 = vor.u32 %v3584_v20, %v3187_v19 }
 0x999   :  { %v4288_v25 = vsub.f32 %v1400_v15, %v1408_v24  ;;  %v3582_v15 = vld [vmem:[#allocation3 + $0xf4] sm:$0xf]  ;;  %1658 = vmatpush.bf16.msrb.mxu0 %v3188_v23  ;;  %v3167_v24 = vld [vmem:[#allocation3 + $0xd8] sm:$0xf] }
 0x99b   :  { %v1412_v26 = vmul.f32 %v4288_v25, %v4288_v25 }
 0x99d   :  { %1414 = vadd.xlane.f32.xlu2 %v1412_v26  ;;  %v3580_v26 = vld [vmem:[#allocation3 + $0xe0] sm:$0xf0]  ;;  %1659 = vmatpush.bf16.msrb.mxu0 %v3176_v33 }
 0x99e   :  { %v1407_v28 = vpop.xlane.xlu0 %1406 }
 0x99f   :  { %v1409_v1 = vmul.f32 %v1407_v28, %v4064_v8  ;;  %v3579_v28 = vld [vmem:[#allocation3 + $0xdc] sm:$0xf] }
 0x9a1   :  { %v4293_v29 = vsub.f32 %v1401_v21, %v1409_v1  ;;  %v3184_v21 = vor.u32 %v3582_v15, %v3181_v18  ;;  %v3168_v1 = vor.u32 %v3580_v26, %v3167_v24  ;;  %1660 = vmatpush.bf16.msrb.mxu0 %v3164_v43 }
 0x9a3   :  { %v1413_v22 = vmul.f32 %v4293_v29, %v4293_v29  ;;  %1644 = vmatpush.bf16.msra.mxu3 %v3184_v21  ;;  %1631 = vmatpush.bf16.msrb.mxu2 %v3168_v1 }
 0x9a5   :  { %1416 = vadd.xlane.f32.xlu1 %v1413_v22  ;;  %v3169_v22 = vld [vmem:[#allocation3 + $0xe4] sm:$0xf0] }
 0x9a6   :  { %v3172_v32 = vor.u32 %v3579_v28, %v3169_v22 }
 0x9a7   :  { %1632 = vmatpush.bf16.msrb.mxu2 %v3156_v38 }
 0x9a8   :  { %1645 = vmatpush.bf16.msra.mxu3 %v3172_v32 }
 0x9ac   :  { %1646 = vmatpush.bf16.msra.mxu3 %v3160_v42 }
 0xa10   :  { %v1415_v31 = vpop.xlane.xlu2 %1414 }
 0xa11   :  { %v1418_v37 = vmul.f32 %v1415_v31, %v4064_v8 }
 0xa13   :  { %v1420_v44 = vadd.f32 1e-12, %v1418_v37 }
 0xa15   :  { %3736 = vrsqrt.f32 %v1420_v44  ;;  %vm1428_vm4 = vweird.f32 %v1420_v44 }
 0xa18   :  { %v1417_v10 = vpop.xlane.xlu1 %1416 }
 0xa19   :  { %v1419_v46 = vmul.f32 %v1417_v10, %v4064_v8 }
 0xa1b   :  { %v3737_v47 = vpop.eup %3736  ;;  %v1421_v54 = vadd.f32 1e-12, %v1419_v46 }
 0xa1c   :  { %v1423_v55 = vmul.f32 %v3737_v47, %v1420_v44  ;;  %vm1429_vm3 = vweird.f32 %v3737_v47 }
 0xa1d   :  { %3738 = vrsqrt.f32 %v1421_v54  ;;  %vm1430_vm5 = vmor %vm1428_vm4, %vm1429_vm3  ;;  %vm1438_vm13 = vweird.f32 %v1421_v54 }
 0xa1e   :  { %v1424_v49 = vmul.f32 %v3737_v47, %v1423_v55 }
 0xa20   :  { %v1425_v50 = vmul.f32 0.5, %v1424_v49 }
 0xa22   :  { %v1426_v51 = vsub.f32 1.5, %v1425_v50 }
 0xa23   :  { %v3739_v52 = vpop.eup %3738 }
 0xa24   :  { %v1427_v53 = vmul.f32 %v3737_v47, %v1426_v51  ;;  %v1433_v11 = vmul.f32 %v3739_v52, %v1421_v54  ;;  %vm1439_vm6 = vweird.f32 %v3739_v52 }
 0xa25   :  { %vm1440_vm14 = vmor %vm1438_vm13, %vm1439_vm6 }
 0xa26   :  { %v1434_v56 = vmul.f32 %v3739_v52, %v1433_v11  ;;  %v1431_v57 = vsel %vm1430_vm5, %v3737_v47, %v1427_v53 }
 0xa27   :  { %v1442_v60 = vmul.f32 %v1431_v57, %v4288_v25 }
 0xa28   :  { %v1435_v58 = vmul.f32 0.5, %v1434_v56 }
 0xa29   :  { %v1447_v3 = vmul.f32 %v3676_v61, %v1442_v60 }
 0xa2a   :  { %v1436_v59 = vsub.f32 1.5, %v1435_v58 }
 0xa2b   :  { %v4307_v6 = vadd.f32 %v3677_v5, %v1447_v3 }
 0xa2c   :  { %v1437_v62 = vmul.f32 %v3739_v52, %v1436_v59 }
 0xa2e   :  { %v1441_v0 = vsel %vm1440_vm14, %v3739_v52, %v1437_v62 }
 0xa2f   :  { %v1443_v45 = vmul.f32 %v1441_v0, %v4293_v29  ;;  %v4316_v29 = vld [vmem:[%s4523_s5 + $0x3] sm:$0x7] }
 0xa30   :  { %v1493_v9 = vperm.slane %v4316_v29, 2  ;;  %v1491_v14 = vperm.slane %v4316_v29, 0  ;;  %v1492_v16 = vperm.slane %v4316_v29, 1 }
 0xa31   :  { %v1448_v48 = vmul.f32 %v3676_v61, %v1443_v45 }
 0xa33   :  { %v4309_v7 = vadd.f32 %v3677_v5, %v1448_v48 }
 0xa35   :  { %v1454_v25 = vpack.c.bf16 %v4309_v7, %v4307_v6 }
 0xa37   :  { %1633 = vmatmul.bf16.vlgmr.msrb.gmra.mxu2 %v1454_v25  ;;  %1647 = vmatmul.bf16.vlgmr.msra.gmra.mxu3 %v1454_v25 }
 0xa38   :  { %1661 = vmatmul.bf16.vlgmr.msrb.gmra.mxu0 %v1454_v25 }
 0xab5   :  { %v1662_v12 = vpop.f32.mrf.mxu0 }
 0xab6   :  { %v1663_v13 = vadd.f32 %v1662_v12, %v1493_v9 }
 0xab8   :  { %v4323_v17 = vpack.c.bf16 %v1663_v13, %v1663_v13 }
 0xaba   :  { %v1711_v15 = vsel %vm466_vm8, %v4323_v17, 0  ;;  %v1634_v63 = vpop.f32.mrf.mxu2  ;;  %v1648_v18 = vpop.f32.mrf.mxu3 }
 0xabb   :  { %v1635_v19 = vadd.f32 %v1634_v63, %v1491_v14  ;;  %v1649_v20 = vadd.f32 %v1648_v18, %v1492_v16  ;;  %1720 = vmatpush.bf16.msra.mxu2 %v1711_v15 }
 0xabd   :  { %v1667_v21 = vpack.c.bf16 %v1649_v20, %v1635_v19 }
 0xabf   :  { %v1672_v23 = vunpack.c.h.b16 %v1667_v21  ;;  %v1727_v24 = vunpack.c.l.b16 %v1667_v21 }
 0xac1   :  { %v1728_v26 = vpack.c.b16 %v1727_v24, %v1727_v24  ;;  %v1673_v28 = vpack.c.b16 %v1672_v23, %v1672_v23 }
 0xac2   :  { %v1636_v1 = vpop.f32.mrf.mxu2  ;;  %v1650_v22 = vpop.f32.mrf.mxu3 }
 0xac3   :  { %v1637_v2 = vadd.f32 %v1636_v1, %v1491_v14  ;;  %v1651_v30 = vadd.f32 %v1650_v22, %v1492_v16  ;;  %1729 = vrot.lane.b32.xlu2 %v1728_v26, %s3930_s30  ;;  %1797 = vrot.lane.b32.xlu1 %v1673_v28, %s3922_s10  ;;  %v1678_v31 = vsel %vm427_vm7, %v1673_v28, 0 }
 0xac4   :  { %1731 = vrot.lane.b32.xlu0 %v1673_v28, %s3930_s30  ;;  %1687 = vmatpush.bf16.xpose.msra.mxu1 %v1678_v31 }
 0xac5   :  { %v1669_v32 = vpack.c.bf16 %v1651_v30, %v1637_v2 }
 0xac7   :  { %v1922_v33 = vunpack.c.h.b16 %v1669_v32  ;;  %v1977_v35 = vunpack.c.l.b16 %v1669_v32 }
 0xac9   :  { %v1923_v34 = vpack.c.b16 %v1922_v33, %v1922_v33  ;;  %v1978_v36 = vpack.c.b16 %v1977_v35, %v1977_v35 }
 0xacb   :  { %1795 = vrot.lane.b32.xlu2 %v1728_v26, %s3922_s10  ;;  %1981 = vrot.lane.b32.xlu1 %v1923_v34, %s3930_s30  ;;  %v1928_v42 = vsel %vm427_vm7, %v1923_v34, 0 }
 0xacc   :  { %1860 = vrot.lane.b32.xlu0 %v1673_v28, %s3931_s0  ;;  %3249 = vmatmul.msk.bf16.vlgmr.msra.gmra.mxu1 %vm427_vm7, %v1667_v21 }
 0xad3   :  { %1979 = vrot.lane.b32.xlu2 %v1978_v36, %s3930_s30  ;;  %2110 = vrot.lane.b32.xlu1 %v1923_v34, %s3931_s0 }
 0xad4   :  { %1858 = vrot.lane.b32.xlu0 %v1728_v26, %s3931_s0 }
 0xadb   :  { %2045 = vrot.lane.b32.xlu2 %v1978_v36, %s3922_s10 }
 0xadc   :  { %2047 = vrot.lane.b32.xlu0 %v1923_v34, %s3922_s10 }
 0xae4   :  { %2108 = vrot.lane.b32.xlu0 %v1978_v36, %s3931_s0 }
 0xb1d   :  { %v1730_v37 = vpop.permute.xlu2 %1729 }
 0xb25   :  { %v1796_v43 = vpop.permute.xlu2 %1795 }
 0xb2d   :  { %v1980_v58 = vpop.permute.xlu2 %1979 }
 0xb35   :  { %v1798_v38 = vpop.permute.xlu1 %1797  ;;  %v2046_v59 = vpop.permute.xlu2 %2045 }
 0xb36   :  { %v1803_v39 = vsel %vm427_vm7, %v1798_v38, 0  ;;  %v1732_v40 = vpop.permute.xlu0 %1731  ;;  %v1767_v38 = vunpack.c.l.b16 %v4323_v17 }
 0xb37   :  { %v1737_v41 = vsel %vm427_vm7, %v1732_v40, 0  ;;  %1812 = vmatpush.bf16.xpose.msrb.mxu1 %v1803_v39 }
 0xb38   :  { %1746 = vmatpush.bf16.xpose.msrb.mxu3 %v1737_v41  ;;  %v1768_v40 = vpack.c.b16 %v1767_v38, %v1767_v38 }
 0xb3d   :  { %v1982_v44 = vpop.permute.xlu1 %1981 }
 0xb3e   :  { %v1987_v10 = vsel %vm427_vm7, %v1982_v44, 0  ;;  %v1861_v46 = vpop.permute.xlu0 %1860  ;;  %3253 = vmatmul.msk.bf16.vlgmr.msrb.gmra.mxu1 %vm427_vm7, %v1796_v43 }
 0xb3f   :  { %1937 = vmatpush.bf16.xpose.msra.mxu1 %v1928_v42  ;;  %v1866_v47 = vsel %vm427_vm7, %v1861_v46, 0  ;;  %3251 = vmatmul.msk.bf16.vlgmr.msrb.gmra.mxu3 %vm427_vm7, %v1730_v37 }
 0xb40   :  { %1875 = vmatpush.bf16.xpose.msra.mxu3 %v1866_v47 }
 0xb45   :  { %v2111_v50 = vpop.permute.xlu1 %2110 }
 0xb46   :  { %v1859_v54 = vpop.permute.xlu0 %1858  ;;  %v2116_v11 = vsel %vm427_vm7, %v2111_v50, 0 }
 0xb48   :  { %1996 = vmatpush.bf16.xpose.msrb.mxu3 %v1987_v10 }
 0xb49   :  { %v1689_v55 = vpop.f32.mrf.mxu1 }
 0xb4a   :  { %v1693_v49 = vmul.f32 0.17677669, %v1689_v55 }
 0xb4c   :  { %v1694_v51 = vadd.f32 %v1693_v49, %v4127_v27 }
 0xb4e   :  { %v2048_v52 = vpop.permute.xlu0 %2047  ;;  %3257 = vmatmul.msk.bf16.vlgmr.msra.gmra.mxu1 %vm427_vm7, %v1669_v32  ;;  %v1695_v53 = vsel %vm450_vm9, %v1694_v51, -inf }
 0xb4f   :  { %v2053_v56 = vsel %vm427_vm7, %v2048_v52, 0  ;;  %3255 = vmatmul.msk.bf16.vlgmr.msra.gmra.mxu3 %vm427_vm7, %v1859_v54  ;;  %1696 = vmax.xlane.f32.xlu1 %v1695_v53 }
 0xb50   :  { %2125 = vmatpush.bf16.xpose.msra.mxu3 %v2116_v11  ;;  %2062 = vmatpush.bf16.xpose.msrb.mxu1 %v2053_v56 }
 0xb51   :  { %v1691_v57 = vpop.f32.mrf.mxu1 }
 0xb56   :  { %v2109_v60 = vpop.permute.xlu0 %2108 }
 0xb5e   :  { %3261 = vmatmul.msk.bf16.vlgmr.msrb.gmra.mxu1 %vm427_vm7, %v2046_v59 }
 0xb5f   :  { %3259 = vmatmul.msk.bf16.vlgmr.msrb.gmra.mxu3 %vm427_vm7, %v1980_v58 }
 0xb6f   :  { %3263 = vmatmul.msk.bf16.vlgmr.msra.gmra.mxu3 %vm427_vm7, %v2109_v60 }
 0xbbb   :  { %v1814_v61 = vpop.f32.mrf.mxu1 }
 0xbbc   :  { %v1818_v62 = vmul.f32 0.17677669, %v1814_v61 }
 0xbbe   :  { %v1819_v0 = vadd.f32 %v1818_v62, %v4127_v27 }
 0xbc0   :  { %v1820_v45 = vsel %vm450_vm9, %v1819_v0, -inf }
 0xbc1   :  { %1821 = vmax.xlane.f32.xlu0 %v1820_v45 }
 0xbc2   :  { %v1748_v3 = vpop.f32.mrf.mxu3  ;;  %v1697_v5 = vpop.xlane.xlu1 %1696 }
 0xbc3   :  { %v1752_v48 = vmul.f32 0.17677669, %v1748_v3  ;;  %v1698_v25 = vsub.f32 %v1694_v51, %v1697_v5  ;;  %v1816_v12 = vpop.f32.mrf.mxu1 }
 0xbc5   :  { %v1699_v13 = vmul.f32 1.442695, %v1698_v25  ;;  %v1753_v14 = vadd.f32 %v1752_v48, %v4127_v27 }
 0xbc7   :  { %3740 = vpow2.f32 %v1699_v13  ;;  %v1754_v16 = vsel %vm450_vm9, %v1753_v14, -inf }
 0xbc8   :  { %1755 = vmax.xlane.f32.xlu2 %v1754_v16 }
 0xbca   :  { %v1750_v15 = vpop.f32.mrf.mxu3 }
 0xbcb   :  { %v1939_v63 = vpop.f32.mrf.mxu1  ;;  %v1664_v15 = vpop.f32.mrf.mxu0 }
 0xbcc   :  { %v1943_v20 = vmul.f32 0.17677669, %v1939_v63  ;;  %v1665_v63 = vadd.f32 %v1664_v15, %v1493_v9 }
 0xbcd   :  { %v3741_v18 = vpop.eup %3740 }
 0xbce   :  { %v1701_v19 = vsel %vm450_vm9, %v3741_v18, 0.0  ;;  %v1944_v26 = vadd.f32 %v1943_v20, %v4155_v4  ;;  %v1670_v20 = vpack.c.bf16 %v1665_v63, %v1665_v63 }
 0xbd0   :  { %1702 = vadd.xlane.f32.xlu2 %v1701_v19  ;;  %v1945_v22 = vsel %vm450_vm9, %v1944_v26, -inf }
 0xbd2   :  { %v1877_v21 = vpop.f32.mrf.mxu3 }
 0xbd3   :  { %v1881_v23 = vmul.f32 0.17677669, %v1877_v21  ;;  %v1941_v24 = vpop.f32.mrf.mxu1 }
 0xbd5   :  { %v1882_v28 = vadd.f32 %v1881_v23, %v4127_v27  ;;  %v2017_v23 = vunpack.c.l.b16 %v1670_v20 }
 0xbd7   :  { %v1883_v1 = vsel %vm450_vm9, %v1882_v28, -inf }
 0xbd8   :  { %1884 = vmax.xlane.f32.xlu1 %v1883_v1  ;;  %1946 = vmax.xlane.f32.xlu2 %v1945_v22 }
 0xbda   :  { %v1879_v2 = vpop.f32.mrf.mxu3 }
 0xbdb   :  { %v2064_v30 = vpop.f32.mrf.mxu1  ;;  %v2018_v2 = vpack.c.b16 %v2017_v23, %v2017_v23 }
 0xbdc   :  { %v2068_v31 = vmul.f32 0.17677669, %v2064_v30 }
 0xbde   :  { %v4367_v32 = vadd.f32 %v2068_v31, %v4155_v4 }
 0xbe0   :  { %v2070_v33 = vsel %vm450_vm9, %v4367_v32, -inf }
 0xbe1   :  { %2071 = vmax.xlane.f32.xlu1 %v2070_v33  ;;  %v1961_v33 = vsel %vm466_vm8, %v1670_v20, 0 }
 0xbe2   :  { %v1998_v34 = vpop.f32.mrf.mxu3 }
 0xbe3   :  { %v2002_v35 = vmul.f32 0.17677669, %v1998_v34  ;;  %v2066_v36 = vpop.f32.mrf.mxu1 }
 0xbe5   :  { %v2003_v27 = vadd.f32 %v2002_v35, %v4155_v4 }
 0xbe7   :  { %v2004_v37 = vsel %vm450_vm9, %v2003_v27, -inf }
 0xbe8   :  { %2005 = vmax.xlane.f32.xlu0 %v2004_v37 }
 0xbea   :  { %v2000_v39 = vpop.f32.mrf.mxu3 }
 0xbf0   :  { %1769 = vrot.lane.b32.xlu2 %v1768_v40, %s3930_s30 }
 0xbf2   :  { %v2127_v41 = vpop.f32.mrf.mxu3 }
 0xbf3   :  { %v2131_v42 = vmul.f32 0.17677669, %v2127_v41 }
 0xbf5   :  { %v2132_v43 = vadd.f32 %v2131_v42, %v4155_v4 }
 0xbf7   :  { %v2133_v44 = vsel %vm450_vm9, %v2132_v43, -inf }
 0xbf8   :  { %2134 = vmax.xlane.f32.xlu0 %v2133_v44 }
 0xbfa   :  { %v2129_v10 = vpop.f32.mrf.mxu3  ;;  %1895 = vrot.lane.b32.xlu1 %v1768_v40, %s3931_s0 }
 0xc0c   :  { %1832 = vrot.lane.b32.xlu0 %v1768_v40, %s3922_s10 }
 0xc34   :  { %v1822_v46 = vpop.xlane.xlu0 %1821 }
 0xc35   :  { %v1823_v47 = vsub.f32 %v1819_v0, %v1822_v46 }
 0xc37   :  { %v1824_v54 = vmul.f32 1.442695, %v1823_v47 }
 0xc39   :  { %3742 = vpow2.f32 %v1824_v54 }
 0xc3b   :  { %v1756_v17 = vpop.xlane.xlu2 %1755 }
 0xc3c   :  { %v1757_v55 = vsub.f32 %v1753_v14, %v1756_v17 }
 0xc3e   :  { %v1758_v49 = vmul.f32 1.442695, %v1757_v55 }
 0xc3f   :  { %v4379_v50 = vpop.eup %3742 }
 0xc40   :  { %3744 = vpow2.f32 %v1758_v49  ;;  %v1826_v4 = vsel %vm450_vm9, %v4379_v50, 0.0 }
 0xc41   :  { %1827 = vadd.xlane.f32.xlu0 %v1826_v4 }
 0xc43   :  { %v1703_v51 = vpop.xlane.xlu2 %1702 }
 0xc44   :  { %3746 = vrcp.f32 %v1703_v51 }
 0xc46   :  { %v4383_v52 = vpop.eup %3744 }
 0xc47   :  { %v1760_v53 = vsel %vm450_vm9, %v4383_v52, 0.0 }
 0xc48   :  { %1761 = vadd.xlane.f32.xlu1 %v1760_v53 }
 0xc4a   :  { %v3747_v11 = vpop.eup %3746 }
 0xc4b   :  { %v1705_v56 = vmul.f32 %v3747_v11, %v3741_v18  ;;  %v1885_v57 = vpop.xlane.xlu1 %1884  ;;  %v1947_v58 = vpop.xlane.xlu2 %1946 }
 0xc4c   :  { %v1886_v59 = vsub.f32 %v1882_v28, %v1885_v57  ;;  %v1948_v60 = vsub.f32 %v1944_v26, %v1947_v58 }
 0xc4d   :  { %v1706_v61 = vpack.c.bf16 %v1705_v56, %v1705_v56 }
 0xc4e   :  { %v1887_v62 = vmul.f32 1.442695, %v1886_v59  ;;  %v1949_v0 = vmul.f32 1.442695, %v1948_v60 }
 0xc4f   :  { %3250 = vmatmul.msk.bf16.vlgmr.msra.gmra.mxu2 %vm450_vm9, %v1706_v61 }
 0xc50   :  { %3748 = vpow2.f32 %v1887_v62 }
 0xc51   :  { %3750 = vpow2.f32 %v1949_v0 }
 0xc53   :  { %v1770_v45 = vpop.permute.xlu2 %1769 }
 0xc54   :  { %v1775_v3 = vsel %vm466_vm8, %v1770_v45, 0  ;;  %v2072_v18 = vpop.xlane.xlu1 %2071 }
 0xc55   :  { %1784 = vmatpush.bf16.msra.mxu0 %v1775_v3  ;;  %v2073_v34 = vsub.f32 %v4367_v32, %v2072_v18 }
 0xc56   :  { %v3749_v5 = vpop.eup %3748 }
 0xc57   :  { %v4389_v48 = vpop.eup %3750  ;;  %v1889_v25 = vsel %vm450_vm9, %v3749_v5, 0.0  ;;  %v2074_v35 = vmul.f32 1.442695, %v2073_v34 }
 0xc58   :  { %v1951_v12 = vsel %vm450_vm9, %v4389_v48, 0.0  ;;  %1890 = vadd.xlane.f32.xlu1 %v1889_v25 }
 0xc59   :  { %1952 = vadd.xlane.f32.xlu2 %v1951_v12 }
 0xc5b   :  { %v2006_v13 = vpop.xlane.xlu0 %2005 }
 0xc5c   :  { %v2007_v14 = vsub.f32 %v2003_v27, %v2006_v13 }
 0xc5e   :  { %v2008_v16 = vmul.f32 1.442695, %v2007_v14 }
 0xc60   :  { %3752 = vpow2.f32 %v2008_v16 }
 0xc66   :  { %v3753_v19 = vpop.eup %3752 }
 0xc67   :  { %v2010_v21 = vsel %vm450_vm9, %v3753_v19, 0.0 }
 0xc68   :  { %2011 = vadd.xlane.f32.xlu0 %v2010_v21 }
 0xc6b   :  { %v2135_v24 = vpop.xlane.xlu0 %2134 }
 0xc6c   :  { %v2136_v26 = vsub.f32 %v2132_v43, %v2135_v24  ;;  %v1896_v28 = vpop.permute.xlu1 %1895 }
 0xc6d   :  { %v1901_v1 = vsel %vm466_vm8, %v1896_v28, 0 }
 0xc6e   :  { %v2137_v22 = vmul.f32 1.442695, %v2136_v26  ;;  %1910 = vmatpush.bf16.msrb.mxu0 %v1901_v1 }
 0xc70   :  { %3754 = vpow2.f32 %v2137_v22 }
 0xc71   :  { %2019 = vrot.lane.b32.xlu1 %v2018_v2, %s3930_s30  ;;  %3756 = vpow2.f32 %v2074_v35  ;;  %v3603_v35 = vld [vmem:[%s4524_s6 + $0x58] sm:$0xff] }
 0xc76   :  { %v3755_v29 = vpop.eup %3754 }
 0xc77   :  { %v2139_v9 = vsel %vm450_vm9, %v3755_v29, 0.0  ;;  %v3757_v36 = vpop.eup %3756 }
 0xc78   :  { %2140 = vadd.xlane.f32.xlu2 %v2139_v9  ;;  %v2076_v27 = vsel %vm450_vm9, %v3757_v36, 0.0  ;;  %v3607_v9 = vld [vmem:[%s4524_s6 + $0x78] sm:$0xff] }
 0xc79   :  { %2244 = vmatpush.bf16.msra.mxu1 %v3607_v9  ;;  %v3337_v9 = vld [vmem:[#allocation5 + $0xa8] sm:$0xf0] }
 0xc7c   :  { %2145 = vrot.lane.b32.xlu0 %v2018_v2, %s3931_s0 }
 0xc7e   :  { %v1833_v30 = vpop.permute.xlu0 %1832 }
 0xc7f   :  { %v1838_v31 = vsel %vm466_vm8, %v1833_v30, 0  ;;  %v3606_v30 = vld [vmem:[%s4524_s6 + $0x70] sm:$0xff] }
 0xc80   :  { %1847 = vmatpush.bf16.msrb.mxu2 %v1838_v31  ;;  %2245 = vmatpush.bf16.msra.mxu1 %v3606_v30  ;;  %v3605_v31 = vld [vmem:[%s4524_s6 + $0x68] sm:$0xff] }
 0xc84   :  { %1970 = vmatpush.bf16.msra.mxu2 %v1961_v33  ;;  %2246 = vmatpush.bf16.msra.mxu1 %v3605_v31  ;;  %v3604_v33 = vld [vmem:[%s4524_s6 + $0x60] sm:$0xff] }
 0xc85   :  { %v3327_v31 = vld [vmem:[#allocation5 + $0x90] sm:$0xf] }
 0xc88   :  { %2247 = vmatpush.bf16.msra.mxu1 %v3604_v33  ;;  %v3611_v33 = vld [vmem:[#allocation5 + $0x94] sm:$0xf0] }
 0xc8c   :  { %2248 = vmatpush.bf16.msra.mxu1 %v3603_v35  ;;  %v3328_v35 = vor.u32 %v3611_v33, %v3327_v31 }
 0xc90   :  { %2082 = vrot.lane.b32.xlu2 %v2018_v2, %s3922_s10 }
 0xc9b   :  { %2077 = vadd.xlane.f32.xlu1 %v2076_v27  ;;  %v3601_v27 = vld [vmem:[%s4524_s6 + $0x48] sm:$0xff] }
 0xcb4   :  { %v1828_v37 = vpop.xlane.xlu0 %1827 }
 0xcb5   :  { %3758 = vrcp.f32 %v1828_v37  ;;  %v3600_v37 = vld [vmem:[%s4524_s6 + $0x40] sm:$0xff] }
 0xcbb   :  { %v3759_v38 = vpop.eup %3758  ;;  %v1762_v39 = vpop.xlane.xlu1 %1761 }
 0xcbc   :  { %v1830_v40 = vmul.f32 %v3759_v38, %v4379_v50  ;;  %3760 = vrcp.f32 %v1762_v39 }
 0xcbe   :  { %v1831_v41 = vpack.c.bf16 %v1830_v40, %v1830_v40 }
 0xcc0   :  { %3254 = vmatmul.msk.bf16.vlgmr.msrb.gmra.mxu2 %vm450_vm9, %v1831_v41 }
 0xcc2   :  { %v3761_v42 = vpop.eup %3760 }
 0xcc3   :  { %v1764_v32 = vmul.f32 %v3761_v42, %v4383_v52 }
 0xcc5   :  { %v1765_v43 = vpack.c.bf16 %v1764_v32, %v1764_v32  ;;  %v3678_v32 = vld [vmem:[%s4525_s7 + $0x1] ss:$0 sm:$0xff] }
 0xcc7   :  { %3252 = vmatmul.msk.bf16.vlgmr.msra.gmra.mxu0 %vm450_vm9, %v1765_v43 }
 0xccb   :  { %v1891_v44 = vpop.xlane.xlu1 %1890 }
 0xccc   :  { %v1953_v10 = vpop.xlane.xlu2 %1952  ;;  %3762 = vrcp.f32 %v1891_v44 }
 0xccd   :  { %3764 = vrcp.f32 %v1953_v10 }
 0xcd2   :  { %v3763_v46 = vpop.eup %3762  ;;  %v1722_v47 = vpop.f32.mrf.mxu2 }
 0xcd3   :  { %v3765_v54 = vpop.eup %3764  ;;  %v1893_v17 = vmul.f32 %v3763_v46, %v3749_v5  ;;  %1726 = vst.msk [vmem:[#allocation2] sm:$0xff] %vm427_vm7, %v1722_v47 }
 0xcd4   :  { %v1955_v55 = vmul.f32 %v3765_v54, %v4389_v48 }
 0xcd5   :  { %v1894_v49 = vpack.c.bf16 %v1893_v17, %v1893_v17 }
 0xcd6   :  { %v1956_v50 = vpack.c.bf16 %v1955_v55, %v1955_v55 }
 0xcd7   :  { %3256 = vmatmul.msk.bf16.vlgmr.msrb.gmra.mxu0 %vm450_vm9, %v1894_v49 }
 0xcd8   :  { %3258 = vmatmul.msk.bf16.vlgmr.msra.gmra.mxu2 %vm450_vm9, %v1956_v50 }
 0xcda   :  { %v1724_v4 = vpop.f32.mrf.mxu2 }
 0xcdb   :  { %v2012_v51 = vpop.xlane.xlu0 %2011 }
 0xcdc   :  { %3766 = vrcp.f32 %v2012_v51 }
 0xce2   :  { %v3767_v52 = vpop.eup %3766 }
 0xce3   :  { %v2014_v53 = vmul.f32 %v3767_v52, %v3753_v19  ;;  %v2020_v11 = vpop.permute.xlu1 %2019 }
 0xce4   :  { %v2025_v56 = vsel %vm466_vm8, %v2020_v11, 0  ;;  %v3622_v11 = vld [vmem:[#allocation5 + $0xf4] sm:$0xf] }
 0xce5   :  { %v2015_v57 = vpack.c.bf16 %v2014_v53, %v2014_v53  ;;  %2034 = vmatpush.bf16.msra.mxu0 %v2025_v56  ;;  %v3623_v53 = vld [vmem:[#allocation5 + $0xf4] sm:$0xf0] }
 0xce8   :  { %3260 = vmatmul.msk.bf16.vlgmr.msra.gmra.mxu0 %vm450_vm9, %v2015_v57  ;;  %v3377_v57 = vld [vmem:[#allocation5 + $0xf8] sm:$0xf0] }
 0xceb   :  { %v2141_v58 = vpop.xlane.xlu2 %2140 }
 0xcec   :  { %3768 = vrcp.f32 %v2141_v58  ;;  %v3380_v58 = vor.u32 %v3622_v11, %v3377_v57 }
 0xcee   :  { %v2146_v59 = vpop.permute.xlu0 %2145  ;;  %2433 = vmatpush.bf16.msrb.mxu3 %v3380_v58 }
 0xcef   :  { %v2151_v60 = vsel %vm466_vm8, %v2146_v59, 0  ;;  %v3367_v59 = vld [vmem:[#allocation5 + $0xe0] sm:$0xf] }
 0xcf0   :  { %2160 = vmatpush.bf16.msrb.mxu0 %v2151_v60  ;;  %v3621_v60 = vld [vmem:[#allocation5 + $0xe4] sm:$0xf0] }
 0xcf2   :  { %v3769_v61 = vpop.eup %3768 }
 0xcf3   :  { %v2143_v62 = vmul.f32 %v3769_v61, %v3755_v29  ;;  %v2083_v0 = vpop.permute.xlu2 %2082  ;;  %v3620_v61 = vld [vmem:[#allocation5 + $0xe4] sm:$0xf] }
 0xcf4   :  { %v2088_v45 = vsel %vm466_vm8, %v2083_v0, 0  ;;  %v3369_v0 = vld [vmem:[#allocation5 + $0xe8] sm:$0xf0] }
 0xcf5   :  { %v2144_v3 = vpack.c.bf16 %v2143_v62, %v2143_v62  ;;  %2097 = vmatpush.bf16.msrb.mxu2 %v2088_v45  ;;  %v3368_v62 = vor.u32 %v3621_v60, %v3367_v59  ;;  %v3372_v45 = vor.u32 %v3620_v61, %v3369_v0  ;;  %v3679_v59 = vld [vmem:[%s4526_s8 + $0x1] ss:$0 sm:$0xff] }
 0xcf7   :  { %2434 = vmatpush.bf16.msrb.mxu3 %v3372_v45  ;;  %v3680_v45 = vld [vmem:[%s4527_s9 + $0x1] ss:$0 sm:$0xff] }
 0xcf8   :  { %3264 = vmatmul.msk.bf16.vlgmr.msrb.gmra.mxu0 %vm450_vm9, %v2144_v3  ;;  %v3359_v3 = vld [vmem:[#allocation5 + $0xd0] sm:$0xf] }
 0xd0e   :  { %v2078_v5 = vpop.xlane.xlu1 %2077 }
 0xd0f   :  { %3770 = vrcp.f32 %v2078_v5  ;;  %v3619_v5 = vld [vmem:[#allocation5 + $0xd4] sm:$0xf0] }
 0xd15   :  { %v3771_v48 = vpop.eup %3770 }
 0xd16   :  { %v2080_v25 = vmul.f32 %v3771_v48, %v3757_v36  ;;  %v3602_v36 = vld [vmem:[%s4524_s6 + $0x50] sm:$0xff]  ;;  %v3618_v48 = vld [vmem:[#allocation5 + $0xd4] sm:$0xf] }
 0xd17   :  { %2249 = vmatpush.bf16.msra.mxu1 %v3602_v36  ;;  %v3329_v36 = vld [vmem:[#allocation5 + $0x98] sm:$0xf0] }
 0xd18   :  { %v2081_v12 = vpack.c.bf16 %v2080_v25, %v2080_v25  ;;  %v3360_v25 = vor.u32 %v3619_v5, %v3359_v3 }
 0xd1a   :  { %3262 = vmatmul.msk.bf16.vlgmr.msrb.gmra.mxu2 %vm450_vm9, %v2081_v12  ;;  %v3361_v12 = vld [vmem:[#allocation5 + $0xd8] sm:$0xf0] }
 0xd1b   :  { %2250 = vmatpush.bf16.msra.mxu1 %v3601_v27  ;;  %v3319_v27 = vld [vmem:[#allocation5 + $0x80] sm:$0xf] }
 0xd1f   :  { %2251 = vmatpush.bf16.msra.mxu1 %v3600_v37  ;;  %v3609_v37 = vld [vmem:[#allocation5 + $0x84] sm:$0xf0] }
 0xd43   :  { %v1849_v13 = vpop.f32.mrf.mxu2 }
 0xd44   :  { %v1786_v14 = vpop.f32.mrf.mxu0  ;;  %1854 = vrot.lane.b32.xlu2 %v1849_v13, %s3922_s10  ;;  %v3364_v13 = vor.u32 %v3618_v48, %v3361_v12  ;;  %v3639_v12 = vld [vmem:[#allocation7 + $0xf8] sm:$0xff] }
 0xd45   :  { %1791 = vrot.lane.b32.xlu1 %v1786_v14, %s3931_s0  ;;  %v3351_v14 = vld [vmem:[#allocation5 + $0xc0] sm:$0xf]  ;;  %2633 = vmatpush.bf16.msrb.mxu1 %v3639_v12 }
 0xd46   :  { %2435 = vmatpush.bf16.msrb.mxu3 %v3364_v13  ;;  %v3638_v13 = vld [vmem:[#allocation7 + $0xf0] sm:$0xff] }
 0xd49   :  { %2634 = vmatpush.bf16.msrb.mxu1 %v3638_v13 }
 0xd4b   :  { %v1851_v16 = vpop.f32.mrf.mxu2 }
 0xd4c   :  { %v1788_v15 = vpop.f32.mrf.mxu0  ;;  %v3617_v16 = vld [vmem:[#allocation5 + $0xc4] sm:$0xf0] }
 0xd4d   :  { %v3616_v15 = vld [vmem:[#allocation5 + $0xc4] sm:$0xf] }
 0xd54   :  { %v1912_v63 = vpop.f32.mrf.mxu0 }
 0xd55   :  { %1917 = vrot.lane.b32.xlu2 %v1912_v63, %s3930_s30  ;;  %v3352_v63 = vor.u32 %v3617_v16, %v3351_v14  ;;  %v3629_v14 = vld [vmem:[#allocation7 + $0xa8] sm:$0xff] }
 0xd56   :  { %v3637_v16 = vld [vmem:[#allocation7 + $0xe8] sm:$0xff] }
 0xd57   :  { %2635 = vmatpush.bf16.msrb.mxu1 %v3637_v16 }
 0xd5b   :  { %v1972_v18 = vpop.f32.mrf.mxu2 }
 0xd5c   :  { %1976 = vst.msk [vmem:[#allocation2 + $0x8] sm:$0xff] %vm427_vm7, %v1972_v18  ;;  %v1914_v19 = vpop.f32.mrf.mxu0  ;;  %v3353_v18 = vld [vmem:[#allocation5 + $0xc8] sm:$0xf0] }
 0xd5d   :  { %v3356_v19 = vor.u32 %v3616_v15, %v3353_v18  ;;  %v3628_v15 = vld [vmem:[#allocation7 + $0xa0] sm:$0xff]  ;;  %v3627_v18 = vld [vmem:[#allocation7 + $0x98] sm:$0xff] }
 0xd5f   :  { %2436 = vmatpush.bf16.msrb.mxu3 %v3356_v19  ;;  %v3635_v19 = vld [vmem:[#allocation7 + $0xd8] sm:$0xff] }
 0xd63   :  { %v1974_v20 = vpop.f32.mrf.mxu2 }
 0xd64   :  { %v3343_v20 = vld [vmem:[#allocation5 + $0xb0] sm:$0xf] }
 0xd65   :  { %v2036_v21 = vpop.f32.mrf.mxu0 }
 0xd66   :  { %2041 = vrot.lane.b32.xlu0 %v2036_v21, %s3931_s0  ;;  %v3615_v21 = vld [vmem:[#allocation5 + $0xb4] sm:$0xf0] }
 0xd6d   :  { %v2038_v23 = vpop.f32.mrf.mxu0 }
 0xd6e   :  { %v3614_v23 = vld [vmem:[#allocation5 + $0xb4] sm:$0xf] }
 0xd75   :  { %v2162_v24 = vpop.f32.mrf.mxu0 }
 0xd7d   :  { %v2164_v26 = vpop.f32.mrf.mxu0 }
 0xd7e   :  { %v3345_v26 = vld [vmem:[#allocation5 + $0xb8] sm:$0xf0] }
 0xd9d   :  { %v2099_v28 = vpop.f32.mrf.mxu2 }
 0xd9e   :  { %2104 = vrot.lane.b32.xlu0 %v2099_v28, %s3922_s10  ;;  %v1855_v22 = vpop.permute.xlu2 %1854  ;;  %v3348_v28 = vor.u32 %v3614_v23, %v3345_v26  ;;  %v3316_v23 = vld [vmem:[%s4529_s11 + $0x2] sm:$0x3]  ;;  %v3633_v26 = vld [vmem:[#allocation7 + $0xc8] sm:$0xff] }
 0xda0   :  { %2437 = vmatpush.bf16.msrb.mxu3 %v3348_v28  ;;  %v2335_v28 = vperm.slane %v3316_v23, 0 }
 0xda5   :  { %v2101_v1 = vpop.f32.mrf.mxu2 }
 0xda6   :  { %2167 = vrot.lane.b32.xlu0 %v2162_v24, %s3930_s30  ;;  %v3344_v24 = vor.u32 %v3615_v21, %v3343_v20  ;;  %v3335_v1 = vld [vmem:[#allocation5 + $0xa0] sm:$0xf]  ;;  %v3626_v20 = vld [vmem:[#allocation7 + $0x90] sm:$0xff] }
 0xda7   :  { %v3634_v21 = vld [vmem:[#allocation7 + $0xd0] sm:$0xff] }
 0xdaf   :  { %v1918_v29 = vpop.permute.xlu2 %1917 }
 0xdb7   :  { %v1792_v2 = vpop.permute.xlu1 %1791 }
 0xdb8   :  { %1794 = vst.msk [vmem:[#allocation2] sm:$0xff] %vm551_vm10, %v1792_v2  ;;  %v3612_v2 = vld [vmem:[#allocation5 + $0xa4] sm:$0xf] }
 0xdb9   :  { %1857 = vst.msk [vmem:[#allocation2] sm:$0xff] %vm615_vm11, %v1855_v22  ;;  %v3613_v22 = vld [vmem:[#allocation5 + $0xa4] sm:$0xf0]  ;;  %v3340_v30 = vor.u32 %v3612_v2, %v3337_v9  ;;  %v3632_v2 = vld [vmem:[#allocation7 + $0xc0] sm:$0xff] }
 0xdba   :  { %1920 = vst.msk [vmem:[#allocation2] sm:$0xff] %vm679_vm12, %v1918_v29  ;;  %v3336_v29 = vor.u32 %v3613_v22, %v3335_v1  ;;  %v2336_v1 = vperm.slane %v3316_v23, 1  ;;  %v3624_v22 = vld [vmem:[#allocation7 + $0x80] sm:$0xff] }
 0xdbb   :  { %2438 = vmatpush.bf16.msrb.mxu3 %v3340_v30 }
 0xdc1   :  { %v2171_v40 = vld [vmem:[#allocation2] sm:$0xff] }
 0xdd8   :  { %v2042_v34 = vpop.permute.xlu0 %2041 }
 0xdd9   :  { %2044 = vst.msk [vmem:[#allocation2 + $0x8] sm:$0xff] %vm551_vm10, %v2042_v34  ;;  %v3610_v34 = vld [vmem:[#allocation5 + $0x94] sm:$0xf] }
 0xe10   :  { %v2105_v38 = vpop.permute.xlu0 %2104 }
 0xe11   :  { %2107 = vst.msk [vmem:[#allocation2 + $0x8] sm:$0xff] %vm615_vm11, %v2105_v38 }
 0xe18   :  { %v2168_v39 = vpop.permute.xlu0 %2167 }
 0xe19   :  { %2170 = vst.msk [vmem:[#allocation2 + $0x8] sm:$0xff] %vm679_vm12, %v2168_v39  ;;  %v3332_v39 = vor.u32 %v3610_v34, %v3329_v36 }
 0xe1b   :  { %2439 = vmatpush.bf16.msrb.mxu3 %v3332_v39 }
 0xe20   :  { %v2172_v41 = vld [vmem:[#allocation2 + $0x8] sm:$0xff] }
 0xe21   :  { %v2173_v42 = vpack.c.bf16 %v2172_v41, %v2171_v40  ;;  %v3608_v40 = vld [vmem:[#allocation5 + $0x84] sm:$0xf]  ;;  %v3321_v41 = vld [vmem:[#allocation5 + $0x88] sm:$0xf0] }
 0xe23   :  { %2252 = vmatmul.bf16.vlgmr.msra.gmra.mxu1 %v2173_v42 }
 0xea0   :  { %v2253_v43 = vpop.f32.mrf.mxu1 }
 0xea1   :  { %v2254_v44 = vadd.f32 %v3678_v32, %v2253_v43  ;;  %v3324_v43 = vor.u32 %v3608_v40, %v3321_v41 }
 0xea3   :  { %v2258_v10 = vadd.f32 %v2254_v44, %v4307_v6  ;;  %2440 = vmatpush.bf16.msrb.mxu3 %v3324_v43 }
 0xea5   :  { %2264 = vadd.xlane.f32.xlu2 %v2258_v10 }
 0xea8   :  { %v2255_v46 = vpop.f32.mrf.mxu1 }
 0xea9   :  { %v2256_v47 = vadd.f32 %v3678_v32, %v2255_v46  ;;  %v3320_v32 = vor.u32 %v3609_v37, %v3319_v27 }
 0xeab   :  { %v2259_v54 = vadd.f32 %v2256_v47, %v4309_v7  ;;  %v3375_v7 = vld [vmem:[#allocation5 + $0xf0] sm:$0xf] }
 0xeac   :  { %v3376_v56 = vor.u32 %v3623_v53, %v3375_v7 }
 0xead   :  { %2266 = vadd.xlane.f32.xlu1 %v2259_v54 }
 0xeae   :  { %2419 = vmatpush.bf16.msra.mxu2 %v3376_v56 }
 0xeb2   :  { %2420 = vmatpush.bf16.msra.mxu2 %v3368_v62 }
 0xeb6   :  { %2421 = vmatpush.bf16.msra.mxu2 %v3360_v25  ;;  %v3631_v25 = vld [vmem:[#allocation7 + $0xb8] sm:$0xff] }
 0xeb7   :  { %2619 = vmatpush.bf16.msra.mxu0 %v3631_v25 }
 0xeba   :  { %2422 = vmatpush.bf16.msra.mxu2 %v3352_v63  ;;  %v3636_v63 = vld [vmem:[#allocation7 + $0xe0] sm:$0xff] }
 0xebb   :  { %2636 = vmatpush.bf16.msrb.mxu1 %v3636_v63 }
 0xebe   :  { %2423 = vmatpush.bf16.msra.mxu2 %v3344_v24  ;;  %v3625_v24 = vld [vmem:[#allocation7 + $0x88] sm:$0xff] }
 0xebf   :  { %2637 = vmatpush.bf16.msrb.mxu1 %v3635_v19 }
 0xec2   :  { %2424 = vmatpush.bf16.msra.mxu2 %v3336_v29 }
 0xec3   :  { %2638 = vmatpush.bf16.msrb.mxu1 %v3634_v21 }
 0xec6   :  { %2425 = vmatpush.bf16.msra.mxu2 %v3328_v35 }
 0xec7   :  { %2639 = vmatpush.bf16.msrb.mxu1 %v3633_v26 }
 0xeca   :  { %2426 = vmatpush.bf16.msra.mxu2 %v3320_v32 }
 0xecb   :  { %2640 = vmatpush.bf16.msrb.mxu1 %v3632_v2 }
 0xf18   :  { %v2265_v17 = vpop.xlane.xlu2 %2264 }
 0xf19   :  { %v2268_v55 = vmul.f32 %v2265_v17, %v4064_v8 }
 0xf1b   :  { %v4463_v49 = vsub.f32 %v2258_v10, %v2268_v55 }
 0xf1d   :  { %v2272_v50 = vmul.f32 %v4463_v49, %v4463_v49 }
 0xf1f   :  { %2274 = vadd.xlane.f32.xlu0 %v2272_v50 }
 0xf20   :  { %v2267_v4 = vpop.xlane.xlu1 %2266 }
 0xf21   :  { %v2269_v51 = vmul.f32 %v2267_v4, %v4064_v8 }
 0xf23   :  { %v4468_v52 = vsub.f32 %v2259_v54, %v2269_v51 }
 0xf25   :  { %v2273_v6 = vmul.f32 %v4468_v52, %v4468_v52 }
 0xf27   :  { %2276 = vadd.xlane.f32.xlu2 %v2273_v6 }
 0xf92   :  { %v2275_v38 = vpop.xlane.xlu0 %2274 }
 0xf93   :  { %v2278_v42 = vmul.f32 %v2275_v38, %v4064_v8 }
 0xf95   :  { %v2280_v44 = vadd.f32 1e-12, %v2278_v42 }
 0xf97   :  { %3772 = vrsqrt.f32 %v2280_v44  ;;  %vm2288_vm8 = vweird.f32 %v2280_v44 }
 0xf9a   :  { %v2277_v10 = vpop.xlane.xlu2 %2276 }
 0xf9b   :  { %v2279_v46 = vmul.f32 %v2277_v10, %v4064_v8 }
 0xf9d   :  { %v3773_v47 = vpop.eup %3772  ;;  %v2281_v54 = vadd.f32 1e-12, %v2279_v46 }
 0xf9e   :  { %v2283_v17 = vmul.f32 %v3773_v47, %v2280_v44  ;;  %vm2289_vm7 = vweird.f32 %v3773_v47 }
 0xf9f   :  { %3774 = vrsqrt.f32 %v2281_v54  ;;  %vm2290_vm9 = vmor %vm2288_vm8, %vm2289_vm7  ;;  %vm2298_vm11 = vweird.f32 %v2281_v54 }
 0xfa0   :  { %v2284_v55 = vmul.f32 %v3773_v47, %v2283_v17 }
 0xfa2   :  { %v2285_v50 = vmul.f32 0.5, %v2284_v55 }
 0xfa4   :  { %v2286_v4 = vsub.f32 1.5, %v2285_v50 }
 0xfa5   :  { %v3775_v51 = vpop.eup %3774 }
 0xfa6   :  { %v2287_v6 = vmul.f32 %v3773_v47, %v2286_v4  ;;  %v2293_v7 = vmul.f32 %v3775_v51, %v2281_v54  ;;  %vm2299_vm10 = vweird.f32 %v3775_v51 }
 0xfa7   :  { %vm2300_vm12 = vmor %vm2298_vm11, %vm2299_vm10 }
 0xfa8   :  { %v2294_v53 = vmul.f32 %v3775_v51, %v2293_v7  ;;  %v2291_v11 = vsel %vm2290_vm9, %v3773_v47, %v2287_v6 }
 0xfa9   :  { %v2302_v58 = vmul.f32 %v2291_v11, %v4463_v49 }
 0xfaa   :  { %v2295_v56 = vmul.f32 0.5, %v2294_v53 }
 0xfab   :  { %v2307_v0 = vmul.f32 %v3679_v59, %v2302_v58 }
 0xfac   :  { %v2296_v57 = vsub.f32 1.5, %v2295_v56 }
 0xfad   :  { %v4482_v5 = vadd.f32 %v3680_v45, %v2307_v0 }
 0xfae   :  { %v2297_v60 = vmul.f32 %v3775_v51, %v2296_v57 }
 0xfb0   :  { %v2301_v61 = vsel %vm2300_vm12, %v3775_v51, %v2297_v60 }
 0xfb1   :  { %v2303_v62 = vmul.f32 %v2301_v61, %v4468_v52  ;;  %v3630_v52 = vld [vmem:[#allocation7 + $0xb0] sm:$0xff] }
 0xfb2   :  { %2620 = vmatpush.bf16.msra.mxu0 %v3630_v52 }
 0xfb3   :  { %v2308_v3 = vmul.f32 %v3679_v59, %v2303_v62 }
 0xfb5   :  { %v4484_v48 = vadd.f32 %v3680_v45, %v2308_v3 }
 0xfb6   :  { %2621 = vmatpush.bf16.msra.mxu0 %v3629_v14  ;;  %v3681_v14 = vld [vmem:[%s4531_s13 + $0x1] ss:$0 sm:$0xff] }
 0xfb7   :  { %v2314_v49 = vpack.c.bf16 %v4484_v48, %v4482_v5 }
 0xfb9   :  { %2427 = vmatmul.bf16.vlgmr.msra.gmra.mxu2 %v2314_v49  ;;  %2441 = vmatmul.bf16.vlgmr.msrb.gmra.mxu3 %v2314_v49 }
 0xfba   :  { %2622 = vmatpush.bf16.msra.mxu0 %v3628_v15 }
 0xfbe   :  { %2623 = vmatpush.bf16.msra.mxu0 %v3627_v18 }
 0xfc2   :  { %2624 = vmatpush.bf16.msra.mxu0 %v3626_v20 }
 0xfc6   :  { %2625 = vmatpush.bf16.msra.mxu0 %v3625_v24 }
 0xfca   :  { %2626 = vmatpush.bf16.msra.mxu0 %v3624_v22 }
0x103c   :  { %v2428_v29 = vpop.f32.mrf.mxu2  ;;  %v2442_v9 = vpop.f32.mrf.mxu3 }
0x103d   :  { %v2429_v30 = vadd.f32 %v2428_v29, %v2335_v28  ;;  %v2443_v31 = vadd.f32 %v2442_v9, %v2336_v1 }
0x103f   :  { %v2451_v33 = vmul.f32 0.044715, %v2429_v30  ;;  %v2452_v34 = vmul.f32 0.044715, %v2443_v31  ;;  %v2447_v59 = vmul.f32 0.5, %v2429_v30  ;;  %v2448_v62 = vmul.f32 0.5, %v2443_v31 }
0x1041   :  { %v2455_v35 = vmul.f32 %v2451_v33, %v2429_v30  ;;  %v2456_v36 = vmul.f32 %v2452_v34, %v2443_v31  ;;  %v3646_v33 = vld [vmem:[#allocation8 + $0x30] sm:$0xff]  ;;  %v3645_v34 = vld [vmem:[#allocation8 + $0x28] sm:$0xff] }
0x1043   :  { %v2459_v27 = vmul.f32 %v2455_v35, %v2429_v30  ;;  %v2460_v37 = vmul.f32 %v2456_v36, %v2443_v31  ;;  %v3643_v35 = vld [vmem:[#allocation8 + $0x18] sm:$0xff]  ;;  %v3642_v36 = vld [vmem:[#allocation8 + $0x10] sm:$0xff] }
0x1044   :  { %v2430_v38 = vpop.f32.mrf.mxu2  ;;  %v2444_v39 = vpop.f32.mrf.mxu3 }
0x1045   :  { %v2431_v40 = vadd.f32 %v2430_v38, %v2335_v28  ;;  %v2445_v41 = vadd.f32 %v2444_v39, %v2336_v1  ;;  %v2463_v42 = vadd.f32 %v2459_v27, %v2429_v30  ;;  %v2464_v32 = vadd.f32 %v2460_v37, %v2443_v31  ;;  %v3641_v27 = vld [vmem:[#allocation8 + $0x8] sm:$0xff]  ;;  %v3640_v39 = vld [vmem:[#allocation8] sm:$0xff] }
0x1047   :  { %v2453_v43 = vmul.f32 0.044715, %v2431_v40  ;;  %v2454_v44 = vmul.f32 0.044715, %v2445_v41  ;;  %v2467_v10 = vmul.f32 0.7978846, %v2463_v42 }
0x1048   :  { %v2468_v54 = vmul.f32 0.7978846, %v2464_v32  ;;  %v2449_v60 = vmul.f32 0.5, %v2431_v40  ;;  %v2450_v0 = vmul.f32 0.5, %v2445_v41 }
0x1049   :  { %v2457_v46 = vmul.f32 %v2453_v43, %v2431_v40  ;;  %v2458_v47 = vmul.f32 %v2454_v44, %v2445_v41  ;;  %3776 = vtanh.f32 %v2467_v10  ;;  %v3654_v43 = vld [vmem:[#allocation10 + $0x30] sm:$0xff] }
0x104a   :  { %3778 = vtanh.f32 %v2468_v54 }
0x104b   :  { %v2461_v17 = vmul.f32 %v2457_v46, %v2431_v40  ;;  %v2462_v55 = vmul.f32 %v2458_v47, %v2445_v41  ;;  %v3653_v47 = vld [vmem:[#allocation10 + $0x28] sm:$0xff] }
0x104d   :  { %v2465_v50 = vadd.f32 %v2461_v17, %v2431_v40  ;;  %v2466_v4 = vadd.f32 %v2462_v55, %v2445_v41  ;;  %v3655_v41 = vld [vmem:[#allocation10 + $0x38] sm:$0xff] }
0x104e   :  { %2857 = vmatpush.bf16.msra.mxu3 %v3655_v41 }
0x104f   :  { %v2469_v51 = vmul.f32 0.7978846, %v2465_v50  ;;  %v2470_v6 = vmul.f32 0.7978846, %v2466_v4  ;;  %v3777_v7 = vpop.eup %3776 }
0x1050   :  { %v3779_v53 = vpop.eup %3778  ;;  %v2475_v11 = vadd.f32 1.0, %v3777_v7 }
0x1051   :  { %3780 = vtanh.f32 %v2469_v51  ;;  %v2476_v57 = vadd.f32 1.0, %v3779_v53 }
0x1052   :  { %3782 = vtanh.f32 %v2470_v6  ;;  %v2479_v3 = vmul.f32 %v2475_v11, %v2447_v59  ;;  %2858 = vmatpush.bf16.msra.mxu3 %v3654_v43 }
0x1053   :  { %v2480_v25 = vmul.f32 %v2476_v57, %v2448_v62 }
0x1056   :  { %2859 = vmatpush.bf16.msra.mxu3 %v3653_v47 }
0x1057   :  { %v3781_v56 = vpop.eup %3780 }
0x1058   :  { %v3783_v58 = vpop.eup %3782  ;;  %v2477_v61 = vadd.f32 1.0, %v3781_v56  ;;  %v3682_v56 = vld [vmem:[%s4532_s14 + $0x1] ss:$0 sm:$0xff] }
0x1059   :  { %v2478_v45 = vadd.f32 1.0, %v3783_v58 }
0x105a   :  { %v2481_v49 = vmul.f32 %v2477_v61, %v2449_v60  ;;  %v3683_v61 = vld [vmem:[%s4533_s15 + $0x1] ss:$0 sm:$0xff] }
0x105b   :  { %v2482_v12 = vmul.f32 %v2478_v45, %v2450_v0 }
0x105c   :  { %v2483_v52 = vpack.c.bf16 %v2481_v49, %v2479_v3  ;;  %v3652_v49 = vld [vmem:[#allocation10 + $0x20] sm:$0xff] }
0x105d   :  { %v2484_v13 = vpack.c.bf16 %v2482_v12, %v2480_v25  ;;  %2860 = vmatpush.bf16.msra.mxu3 %v3652_v49  ;;  %v3651_v25 = vld [vmem:[#allocation10 + $0x18] sm:$0xff]  ;;  %v3650_v12 = vld [vmem:[#allocation10 + $0x10] sm:$0xff] }
0x105e   :  { %2627 = vmatmul.bf16.vlgmr.msra.gmra.mxu0 %v2483_v52  ;;  %v3649_v52 = vld [vmem:[#allocation10 + $0x8] sm:$0xff] }
0x105f   :  { %2641 = vmatmul.bf16.vlgmr.msrb.gmra.mxu1 %v2484_v13  ;;  %v3648_v13 = vld [vmem:[#allocation10] sm:$0xff] }
0x1061   :  { %2861 = vmatpush.bf16.msra.mxu3 %v3651_v25 }
0x1065   :  { %2862 = vmatpush.bf16.msra.mxu3 %v3650_v12 }
0x1069   :  { %2863 = vmatpush.bf16.msra.mxu3 %v3649_v52 }
0x106d   :  { %2864 = vmatpush.bf16.msra.mxu3 %v3648_v13 }
0x10db   :  { %v2628_v16 = vpop.f32.mrf.mxu0 }
0x10dc   :  { %v2629_v15 = vadd.f32 %v3681_v14, %v2628_v16  ;;  %v2642_v63 = vpop.f32.mrf.mxu1  ;;  %v3684_v16 = vld [vmem:[%s4535_s17] ss:$0 sm:$0xff] }
0x10de   :  { %v2643_v18 = vadd.f32 %v2642_v63, %v2629_v15 }
0x10e0   :  { %v2647_v19 = vadd.f32 %v2643_v18, %v4482_v5  ;;  %v3647_v5 = vld [vmem:[#allocation8 + $0x38] sm:$0xff] }
0x10e1   :  { %2772 = vmatpush.bf16.msrb.mxu2 %v3647_v5 }
0x10e2   :  { %2653 = vadd.xlane.f32.xlu1 %v2647_v19 }
0x10e3   :  { %v2630_v20 = vpop.f32.mrf.mxu0 }
0x10e4   :  { %v2631_v21 = vadd.f32 %v3681_v14, %v2630_v20  ;;  %v2644_v23 = vpop.f32.mrf.mxu1 }
0x10e5   :  { %2773 = vmatpush.bf16.msrb.mxu2 %v3646_v33 }
0x10e6   :  { %v2645_v24 = vadd.f32 %v2644_v23, %v2631_v21  ;;  %v3685_v23 = vld [vmem:[%s4537_s19] ss:$0 sm:$0xff] }
0x10e8   :  { %v2648_v26 = vadd.f32 %v2645_v24, %v4484_v48  ;;  %v3644_v48 = vld [vmem:[#allocation8 + $0x20] sm:$0xff] }
0x10e9   :  { %2774 = vmatpush.bf16.msrb.mxu2 %v3645_v34 }
0x10ea   :  { %2655 = vadd.xlane.f32.xlu0 %v2648_v26 }
0x10ed   :  { %2775 = vmatpush.bf16.msrb.mxu2 %v3644_v48 }
0x10f1   :  { %2776 = vmatpush.bf16.msrb.mxu2 %v3643_v35 }
0x10f5   :  { %2777 = vmatpush.bf16.msrb.mxu2 %v3642_v36 }
0x10f9   :  { %2778 = vmatpush.bf16.msrb.mxu2 %v3641_v27 }
0x10fd   :  { %2779 = vmatpush.bf16.msrb.mxu2 %v3640_v39 }
0x1155   :  { %v2654_v28 = vpop.xlane.xlu1 %2653 }
0x1156   :  { %v2657_v1 = vmul.f32 %v2654_v28, %v4064_v8 }
0x1158   :  { %v2659_v22 = vsub.f32 %v2647_v19, %v2657_v1 }
0x115a   :  { %v2661_v2 = vmul.f32 %v2659_v22, %v2659_v22 }
0x115c   :  { %2663 = vadd.xlane.f32.xlu2 %v2661_v2 }
0x115d   :  { %v2656_v29 = vpop.xlane.xlu0 %2655 }
0x115e   :  { %v2658_v9 = vmul.f32 %v2656_v29, %v4064_v8 }
0x1160   :  { %v2660_v30 = vsub.f32 %v2648_v26, %v2658_v9 }
0x1162   :  { %v2662_v31 = vmul.f32 %v2660_v30, %v2660_v30 }
0x1164   :  { %2665 = vadd.xlane.f32.xlu1 %v2662_v31 }
0x11cf   :  { %v2664_v37 = vpop.xlane.xlu2 %2663 }
0x11d0   :  { %v2667_v38 = vmul.f32 %v2664_v37, %v4064_v8 }
0x11d2   :  { %v2669_v40 = vadd.f32 1e-12, %v2667_v38 }
0x11d4   :  { %3784 = vrsqrt.f32 %v2669_v40  ;;  %vm2677_vm0 = vweird.f32 %v2669_v40 }
0x11d7   :  { %v2666_v42 = vpop.xlane.xlu1 %2665 }
0x11d8   :  { %v2668_v32 = vmul.f32 %v2666_v42, %v4064_v8 }
0x11da   :  { %v3785_v44 = vpop.eup %3784  ;;  %v2670_v10 = vadd.f32 1e-12, %v2668_v32 }
0x11db   :  { %v2672_v46 = vmul.f32 %v3785_v44, %v2669_v40  ;;  %vm2678_vm15 = vweird.f32 %v3785_v44 }
0x11dc   :  { %3786 = vrsqrt.f32 %v2670_v10  ;;  %vm2679_vm1 = vmor %vm2677_vm0, %vm2678_vm15  ;;  %vm2687_vm3 = vweird.f32 %v2670_v10 }
0x11dd   :  { %v2673_v54 = vmul.f32 %v3785_v44, %v2672_v46 }
0x11df   :  { %v2674_v17 = vmul.f32 0.5, %v2673_v54 }
0x11e1   :  { %v2675_v55 = vsub.f32 1.5, %v2674_v17 }
0x11e2   :  { %v3787_v50 = vpop.eup %3786 }
0x11e3   :  { %v2676_v4 = vmul.f32 %v3785_v44, %v2675_v55  ;;  %v2682_v51 = vmul.f32 %v3787_v50, %v2670_v10  ;;  %vm2688_vm2 = vweird.f32 %v3787_v50 }
0x11e4   :  { %vm2689_vm4 = vmor %vm2687_vm3, %vm2688_vm2 }
0x11e5   :  { %v2683_v6 = vmul.f32 %v3787_v50, %v2682_v51  ;;  %v2680_v8 = vsel %vm2679_vm1, %v3785_v44, %v2676_v4 }
0x11e6   :  { %v2691_v11 = vmul.f32 %v2680_v8, %v2659_v22 }
0x11e7   :  { %v2684_v7 = vmul.f32 0.5, %v2683_v6 }
0x11e8   :  { %v2696_v60 = vmul.f32 %v3682_v56, %v2691_v11 }
0x11e9   :  { %v2685_v53 = vsub.f32 1.5, %v2684_v7 }
0x11ea   :  { %v2701_v0 = vadd.f32 %v3683_v61, %v2696_v60 }
0x11eb   :  { %v2686_v57 = vmul.f32 %v3787_v50, %v2685_v53 }
0x11ed   :  { %v2690_v58 = vsel %vm2689_vm4, %v3787_v50, %v2686_v57 }
0x11ee   :  { %v2692_v59 = vmul.f32 %v2690_v58, %v2660_v30 }
0x11f0   :  { %v2697_v62 = vmul.f32 %v3682_v56, %v2692_v59 }
0x11f2   :  { %v2702_v45 = vadd.f32 %v3683_v61, %v2697_v62 }
0x11f4   :  { %v2703_v3 = vpack.c.bf16 %v2702_v45, %v2701_v0 }
0x11f6   :  { %2780 = vmatmul.bf16.vlgmr.msrb.gmra.mxu2 %v2703_v3 }
0x1279   :  { %v2781_v14 = vpop.f32.mrf.mxu2 }
0x127a   :  { %v2782_v15 = vadd.f32 %v3684_v16, %v2781_v14 }
0x127c   :  { %3788 = vtanh.f32 %v2782_v15 }
0x1281   :  { %v2783_v63 = vpop.f32.mrf.mxu2 }
0x1282   :  { %v2784_v18 = vadd.f32 %v3684_v16, %v2783_v63  ;;  %v3789_v19 = vpop.eup %3788 }
0x1284   :  { %3790 = vtanh.f32 %v2784_v18 }
0x128a   :  { %v3791_v20 = vpop.eup %3790 }
0x128b   :  { %v2788_v21 = vpack.c.bf16 %v3791_v20, %v3789_v19 }
0x128d   :  { %2865 = vmatmul.bf16.vlgmr.msra.gmra.mxu3 %v2788_v21 }
0x1310   :  { %v2866_v24 = vpop.f32.mrf.mxu3 }
0x1311   :  { %v2867_v26 = vadd.f32 %v3685_v23, %v2866_v24 }
0x1313   :  { %2871 = vst [vmem:[%s4538_s20] sm:$0xff] %v2867_v26 }
0x1318   :  { %v2868_v28 = vpop.f32.mrf.mxu3 }
0x1319   :  { %v2869_v1 = vadd.f32 %v3685_v23, %v2868_v28 }
0x131b   :  { %2872 = vst [vmem:[%s4538_s20 + $0x8] sm:$0xff] %v2869_v1 }
0x131c   :  { %2877 = vsyncpa [#allocation4], 1 }
0x131d   :  { %2878 = vsyncpa [#allocation6], 1 }
0x131e   :  { %2879 = vsyncpa [#allocation9], 1 }

</bundles_post_ra>
